<compile_context>
chip_gen: v5e
topology: v5e:2x2
jax: 0.10.0
libtpu: 0.0.40
codegen_flags: <defaults>
</compile_context>

<pallas_src>
import math
import functools

import jax
import jax.numpy as jnp
from jax import lax
from jax.experimental import pallas as pl
from jax.experimental.pallas import tpu as pltpu


def _attention_block_kernel(x_ref, wqkv_ref, wproj_ref, bproj_ref,
                            gamma_ref, beta_ref, o_ref,
                            xn_ref, hbuf_ref, qkv_ref,
                            *, num_heads, num_groups, eps, q_tile):
    h_idx = pl.program_id(1)

    C, T = xn_ref.shape
    G = num_groups
    Cg = C // G
    nh = num_heads
    Cph = C // nh

    # ---- once per batch element: GroupNorm into a reused bf16 scratch -----
    @pl.when(h_idx == 0)
    def _():
        x = x_ref[0]                                        # (C, T) f32
        inv_n = 1.0 / (Cg * T)
        # Lane-dense stats: reduce over lanes per channel first, then combine
        # the tiny per-channel columns within each group (two-pass variance,
        # no E[x^2]-mean^2 cancellation).
        s1 = jnp.sum(x, axis=-1, keepdims=True)             # (C, 1)
        g1 = jnp.sum(s1.reshape(G, Cg, 1), axis=1, keepdims=True)
        mean_c = jnp.broadcast_to(g1 * inv_n, (G, Cg, 1)).reshape(C, 1)
        d = x - mean_c
        s2 = jnp.sum(d * d, axis=-1, keepdims=True)         # (C, 1)
        g2 = jnp.sum(s2.reshape(G, Cg, 1), axis=1, keepdims=True)
        rstd_c = jnp.broadcast_to(lax.rsqrt(g2 * inv_n + eps),
                                  (G, Cg, 1)).reshape(C, 1)
        xn = d * rstd_c * gamma_ref[...] + beta_ref[...]
        xn_ref[...] = xn.astype(jnp.bfloat16)

    # ---- per (batch, head): qkv matmul (softmax scale pre-folded) ---------
    xn = xn_ref[...]                                        # (C, T) bf16
    # (3*Cph, C) @ (C, T) -> (3*Cph, T); bf16 operands, f32 accumulation.
    qkv_ref[...] = jnp.dot(wqkv_ref[h_idx], xn,
                           preferred_element_type=jnp.float32
                           ).astype(jnp.bfloat16)
    k = qkv_ref[Cph:2 * Cph, :]                             # (Cph, T) bf16
    v = qkv_ref[2 * Cph:3 * Cph, :]                         # (Cph, T) bf16

    row0 = pl.multiple_of(h_idx * Cph, Cph)
    is_last = h_idx == nh - 1
    n_q_tiles = T // q_tile

    def q_tile_body(i, carry):
        start = i * q_tile
        if not isinstance(start, int):
            start = pl.multiple_of(start, q_tile)
        sl = pl.ds(start, q_tile)
        q_t = qkv_ref[0:Cph, sl]                            # (Cph, TQ) bf16
        # attn[t, s] = sum_c q[c, t] * k[c, s]   (no explicit transposes)
        attn = lax.dot_general(q_t, k, (((0,), (0,)), ((), ())),
                               preferred_element_type=jnp.float32)  # (TQ, T)
        attn = attn - jnp.max(attn, axis=-1, keepdims=True)
        p = jnp.exp(attn)
        p = p * pl.reciprocal(jnp.sum(p, axis=-1, keepdims=True), approx=True)
        # h_out[c, t] = sum_s v[c, s] * p[t, s]
        h_t = lax.dot_general(v, p.astype(jnp.bfloat16),
                              (((1,), (1,)), ((), ())),
                              preferred_element_type=jnp.float32)   # (Cph, TQ)
        # Pure bf16 store of this head's pre-projection rows (no f32 RMW).
        hbuf_ref[pl.ds(row0, Cph), sl] = h_t.astype(jnp.bfloat16)

        # Last head: all heads' rows for this column block are in place ->
        # single output projection with full K=C MXU depth, fused with the
        # residual and the proj bias; one f32 write pass over the output.
        @pl.when(is_last)
        def _():
            hcol = hbuf_ref[:, sl]                          # (C, TQ) bf16
            y = jnp.dot(wproj_ref[...], hcol,
                        preferred_element_type=jnp.float32)  # (C, TQ)
            o_ref[0, :, sl] = x_ref[0, :, sl] + bproj_ref[...] + y

        return carry

    if n_q_tiles <= 2:
        for i in range(n_q_tiles):          # short loop: full unroll is fine
            q_tile_body(i, 0)
    else:
        lax.fori_loop(0, n_q_tiles, q_tile_body, 0)  # bound live ranges


def _pick_q_tile(T):
    for cand in (512, 256, 128):
        if T % cand == 0:
            # Bound the (q_tile, T) f32 attention slabs to ~8 MiB so the
            # kernel also fits v7x's 64 MiB VMEM at large resolutions.
            while cand > 128 and cand * T * 4 > 8 * 1024 * 1024:
                cand //= 2
            return cand
    # TODO(synk): pad T to a multiple of 128 (masking padded key columns)
    # instead of materializing a full (T, T) slab for unaligned resolutions.
    return T


def _vmem_limit_bytes(C, T, Cph, nh, q_tile):
    f32, bf16 = 4, 2
    need = 0
    need += 2 * C * T * f32                   # x input block (double-buffered)
    need += 2 * C * T * f32                   # f32 output block (buffered)
    need += 2 * (3 * C * C + C * C) * bf16    # resident qkv + proj weights
    need += C * T * bf16                      # xn scratch
    need += C * T * bf16                      # pre-proj head-output scratch
    need += 3 * Cph * T * (bf16 + f32)        # qkv scratch + transient f32 dot
    need += 2 * q_tile * T * f32              # attn / p slabs
    need += 2 * C * q_tile * f32              # proj tile + residual tile
    need = int(need * 1.3) + (4 << 20)        # headroom for compiler temps
    try:
        cap = int(pltpu.get_tpu_info().vmem_capacity_bytes) * 3 // 4
    except Exception:
        cap = 96 << 20
    cap = max(cap, 32 << 20)
    return min(max(need, 32 << 20), cap)


def attention_block_pallas(x_nchw, wqkv, wproj, bproj, gamma, beta,
                           *, num_heads, num_groups, eps=1e-5):
    B, C, H, W = x_nchw.shape
    T = H * W
    nh = num_heads
    assert C % nh == 0 and C % num_groups == 0
    Cph = C // nh

    x = x_nchw.reshape(B, C, T).astype(jnp.float32)

    # Fold the softmax scale (applied to both q and k in the module) into the
    # q/k rows of the (bias-free) qkv weight; split weights per head; bf16.
    scale = 1.0 / math.sqrt(math.sqrt(Cph))
    row_scale = jnp.concatenate([
        jnp.full((2 * Cph,), scale, jnp.float32),
        jnp.ones((Cph,), jnp.float32)])
    wqkv_heads = (wqkv.astype(jnp.float32).reshape(nh, 3 * Cph, C)
                  * row_scale[None, :, None]).astype(jnp.bfloat16)
    wproj_bf16 = wproj.astype(jnp.bfloat16)       # full (C, C) for K=C proj

    q_tile = _pick_q_tile(T)

    kernel = functools.partial(_attention_block_kernel, num_heads=nh,
                               num_groups=num_groups, eps=eps, q_tile=q_tile)

    out = pl.pallas_call(
        kernel,
        out_shape=jax.ShapeDtypeStruct((B, C, T), jnp.float32),
        grid_spec=pltpu.PrefetchScalarGridSpec(
            num_scalar_prefetch=0,
            grid=(B, nh),
            in_specs=[
                pl.BlockSpec((1, C, T), lambda b, h: (b, 0, 0)),          # x
                pl.BlockSpec((nh, 3 * Cph, C), lambda b, h: (0, 0, 0)),   # W_qkv (all heads, resident)
                pl.BlockSpec((C, C), lambda b, h: (0, 0)),                # W_proj (resident)
                pl.BlockSpec((C, 1), lambda b, h: (0, 0)),                # b_proj
                pl.BlockSpec((C, 1), lambda b, h: (0, 0)),                # gamma
                pl.BlockSpec((C, 1), lambda b, h: (0, 0)),                # beta
            ],
            out_specs=pl.BlockSpec((1, C, T), lambda b, h: (b, 0, 0)),
            scratch_shapes=[
                pltpu.VMEM((C, T), jnp.bfloat16),        # normalized x
                pltpu.VMEM((C, T), jnp.bfloat16),        # pre-proj head outputs
                pltpu.VMEM((3 * Cph, T), jnp.bfloat16),  # per-head qkv
            ]),
        compiler_params=pltpu.CompilerParams(
            dimension_semantics=("parallel", "arbitrary"),
            vmem_limit_bytes=_vmem_limit_bytes(C, T, Cph, nh, q_tile)),
    )(x, wqkv_heads, wproj_bf16,
      bproj.reshape(C, 1).astype(jnp.float32),
      gamma.reshape(C, 1).astype(jnp.float32),
      beta.reshape(C, 1).astype(jnp.float32))

    return out.reshape(B, C, H, W)


def attention_block_reference(x_nchw, wqkv, wproj, bproj, gamma, beta,
                              *, num_heads, num_groups, eps=1e-5):
    """Pure-JAX f32 mirror of the PyTorch forward (for validation)."""
    B, C, H, W = x_nchw.shape
    T = H * W
    x = x_nchw.reshape(B, C, T).astype(jnp.float32)

    # GroupNorm
    xg = x.reshape(B, num_groups, C // num_groups, T)
    mean = jnp.mean(xg, axis=(2, 3), keepdims=True)
    var = jnp.var(xg, axis=(2, 3), keepdims=True)
    xn = ((xg - mean) / jnp.sqrt(var + eps)).reshape(B, C, T)
    xn = xn * gamma[None, :, None] + beta[None, :, None]

    qkv = jnp.einsum('oc,bct->bot', wqkv, xn)                 # (B, 3C, T)
    nh = num_heads
    qkv = qkv.reshape(B * nh, 3 * C // nh, T)
    Cph = C // nh
    q, k, v = qkv[:, :Cph], qkv[:, Cph:2 * Cph], qkv[:, 2 * Cph:]
    scale = 1.0 / math.sqrt(math.sqrt(Cph))
    attn = jnp.einsum('bct,bcs->bts', q * scale, k * scale)
    attn = jax.nn.softmax(attn, axis=-1)
    h = jnp.einsum('bts,bcs->bct', attn, v)
    h = h.reshape(B, C, T)
    y = jnp.einsum('oc,bct->bot', wproj, h) + bproj[None, :, None] + x
    return y.reshape(B, C, H, W)


if __name__ == "__main__":
    # Small shapes consistent with the module: channels divisible by num_heads
    # and by the GroupNorm group count (32); H*W a multiple of 128 so the
    # output lane dimension is dense.
    B, C, H, W = 2, 64, 16, 16
    num_heads = 2
    num_groups = 32     # norm_layer(channels) == nn.GroupNorm(32, channels)

    key = jax.random.PRNGKey(0)
    kx, kq, kp, kb, kg, kbe = jax.random.split(key, 6)

    x = jax.random.normal(kx, (B, C, H, W), dtype=jnp.float32)
    wqkv = jax.random.normal(kq, (3 * C, C), dtype=jnp.float32) * 0.05
    wproj = jax.random.normal(kp, (C, C), dtype=jnp.float32) * 0.05
    bproj = jax.random.normal(kb, (C,), dtype=jnp.float32) * 0.05
    gamma = 1.0 + 0.1 * jax.random.normal(kg, (C,), dtype=jnp.float32)
    beta = 0.1 * jax.random.normal(kbe, (C,), dtype=jnp.float32)

    out = attention_block_pallas(x, wqkv, wproj, bproj, gamma, beta,
                                 num_heads=num_heads, num_groups=num_groups)
    out = jax.block_until_ready(out)

    ref = attention_block_reference(x, wqkv, wproj, bproj, gamma, beta,
                                    num_heads=num_heads,
                                    num_groups=num_groups)

    assert out.shape == (B, C, H, W)
    # Kernel uses bf16 MXU operands with f32 accumulation; compare against the
    # f32 reference with a correspondingly loosened tolerance.
    max_err = float(jnp.max(jnp.abs(out - ref)))
    assert jnp.allclose(out, ref, atol=2e-2, rtol=2e-2), max_err
    print("KERNEL_OK")
</pallas_src>

<mosaic_0001>
module attributes {stable_mosaic.version = 11 : i64} {
  func.func @_attention_block_kernel(%arg0: i32, %arg1: i32, %arg2: memref<1x64x256xf32, #tpu.memory_space<vmem>>, %arg3: memref<2x96x64xbf16, #tpu.memory_space<vmem>>, %arg4: memref<64x64xbf16, #tpu.memory_space<vmem>>, %arg5: memref<64x1xf32, #tpu.memory_space<vmem>>, %arg6: memref<64x1xf32, #tpu.memory_space<vmem>>, %arg7: memref<64x1xf32, #tpu.memory_space<vmem>>, %arg8: memref<1x64x256xf32, #tpu.memory_space<vmem>>, %arg9: memref<64x256xbf16, #tpu.memory_space<vmem>>, %arg10: memref<64x256xbf16, #tpu.memory_space<vmem>>, %arg11: memref<96x256xbf16, #tpu.memory_space<vmem>>) attributes {dimension_semantics = [#tpu.dimension_semantics<parallel>, #tpu.dimension_semantics<arbitrary>], iteration_bounds = array<i64: 2, 2>, scalar_prefetch = 0 : i64, scratch_operands = 3 : i64, tpu.core_type = #tpu.core_type<tc>, window_params = [{transform_indices = @transform_0, window_bounds = array<i64: 1, 64, 256>}, {pipeline_mode = #tpu.pipeline_mode<synchronous>, transform_indices = @transform_1, window_bounds = array<i64: 2, 96, 64>}, {pipeline_mode = #tpu.pipeline_mode<synchronous>, transform_indices = @transform_2, window_bounds = array<i64: 64, 64>}, {pipeline_mode = #tpu.pipeline_mode<synchronous>, transform_indices = @transform_3, window_bounds = array<i64: 64, 1>}, {pipeline_mode = #tpu.pipeline_mode<synchronous>, transform_indices = @transform_4, window_bounds = array<i64: 64, 1>}, {pipeline_mode = #tpu.pipeline_mode<synchronous>, transform_indices = @transform_5, window_bounds = array<i64: 64, 1>}, {transform_indices = @transform_6, window_bounds = array<i64: 1, 64, 256>}]} {
    %c0_i32 = arith.constant 0 : i32
    %0 = arith.cmpi eq, %arg1, %c0_i32 : i32
    %1 = arith.extui %0 : i1 to i32
    %c0_i32_0 = arith.constant 0 : i32
    %2 = arith.cmpi ne, %1, %c0_i32_0 : i32
    scf.if %2 {
      %c0_16 = arith.constant 0 : index
      %c0_17 = arith.constant 0 : index
      %c0_18 = arith.constant 0 : index
      %34 = vector.load %arg2[%c0_16, %c0_17, %c0_18] : memref<1x64x256xf32, #tpu.memory_space<vmem>>, vector<1x64x256xf32>
      %35 = vector.shape_cast %34 : vector<1x64x256xf32> to vector<64x256xf32>
      %cst_19 = arith.constant dense<0.000000e+00> : vector<64xf32>
      %36 = vector.multi_reduction <add>, %35, %cst_19 [1] : vector<64x256xf32> to vector<64xf32>
      %37 = vector.shape_cast %36 : vector<64xf32> to vector<64x1xf32>
      %38 = vector.shape_cast %37 : vector<64x1xf32> to vector<32x2x1xf32>
      %cst_20 = arith.constant dense<0.000000e+00> : vector<32x1xf32>
      %39 = vector.multi_reduction <add>, %38, %cst_20 [1] : vector<32x2x1xf32> to vector<32x1xf32>
      %40 = vector.shape_cast %39 : vector<32x1xf32> to vector<32x1x1xf32>
      %cst_21 = arith.constant 0.001953125 : f32
      %41 = vector.broadcast %cst_21 : f32 to vector<32x1x1xf32>
      %42 = arith.mulf %40, %41 : vector<32x1x1xf32>
      %43 = vector.shape_cast %42 : vector<32x1x1xf32> to vector<32x1x1xf32>
      %44 = vector.broadcast %43 : vector<32x1x1xf32> to vector<32x2x1xf32>
      %45 = vector.shape_cast %44 : vector<32x2x1xf32> to vector<64x1xf32>
      %46 = vector.broadcast %45 : vector<64x1xf32> to vector<64x256xf32>
      %47 = arith.subf %35, %46 : vector<64x256xf32>
      %48 = arith.mulf %47, %47 : vector<64x256xf32>
      %cst_22 = arith.constant dense<0.000000e+00> : vector<64xf32>
      %49 = vector.multi_reduction <add>, %48, %cst_22 [1] : vector<64x256xf32> to vector<64xf32>
      %50 = vector.shape_cast %49 : vector<64xf32> to vector<64x1xf32>
      %51 = vector.shape_cast %50 : vector<64x1xf32> to vector<32x2x1xf32>
      %cst_23 = arith.constant dense<0.000000e+00> : vector<32x1xf32>
      %52 = vector.multi_reduction <add>, %51, %cst_23 [1] : vector<32x2x1xf32> to vector<32x1xf32>
      %53 = vector.shape_cast %52 : vector<32x1xf32> to vector<32x1x1xf32>
      %cst_24 = arith.constant 0.001953125 : f32
      %54 = vector.broadcast %cst_24 : f32 to vector<32x1x1xf32>
      %55 = arith.mulf %53, %54 : vector<32x1x1xf32>
      %cst_25 = arith.constant 9.99999974E-6 : f32
      %56 = vector.broadcast %cst_25 : f32 to vector<32x1x1xf32>
      %57 = arith.addf %55, %56 : vector<32x1x1xf32>
      %58 = math.rsqrt %57 : vector<32x1x1xf32>
      %59 = vector.shape_cast %58 : vector<32x1x1xf32> to vector<32x1x1xf32>
      %60 = vector.broadcast %59 : vector<32x1x1xf32> to vector<32x2x1xf32>
      %61 = vector.shape_cast %60 : vector<32x2x1xf32> to vector<64x1xf32>
      %62 = vector.broadcast %61 : vector<64x1xf32> to vector<64x256xf32>
      %63 = arith.mulf %47, %62 : vector<64x256xf32>
      %c0_26 = arith.constant 0 : index
      %c0_27 = arith.constant 0 : index
      %64 = vector.load %arg6[%c0_26, %c0_27] : memref<64x1xf32, #tpu.memory_space<vmem>>, vector<64x1xf32>
      %65 = vector.broadcast %64 : vector<64x1xf32> to vector<64x256xf32>
      %66 = arith.mulf %63, %65 : vector<64x256xf32>
      %c0_28 = arith.constant 0 : index
      %c0_29 = arith.constant 0 : index
      %67 = vector.load %arg7[%c0_28, %c0_29] : memref<64x1xf32, #tpu.memory_space<vmem>>, vector<64x1xf32>
      %68 = vector.broadcast %67 : vector<64x1xf32> to vector<64x256xf32>
      %69 = arith.addf %66, %68 : vector<64x256xf32>
      %70 = arith.truncf %69 : vector<64x256xf32> to vector<64x256xbf16>
      %c0_30 = arith.constant 0 : index
      %c0_31 = arith.constant 0 : index
      %71 = vector.load %arg9[%c0_30, %c0_31] : memref<64x256xbf16, #tpu.memory_space<vmem>>, vector<64x256xbf16>
      tpu.vector_store %arg9[%c0_30, %c0_31], %70 {strides = array<i32>} : memref<64x256xbf16, #tpu.memory_space<vmem>>, vector<64x256xbf16>,
    } else {
    }
    %c0 = arith.constant 0 : index
    %c0_1 = arith.constant 0 : index
    %3 = vector.load %arg9[%c0, %c0_1] : memref<64x256xbf16, #tpu.memory_space<vmem>>, vector<64x256xbf16>
    %4 = arith.index_cast %arg1 : i32 to index
    %c0_2 = arith.constant 0 : index
    %c0_3 = arith.constant 0 : index
    %5 = vector.load %arg3[%4, %c0_2, %c0_3] : memref<2x96x64xbf16, #tpu.memory_space<vmem>>, vector<1x96x64xbf16>
    %6 = vector.shape_cast %5 : vector<1x96x64xbf16> to vector<96x64xbf16>
    %cst = arith.constant dense<0.000000e+00> : vector<96x256xf32>
    %7 = tpu.matmul %6, %3, %cst {dimension_numbers = #tpu.dot_dimension_numbers<[1], [0], [0], [1], [0, 0, 1, 1], [], []>} : vector<96x64xbf16>, vector<64x256xbf16>, vector<96x256xf32> -> vector<96x256xf32>
    %8 = arith.truncf %7 : vector<96x256xf32> to vector<96x256xbf16>
    %c0_4 = arith.constant 0 : index
    %c0_5 = arith.constant 0 : index
    %9 = vector.load %arg11[%c0_4, %c0_5] : memref<96x256xbf16, #tpu.memory_space<vmem>>, vector<96x256xbf16>
    tpu.vector_store %arg11[%c0_4, %c0_5], %8 {strides = array<i32>} : memref<96x256xbf16, #tpu.memory_space<vmem>>, vector<96x256xbf16>,
    %c32 = arith.constant 32 : index
    %c0_6 = arith.constant 0 : index
    %10 = vector.load %arg11[%c32, %c0_6] : memref<96x256xbf16, #tpu.memory_space<vmem>>, vector<32x256xbf16>
    %c64 = arith.constant 64 : index
    %c0_7 = arith.constant 0 : index
    %11 = vector.load %arg11[%c64, %c0_7] : memref<96x256xbf16, #tpu.memory_space<vmem>>, vector<32x256xbf16>
    %c32_i32 = arith.constant 32 : i32
    %12 = arith.muli %arg1, %c32_i32 : i32
    %13 = tpu.assume_multiple %12, 32 : i32
    %c1_i32 = arith.constant 1 : i32
    %14 = arith.cmpi eq, %arg1, %c1_i32 : i32
    %c0_8 = arith.constant 0 : index
    %c0_9 = arith.constant 0 : index
    %15 = vector.load %arg11[%c0_8, %c0_9] : memref<96x256xbf16, #tpu.memory_space<vmem>>, vector<32x256xbf16>
    %cst_10 = arith.constant dense<0.000000e+00> : vector<256x256xf32>
    %16 = tpu.matmul %15, %10, %cst_10 {dimension_numbers = #tpu.dot_dimension_numbers<[0], [0], [1], [1], [0, 1, 1, 1], [], []>} : vector<32x256xbf16>, vector<32x256xbf16>, vector<256x256xf32> -> vector<256x256xf32>
    %cst_11 = arith.constant dense<0xFF800000> : vector<256xf32>
    %17 = vector.multi_reduction <maximumf>, %16, %cst_11 [1] : vector<256x256xf32> to vector<256xf32>
    %18 = vector.shape_cast %17 : vector<256xf32> to vector<256x1xf32>
    %19 = vector.broadcast %18 : vector<256x1xf32> to vector<256x256xf32>
    %20 = arith.subf %16, %19 : vector<256x256xf32>
    %21 = math.exp %20 : vector<256x256xf32>
    %cst_12 = arith.constant dense<0.000000e+00> : vector<256xf32>
    %22 = vector.multi_reduction <add>, %21, %cst_12 [1] : vector<256x256xf32> to vector<256xf32>
    %23 = vector.shape_cast %22 : vector<256xf32> to vector<256x1xf32>
    %24 = tpu.reciprocal %23 {approx = true} : vector<256x1xf32> -> vector<256x1xf32>
    %25 = vector.broadcast %24 : vector<256x1xf32> to vector<256x256xf32>
    %26 = arith.mulf %21, %25 : vector<256x256xf32>
    %27 = arith.truncf %26 : vector<256x256xf32> to vector<256x256xbf16>
    %cst_13 = arith.constant dense<0.000000e+00> : vector<32x256xf32>
    %28 = tpu.matmul %11, %27, %cst_13 {dimension_numbers = #tpu.dot_dimension_numbers<[1], [1], [0], [0], [0, 0, 1, 0], [], []>} : vector<32x256xbf16>, vector<256x256xbf16>, vector<32x256xf32> -> vector<32x256xf32>
    %29 = arith.truncf %28 : vector<32x256xf32> to vector<32x256xbf16>
    %30 = arith.index_cast %13 : i32 to index
    %c0_14 = arith.constant 0 : index
    %31 = vector.load %arg10[%30, %c0_14] : memref<64x256xbf16, #tpu.memory_space<vmem>>, vector<32x256xbf16>
    tpu.vector_store %arg10[%30, %c0_14], %29 {strides = array<i32>} : memref<64x256xbf16, #tpu.memory_space<vmem>>, vector<32x256xbf16>,
    %32 = arith.extui %14 : i1 to i32
    %c0_i32_15 = arith.constant 0 : i32
    %33 = arith.cmpi ne, %32, %c0_i32_15 : i32
    scf.if %33 {
      %c0_16 = arith.constant 0 : index
      %c0_17 = arith.constant 0 : index
      %34 = vector.load %arg10[%c0_16, %c0_17] : memref<64x256xbf16, #tpu.memory_space<vmem>>, vector<64x256xbf16>
      %c0_18 = arith.constant 0 : index
      %c0_19 = arith.constant 0 : index
      %35 = vector.load %arg4[%c0_18, %c0_19] : memref<64x64xbf16, #tpu.memory_space<vmem>>, vector<64x64xbf16>
      %cst_20 = arith.constant dense<0.000000e+00> : vector<64x256xf32>
      %36 = tpu.matmul %35, %34, %cst_20 {dimension_numbers = #tpu.dot_dimension_numbers<[1], [0], [0], [1], [0, 0, 1, 1], [], []>} : vector<64x64xbf16>, vector<64x256xbf16>, vector<64x256xf32> -> vector<64x256xf32>
      %c0_21 = arith.constant 0 : index
      %c0_22 = arith.constant 0 : index
      %c0_23 = arith.constant 0 : index
      %37 = vector.load %arg2[%c0_21, %c0_22, %c0_23] : memref<1x64x256xf32, #tpu.memory_space<vmem>>, vector<1x64x256xf32>
      %38 = vector.shape_cast %37 : vector<1x64x256xf32> to vector<64x256xf32>
      %c0_24 = arith.constant 0 : index
      %c0_25 = arith.constant 0 : index
      %39 = vector.load %arg5[%c0_24, %c0_25] : memref<64x1xf32, #tpu.memory_space<vmem>>, vector<64x1xf32>
      %40 = vector.broadcast %39 : vector<64x1xf32> to vector<64x256xf32>
      %41 = arith.addf %38, %40 : vector<64x256xf32>
      %42 = arith.addf %41, %36 : vector<64x256xf32>
      %c0_26 = arith.constant 0 : index
      %c0_27 = arith.constant 0 : index
      %c0_28 = arith.constant 0 : index
      %43 = vector.load %arg8[%c0_26, %c0_27, %c0_28] : memref<1x64x256xf32, #tpu.memory_space<vmem>>, vector<1x64x256xf32>
      %44 = vector.shape_cast %43 : vector<1x64x256xf32> to vector<64x256xf32>
      %45 = vector.shape_cast %42 : vector<64x256xf32> to vector<1x64x256xf32>
      tpu.vector_store %arg8[%c0_26, %c0_27, %c0_28], %45 {strides = array<i32>} : memref<1x64x256xf32, #tpu.memory_space<vmem>>, vector<1x64x256xf32>,
    } else {
    }
    return
  }
  func.func @transform_0(%arg0: i32, %arg1: i32) -> (i32, i32, i32) {
    %c0_i32 = arith.constant 0 : i32
    %c0_i32_0 = arith.constant 0 : i32
    %c0_i32_1 = arith.constant 0 : i32
    return %arg0, %c0_i32, %c0_i32_0 : i32, i32, i32
  }
  func.func @transform_1(%arg0: i32, %arg1: i32) -> (i32, i32, i32) {
    %c0_i32 = arith.constant 0 : i32
    %c0_i32_0 = arith.constant 0 : i32
    %c0_i32_1 = arith.constant 0 : i32
    %c0_i32_2 = arith.constant 0 : i32
    return %c0_i32, %c0_i32_0, %c0_i32_1 : i32, i32, i32
  }
  func.func @transform_2(%arg0: i32, %arg1: i32) -> (i32, i32) {
    %c0_i32 = arith.constant 0 : i32
    %c0_i32_0 = arith.constant 0 : i32
    %c0_i32_1 = arith.constant 0 : i32
    return %c0_i32, %c0_i32_0 : i32, i32
  }
  func.func @transform_3(%arg0: i32, %arg1: i32) -> (i32, i32) {
    %c0_i32 = arith.constant 0 : i32
    %c0_i32_0 = arith.constant 0 : i32
    %c0_i32_1 = arith.constant 0 : i32
    return %c0_i32, %c0_i32_0 : i32, i32
  }
  func.func @transform_4(%arg0: i32, %arg1: i32) -> (i32, i32) {
    %c0_i32 = arith.constant 0 : i32
    %c0_i32_0 = arith.constant 0 : i32
    %c0_i32_1 = arith.constant 0 : i32
    return %c0_i32, %c0_i32_0 : i32, i32
  }
  func.func @transform_5(%arg0: i32, %arg1: i32) -> (i32, i32) {
    %c0_i32 = arith.constant 0 : i32
    %c0_i32_0 = arith.constant 0 : i32
    %c0_i32_1 = arith.constant 0 : i32
    return %c0_i32, %c0_i32_0 : i32, i32
  }
  func.func @transform_6(%arg0: i32, %arg1: i32) -> (i32, i32, i32) {
    %c0_i32 = arith.constant 0 : i32
    %c0_i32_0 = arith.constant 0 : i32
    %c0_i32_1 = arith.constant 0 : i32
    return %arg0, %c0_i32, %c0_i32_0 : i32, i32, i32
  }
}

</mosaic_0001>

<bundles_post_ra>
// kernel: tpu_custom_call.1
= control target key start
LH: loop header
LB: loop body
LE: loop exit
PB: predicated region body
PF: predicated region fallthrough
CT: control target
= control target key end

     0   :  { %11 = vsyncpa [#allocation6], 0  ;;  %s6064_s0 = inlined_call_operand.hbm [shape: f32[2,64,256], index: 0, kind: input, shape index: {}]   ;;  %s6065_s1 = inlined_call_operand.vmem [shape: bf16[2,96,64], index: 1, kind: input, shape index: {}]   ;;  %s6066_s2 = inlined_call_operand.vmem [shape: bf16[64,64], index: 2, kind: input, shape index: {}]   ;;  %s6067_s3 = inlined_call_operand.vmem [shape: f32[64,1], index: 3, kind: input, shape index: {}]   ;;  %s6068_s4 = inlined_call_operand.vmem [shape: f32[64,1], index: 4, kind: input, shape index: {}]   ;;  %s6069_s5 = inlined_call_operand.vmem [shape: f32[64,1], index: 5, kind: input, shape index: {}]   ;;  %s6070_s6 = inlined_call_operand.hbm [shape: f32[2,64,256], index: 6, kind: output, shape index: {}]  }
   0x1   :  { %13 = vsyncpa [#allocation6 + $0x1], 0 }
   0x2   :  { %14 = vsyncpa [#allocation7], 0 }
   0x3   :  { %16 = vsyncpa [#allocation7 + $0x1], 0  ;;  %s4258_s21 = smov 0   ;;  %s4260_s22 = smov 0  }
   0x4   :  { %s4262_s23 = smov 0   ;;  %s4264_s24 = smov 0  }
   0x5   :  { %s4266_s25 = smov 0   ;;  %s4268_s26 = smov 0  }
   0x6   :  { %s4270_s27 = smov 0   ;;  %s4272_s28 = smov 0  }
   0x7 LB: > { %6102 = sst [smem:[#allocation11_spill]] %s4203_s26  ;;  %s3457_s29 = sadd.s32 4294967295, %s4211_s28   ;;  %s4211_s28 = sphi %s4272_s28, %s22_s28   ;;  %s4207_s27 = sphi %s4270_s27, %s6195_s27   ;;  %s4203_s26 = sphi %s4268_s26, %s6189_s26   ;;  %s4199_s25 = sphi %s4266_s25, %s6194_s25   ;;  %s4195_s24 = sphi %s4264_s24, %s6188_s24   ;;  %s4191_s23 = sphi %s4262_s23, %s6193_s23   ;;  %s4187_s22 = sphi %s4260_s22, %s6192_s22   ;;  %s4183_s21 = sphi %s4258_s21, %s6191_s21  }
   0x8   : > { %s3458_s30 = sadd.s32 4294967294, %s4211_s28   ;;  %s31_s7 = sadd.s32 1, %s4203_s26 }
   0x9   : > { %s34_s8 = sadd.s32 1, %s4207_s27  ;;  %p32_p0 = scmp.ge.s32.totalorder %s31_s7, 2 }
   0xa   : > { %s41_s9 = sadd.s32 1, %s4191_s23  ;;  %p48_p1 = scmp.ne.s32.totalorder %s4191_s23, %s4187_s22 }
   0xb   : > { %p49_p2 = scmp.eq.s32.totalorder %s4211_s28, 0  ;;  %s6197_s7 = smov (%p32_p0, %s31_s7), 0 }
   0xc   : > { %6103 = sst [smem:[#allocation12_spill]] %s6197_s7  ;;  %s6199_s8 = smov (!%p32_p0, %s34_s8), %s4207_s27 }
   0xd   : > { %p4309_p3 = por %p49_p2, %p48_p1  ;;  %p54_p4 = scmp.ne.s32.totalorder %s4187_s22, %s4183_s21 }
   0xe   : > { %p36_p5 = scmp.ge.s32.totalorder %s6199_s8, 2  ;;  %p55_p6 = scmp.eq.s32.totalorder %s3457_s29, 0 }
   0xf   : > { %p183_p7 = scmp.eq.s32.totalorder %s3457_s29, 3  ;;  %p189_p8 = scmp.eq.s32.totalorder %s3458_s30, 3 }
  0x10   : > { %s6201_s8 = smov (%p36_p5, %s6199_s8), 0  ;;  %p4317_p9 = por %p55_p6, %p54_p4 }
  0x11   : > { %6105 = sst [smem:[#allocation13_spill]] %s6201_s8  ;;  %p4321_p10 = por %p183_p7, %p48_p1 }
  0x12   : > { %s38_s13 = ssub.s32 %s4207_s27, %s6201_s8  ;;  %p4327_p11 = por %p189_p8, %p54_p4 }
  0x13   : > { %p39_p12 = scmp.eq.s32.totalorder %s38_s13, 0  ;;  %p3744_p13 = scmp.lt.s32.totalorder %s4211_s28, 4 }
  0x14   : > { %s6108_s14 = scalar_select %p4327_p11, 1, 0 }
  0x15   : > { %s224_s15 = sand.u32 1, %s4191_s23   ;;  %s3682_s18 = sshll.u32 %s4207_s27, 7 }
  0x16   : > { %6109 = sst [smem:[#allocation14_spill]] %s6108_s14  ;;  %s3461_s17 = sshll.u32 %s224_s15, 7 }
  0x17   : > { %s4334_s16 = scalar_select %p39_p12, %s4191_s23, %s41_s9  }
  0x18   : > { %s233_s29 = scalar_lea.hbm %s6064_s0, %s3682_s18  ;;  %s228_s30 = scalar_lea.vmem [#allocation5], %s3461_s17 }
  0x19   : > { %s236_s7 = sshll.u32 %s228_s30, 4  ;;  %s234_s26 = sshll.u32 %s233_s29, 4  ;;  %s237_s7 = int_to_ptr.vmem [resolvable:$true] %s236_s7  ;;  %s235_s26 = int_to_ptr.hbm [resolvable:$true] %s234_s26 }
  0x1a   : > { %p3737_p0 = pnand %p3744_p13, %p4309_p3  ;;  %p3464_p1 = scmp.ge.s32.totalorder %s4211_s28, 1 }
  0x1b   : > { %s225_s13 = scalar_lea.sflag [#allocation6], %s224_s15  ;;  %s4213_s8 = smov 256  }
  0x1c   : > { %s4214_s14 = smov 16   ;;  %p244_p2 = scmp.lt.s32.totalorder %s4211_s28, 5 }
  0x1d   : > { %3739 = dma.hbm_to_vmem [thread:$0]  (!%p3737_p0), %s235_s26, 2048, %s237_s7, %s225_s13, %s4213_s8, %s4213_s8, %s4214_s14  }
  0x1e   : > { %p245_p4 = pnand %p3464_p1, %p244_p2 }
  0x20   : > { %248 = sbr.rel (%p245_p4) target bundleno = 1948 (0x79c), region = 44 }
  0x25   : > { %s4345_s9 = sand.u32 1, %s4187_s22  }
  0x26   : > { %s3465_s17 = sshll.u32 %s4345_s9, 7  ;;  %s251_s18 = scalar_lea.sflag [#allocation6], %s4345_s9 }
  0x27   : > { %s4349_s19 = scalar_lea.vmem [#allocation5], %s3465_s17 }
  0x28   : > { %4174 = dma.done.wait (%p4317_p9), %s251_s18, 2048  }
  0x29   : > { %4176 = vsyncadd (%p4317_p9), %s251_s18, 4294965248  ;;  %s4355_s10 = scalar_lea.vmem [#allocation8], %s3465_s17  ;;  %p3467_p3 = scmp.ne.s32.totalorder %s4195_s24, 0 }
  0x2b   : > { %288 = sbr.rel (%p3467_p3) target bundleno = 514 (0x202), region = 52 }
  0x30   : > { %v4359_v0 = vld [vmem:[%s4349_s19] sm:$0xff]  ;;  %v4362_v1 = vld [vmem:[%s4349_s19 + $0x8] sm:$0xff]  ;;  %v4215_v5 = vmov 0   ;;  %v4381_v9 = vld [vmem:[%s4349_s19 + $0x10] sm:$0xff]  ;;  %v4216_v30 = vmov 269488144  }
  0x31   : > { %v4365_v2 = vld [vmem:[%s4349_s19 + $0x20] sm:$0xff]  ;;  %v305_v3 = vadd.f32 %v4362_v1, %v4359_v0  ;;  %v4370_v4 = vld [vmem:[%s4349_s19 + $0x28] sm:$0xff]  ;;  %3821 = vset.pattern.permute.xlu1 %v4215_v5  ;;  %3822 = vset.pattern.permute.xlu2 %v4215_v5  ;;  %v4384_v10 = vld [vmem:[%s4349_s19 + $0x18] sm:$0xff]  ;;  %v338_v31 = vunpack.c.l.s4 %v4216_v30  ;;  %v4217_v32 = vmov 842150450   ;;  %vm497_vm0 = vcmask 1041408  }
  0x32   : > { %v311_v6 = vadd.f32 %v4370_v4, %v4365_v2  ;;  %v4375_v7 = vld [vmem:[%s4349_s19 + $0x40] sm:$0xff]  ;;  %3823 = vset.pattern.permute.xlu0 %v4215_v5  ;;  %v4378_v8 = vld [vmem:[%s4349_s19 + $0x48] sm:$0xff]  ;;  %v4389_v12 = vld [vmem:[%s4349_s19 + $0x30] sm:$0xff]  ;;  %v308_v14 = vadd.f32 %v4384_v10, %v4381_v9  ;;  %v342_v33 = vunpack.c.l.s4 %v4217_v32  ;;  %v4218_v34 = vmov 1414812756  }
  0x33   : > { %306 = vadd.xlane.f32.xlu0 %v305_v3  ;;  %v317_v11 = vadd.f32 %v4378_v8, %v4375_v7  ;;  %v4392_v13 = vld [vmem:[%s4349_s19 + $0x38] sm:$0xff]  ;;  %v4397_v15 = vld [vmem:[%s4349_s19 + $0x50] sm:$0xff]  ;;  %v4407_v19 = vld [vmem:[%s4349_s19 + $0x60] sm:$0xff]  ;;  %v346_v35 = vunpack.c.l.s4 %v4218_v34  ;;  %v4219_v36 = vmov 1987475062   ;;  %v4437_v38 = vunpack.c.0.s8 %v338_v31 }
  0x34   : > { %312 = vadd.xlane.f32.xlu1 %v311_v6  ;;  %v4400_v16 = vld [vmem:[%s4349_s19 + $0x58] sm:$0xff]  ;;  %v314_v17 = vadd.f32 %v4392_v13, %v4389_v12  ;;  %v4410_v20 = vld [vmem:[%s4349_s19 + $0x68] sm:$0xff]  ;;  %v4413_v21 = vld [vmem:[%s4349_s19 + $0x70] sm:$0xff]  ;;  %v350_v37 = vunpack.c.l.s4 %v4219_v36  ;;  %v4439_v39 = vunpack.c.0.s8 %v342_v33 }
  0x35   : > { %318 = vadd.xlane.f32.xlu2 %v317_v11  ;;  %v320_v18 = vadd.f32 %v4400_v16, %v4397_v15  ;;  %v4416_v22 = vld [vmem:[%s4349_s19 + $0x78] sm:$0xff]  ;;  %v323_v23 = vadd.f32 %v4410_v20, %v4407_v19  ;;  %v1809_v25 = vld [vmem:[%s6068_s4 + $0x8] sm:$0xff]  ;;  %v1810_v26 = vld [vmem:[%s6068_s4 + $0x10] sm:$0xff]  ;;  %v4441_v40 = vunpack.c.0.s8 %v346_v35 }
  0x36   : > { %v326_v24 = vadd.f32 %v4416_v22, %v4413_v21  ;;  %v1808_v27 = vld [vmem:[%s6068_s4] sm:$0xff]  ;;  %v1811_v28 = vld [vmem:[%s6068_s4 + $0x18] sm:$0xff]  ;;  %v4443_v41 = vunpack.c.0.s8 %v350_v37 }
  0x37   : > { %v1812_v29 = vld [vmem:[%s6068_s4 + $0x20] sm:$0xff] }
  0x3b   : > { %309 = vadd.xlane.f32.xlu0 %v308_v14 }
  0x3c   : > { %315 = vadd.xlane.f32.xlu1 %v314_v17 }
  0x3d   : > { %321 = vadd.xlane.f32.xlu2 %v320_v18 }
  0x43   : > { %324 = vadd.xlane.f32.xlu0 %v323_v23 }
  0x44   : > { %327 = vadd.xlane.f32.xlu1 %v326_v24 }
  0x55   : > { %1823 = vperm.xlu2 %3822, %v1809_v25  }
  0x57   : > { %1828 = vperm.xlu0 %3823, %v1810_v26  }
  0x5d   : > { %1818 = vperm.xlu1 %3821, %v1808_v27   ;;  %1833 = vperm.xlu2 %3822, %v1811_v28  }
  0x65   : > { %1838 = vperm.xlu1 %3821, %v1812_v29  }
  0xa6   : > { %v307_v42 = vpop.xlane.xlu0 %306 }
  0xa7   : > { %v340_v43 = vperm.slane %v307_v42, %v4437_v38  ;;  %v344_v44 = vperm.slane %v307_v42, %v4439_v39  ;;  %v348_v45 = vperm.slane %v307_v42, %v4441_v40  ;;  %v352_v46 = vperm.slane %v307_v42, %v4443_v41  ;;  %v313_v47 = vpop.xlane.xlu1 %312 }
  0xa8   : > { %v372_v48 = vperm.slane %v313_v47, %v4437_v38  ;;  %v376_v49 = vperm.slane %v313_v47, %v4439_v39  ;;  %v380_v50 = vperm.slane %v313_v47, %v4441_v40  ;;  %v384_v51 = vperm.slane %v313_v47, %v4443_v41 }
  0xa9   : > { %v498_v52 = vsel %vm497_vm0, %v340_v43, 0.0  ;;  %v505_v53 = vsel %vm497_vm0, %v344_v44, 0.0  ;;  %v512_v54 = vsel %vm497_vm0, %v348_v45, 0.0  ;;  %v519_v55 = vsel %vm497_vm0, %v352_v46, 0.0 }
  0xaa   : > { %v499_v56 = vrot.slane %v498_v52, 4  ;;  %v506_v57 = vrot.slane %v505_v53, 4  ;;  %v513_v58 = vrot.slane %v512_v54, 4  ;;  %v520_v59 = vrot.slane %v519_v55, 4 }
  0xab   : > { %v554_v60 = vsel %vm497_vm0, %v372_v48, 0.0  ;;  %v561_v61 = vsel %vm497_vm0, %v376_v49, 0.0  ;;  %v568_v62 = vsel %vm497_vm0, %v380_v50, 0.0  ;;  %v575_v63 = vsel %vm497_vm0, %v384_v51, 0.0 }
  0xac   : > { %v500_v3 = vadd.f32 %v499_v56, %v498_v52  ;;  %v507_v5 = vadd.f32 %v506_v57, %v505_v53  ;;  %v514_v6 = vadd.f32 %v513_v58, %v512_v54  ;;  %v521_v11 = vadd.f32 %v520_v59, %v519_v55 }
  0xad   : > { %v555_v14 = vrot.slane %v554_v60, 4  ;;  %v562_v17 = vrot.slane %v561_v61, 4  ;;  %v569_v18 = vrot.slane %v568_v62, 4  ;;  %v576_v23 = vrot.slane %v575_v63, 4 }
  0xae   : > { %v501_v24 = vrot.slane %v500_v3, 2  ;;  %v508_v25 = vrot.slane %v507_v5, 2  ;;  %v515_v26 = vrot.slane %v514_v6, 2  ;;  %v522_v27 = vrot.slane %v521_v11, 2 }
  0xaf   : > { %v556_v28 = vadd.f32 %v555_v14, %v554_v60  ;;  %v563_v29 = vadd.f32 %v562_v17, %v561_v61  ;;  %v570_v30 = vadd.f32 %v569_v18, %v568_v62  ;;  %v577_v31 = vadd.f32 %v576_v23, %v575_v63  ;;  %v310_v60 = vpop.xlane.xlu0 %309 }
  0xb0   : > { %v502_v32 = vadd.f32 %v501_v24, %v500_v3  ;;  %v509_v33 = vadd.f32 %v508_v25, %v507_v5  ;;  %v516_v34 = vadd.f32 %v515_v26, %v514_v6  ;;  %v523_v35 = vadd.f32 %v522_v27, %v521_v11 }
  0xb1   : > { %v557_v36 = vrot.slane %v556_v28, 2  ;;  %v564_v37 = vrot.slane %v563_v29, 2  ;;  %v571_v42 = vrot.slane %v570_v30, 2  ;;  %v578_v43 = vrot.slane %v577_v31, 2 }
  0xb2   : > { %v503_v44 = vrot.slane %v502_v32, 1  ;;  %v510_v45 = vrot.slane %v509_v33, 1  ;;  %v517_v46 = vrot.slane %v516_v34, 1  ;;  %v524_v47 = vrot.slane %v523_v35, 1 }
  0xb3   : > { %v558_v48 = vadd.f32 %v557_v36, %v556_v28  ;;  %v565_v49 = vadd.f32 %v564_v37, %v563_v29  ;;  %v572_v50 = vadd.f32 %v571_v42, %v570_v30  ;;  %v579_v51 = vadd.f32 %v578_v43, %v577_v31  ;;  %v316_v29 = vpop.xlane.xlu1 %315 }
  0xb4   : > { %v504_v52 = vadd.f32 %v503_v44, %v502_v32  ;;  %v511_v53 = vadd.f32 %v510_v45, %v509_v33  ;;  %v518_v54 = vadd.f32 %v517_v46, %v516_v34  ;;  %v525_v55 = vadd.f32 %v524_v47, %v523_v35 }
  0xb5   : > { %v559_v56 = vrot.slane %v558_v48, 1  ;;  %v566_v57 = vrot.slane %v565_v49, 1  ;;  %v573_v58 = vrot.slane %v572_v50, 1  ;;  %v580_v59 = vrot.slane %v579_v51, 1 }
  0xb6   : > { %v722_v61 = vmul.f32 0.001953125, %v504_v52  ;;  %v723_v62 = vmul.f32 0.001953125, %v511_v53  ;;  %v724_v63 = vmul.f32 0.001953125, %v518_v54  ;;  %v725_v3 = vmul.f32 0.001953125, %v525_v55 }
  0xb7   : > { %v560_v5 = vadd.f32 %v559_v56, %v558_v48  ;;  %v567_v6 = vadd.f32 %v566_v57, %v565_v49  ;;  %v574_v11 = vadd.f32 %v573_v58, %v572_v50  ;;  %v581_v14 = vadd.f32 %v580_v59, %v579_v51 }
  0xb8   : > { %786 = vst [vmem:[#allocation1] ss:$4 sm:$0xff] %v722_v61  ;;  %v356_v17 = vperm.slane %v310_v60, %v4437_v38  ;;  %v360_v18 = vperm.slane %v310_v60, %v4439_v39  ;;  %v364_v23 = vperm.slane %v310_v60, %v4441_v40  ;;  %v368_v24 = vperm.slane %v310_v60, %v4443_v41 }
  0xb9   : > { %788 = vst [vmem:[#allocation1 + $0x1] ss:$4 sm:$0xff] %v723_v62  ;;  %v730_v25 = vmul.f32 0.001953125, %v560_v5  ;;  %v731_v26 = vmul.f32 0.001953125, %v567_v6  ;;  %v732_v27 = vmul.f32 0.001953125, %v574_v11  ;;  %v733_v28 = vmul.f32 0.001953125, %v581_v14 }
  0xba   : > { %790 = vst [vmem:[#allocation1 + $0x2] ss:$4 sm:$0xff] %v724_v63  ;;  %v526_v30 = vsel %vm497_vm0, %v356_v17, 0.0  ;;  %v533_v31 = vsel %vm497_vm0, %v360_v18, 0.0  ;;  %v540_v32 = vsel %vm497_vm0, %v364_v23, 0.0  ;;  %v547_v33 = vsel %vm497_vm0, %v368_v24, 0.0 }
  0xbb   : > { %792 = vst [vmem:[#allocation1 + $0x3] ss:$4 sm:$0xff] %v725_v3  ;;  %v527_v34 = vrot.slane %v526_v30, 4  ;;  %v534_v35 = vrot.slane %v533_v31, 4  ;;  %v541_v36 = vrot.slane %v540_v32, 4  ;;  %v548_v37 = vrot.slane %v547_v33, 4 }
  0xbc   : > { %v388_v42 = vperm.slane %v316_v29, %v4437_v38  ;;  %v392_v43 = vperm.slane %v316_v29, %v4439_v39  ;;  %v396_v44 = vperm.slane %v316_v29, %v4441_v40  ;;  %v400_v45 = vperm.slane %v316_v29, %v4443_v41 }
  0xbd   : > { %v528_v46 = vadd.f32 %v527_v34, %v526_v30  ;;  %v535_v47 = vadd.f32 %v534_v35, %v533_v31  ;;  %v542_v48 = vadd.f32 %v541_v36, %v540_v32  ;;  %v549_v49 = vadd.f32 %v548_v37, %v547_v33 }
  0xbe   : > { %v582_v50 = vsel %vm497_vm0, %v388_v42, 0.0  ;;  %v589_v51 = vsel %vm497_vm0, %v392_v43, 0.0  ;;  %v596_v52 = vsel %vm497_vm0, %v396_v44, 0.0  ;;  %v603_v53 = vsel %vm497_vm0, %v400_v45, 0.0 }
  0xbf   : > { %v529_v54 = vrot.slane %v528_v46, 2  ;;  %v536_v55 = vrot.slane %v535_v47, 2  ;;  %v543_v56 = vrot.slane %v542_v48, 2  ;;  %v550_v57 = vrot.slane %v549_v49, 2 }
  0xc0   : > { %v583_v58 = vrot.slane %v582_v50, 4  ;;  %v590_v59 = vrot.slane %v589_v51, 4  ;;  %v597_v60 = vrot.slane %v596_v52, 4  ;;  %v604_v61 = vrot.slane %v603_v53, 4 }
  0xc1   : > { %v530_v62 = vadd.f32 %v529_v54, %v528_v46  ;;  %v537_v63 = vadd.f32 %v536_v55, %v535_v47  ;;  %v544_v3 = vadd.f32 %v543_v56, %v542_v48  ;;  %v551_v5 = vadd.f32 %v550_v57, %v549_v49 }
  0xc2   : > { %v801_v6 = vld.sshfl [vmem:[#allocation1] sm:$0xff pattern:$0x73625140]  ;;  %v802_v11 = vld.sshfl [vmem:[#allocation1 + $0x8] sm:$0xff pattern:$0x73625140]  ;;  %v584_v14 = vadd.f32 %v583_v58, %v582_v50  ;;  %v591_v17 = vadd.f32 %v590_v59, %v589_v51  ;;  %v598_v18 = vadd.f32 %v597_v60, %v596_v52  ;;  %v605_v23 = vadd.f32 %v604_v61, %v603_v53 }
  0xc3   : > { %805 = vst [vmem:[#allocation1] ss:$4 sm:$0xff] %v730_v25  ;;  %v531_v24 = vrot.slane %v530_v62, 1  ;;  %v538_v29 = vrot.slane %v537_v63, 1  ;;  %v545_v30 = vrot.slane %v544_v3, 1  ;;  %v552_v31 = vrot.slane %v551_v5, 1  ;;  %v319_v25 = vpop.xlane.xlu2 %318 }
  0xc4   : > { %806 = vst [vmem:[#allocation1 + $0x1] ss:$4 sm:$0xff] %v731_v26  ;;  %v585_v32 = vrot.slane %v584_v14, 2  ;;  %v592_v33 = vrot.slane %v591_v17, 2  ;;  %v599_v34 = vrot.slane %v598_v18, 2  ;;  %v606_v35 = vrot.slane %v605_v23, 2 }
  0xc5   : > { %807 = vst [vmem:[#allocation1 + $0x2] ss:$4 sm:$0xff] %v732_v27  ;;  %v532_v36 = vadd.f32 %v531_v24, %v530_v62  ;;  %v539_v37 = vadd.f32 %v538_v29, %v537_v63  ;;  %v546_v42 = vadd.f32 %v545_v30, %v544_v3  ;;  %v553_v43 = vadd.f32 %v552_v31, %v551_v5 }
  0xc6   : > { %808 = vst [vmem:[#allocation1 + $0x3] ss:$4 sm:$0xff] %v733_v28  ;;  %v586_v44 = vadd.f32 %v585_v32, %v584_v14  ;;  %v593_v45 = vadd.f32 %v592_v33, %v591_v17  ;;  %v600_v46 = vadd.f32 %v599_v34, %v598_v18  ;;  %v607_v47 = vadd.f32 %v606_v35, %v605_v23 }
  0xc7   : > { %v726_v48 = vmul.f32 0.001953125, %v532_v36  ;;  %v727_v49 = vmul.f32 0.001953125, %v539_v37  ;;  %v728_v50 = vmul.f32 0.001953125, %v546_v42  ;;  %v729_v51 = vmul.f32 0.001953125, %v553_v43 }
  0xc8   : > { %v587_v26 = vrot.slane %v586_v44, 1  ;;  %v594_v52 = vrot.slane %v593_v45, 1  ;;  %v601_v53 = vrot.slane %v600_v46, 1  ;;  %v608_v54 = vrot.slane %v607_v47, 1 }
  0xc9   : > { %794 = vst [vmem:[#allocation1 + $0x20] ss:$4 sm:$0xff] %v726_v48  ;;  %v404_v27 = vperm.slane %v319_v25, %v4437_v38  ;;  %v408_v55 = vperm.slane %v319_v25, %v4439_v39  ;;  %v412_v28 = vperm.slane %v319_v25, %v4441_v40  ;;  %v416_v56 = vperm.slane %v319_v25, %v4443_v41 }
  0xca   : > { %796 = vst [vmem:[#allocation1 + $0x21] ss:$4 sm:$0xff] %v727_v49  ;;  %v588_v57 = vadd.f32 %v587_v26, %v586_v44  ;;  %v595_v58 = vadd.f32 %v594_v52, %v593_v45  ;;  %v602_v59 = vadd.f32 %v601_v53, %v600_v46  ;;  %v609_v60 = vadd.f32 %v608_v54, %v607_v47 }
  0xcb   : > { %798 = vst [vmem:[#allocation1 + $0x22] ss:$4 sm:$0xff] %v728_v50  ;;  %v610_v61 = vsel %vm497_vm0, %v404_v27, 0.0  ;;  %v617_v62 = vsel %vm497_vm0, %v408_v55, 0.0  ;;  %v624_v63 = vsel %vm497_vm0, %v412_v28, 0.0  ;;  %v631_v3 = vsel %vm497_vm0, %v416_v56, 0.0  ;;  %v322_v35 = vpop.xlane.xlu2 %321 }
  0xcc   : > { %800 = vst [vmem:[#allocation1 + $0x23] ss:$4 sm:$0xff] %v729_v51  ;;  %v734_v5 = vmul.f32 0.001953125, %v588_v57  ;;  %v735_v14 = vmul.f32 0.001953125, %v595_v58  ;;  %v736_v17 = vmul.f32 0.001953125, %v602_v59  ;;  %v737_v18 = vmul.f32 0.001953125, %v609_v60 }
  0xcd   : > { %v813_v23 = vld.sshfl [vmem:[#allocation1] sm:$0xff pattern:$0x73625140]  ;;  %v814_v24 = vld.sshfl [vmem:[#allocation1 + $0x8] sm:$0xff pattern:$0x73625140]  ;;  %v4486_v29 = vsub.f32 %v4359_v0, %v801_v6  ;;  %v4489_v30 = vsub.f32 %v4362_v1, %v802_v11  ;;  %v420_v47 = vperm.slane %v322_v35, %v4437_v38  ;;  %v424_v26 = vperm.slane %v322_v35, %v4439_v39 }
  0xce   : > { %v611_v31 = vrot.slane %v610_v61, 4  ;;  %v618_v32 = vrot.slane %v617_v62, 4  ;;  %v625_v33 = vrot.slane %v624_v63, 4  ;;  %v632_v34 = vrot.slane %v631_v3, 4 }
  0xcf   : > { %v873_v36 = vmul.f32 %v4486_v29, %v4486_v29  ;;  %v874_v37 = vmul.f32 %v4489_v30, %v4489_v30  ;;  %v4496_v42 = vsub.f32 %v4365_v2, %v813_v23  ;;  %v4499_v0 = vsub.f32 %v4370_v4, %v814_v24 }
  0xd0   : > { %v612_v6 = vadd.f32 %v611_v31, %v610_v61  ;;  %v619_v1 = vadd.f32 %v618_v32, %v617_v62  ;;  %v626_v11 = vadd.f32 %v625_v33, %v624_v63  ;;  %v633_v43 = vadd.f32 %v632_v34, %v631_v3 }
  0xd1   : > { %v889_v44 = vadd.f32 %v874_v37, %v873_v36  ;;  %v877_v45 = vmul.f32 %v4496_v42, %v4496_v42  ;;  %v878_v46 = vmul.f32 %v4499_v0, %v4499_v0  ;;  %v428_v52 = vperm.slane %v322_v35, %v4441_v40 }
  0xd2   : > { %v613_v25 = vrot.slane %v612_v6, 2  ;;  %v620_v48 = vrot.slane %v619_v1, 2  ;;  %v627_v2 = vrot.slane %v626_v11, 2  ;;  %v634_v49 = vrot.slane %v633_v43, 2 }
  0xd3   : > { %v803_v50 = vld.sshfl [vmem:[#allocation1 + $0x20] sm:$0xff pattern:$0x73625140]  ;;  %v804_v4 = vld.sshfl [vmem:[#allocation1 + $0x28] sm:$0xff pattern:$0x73625140]  ;;  %890 = vadd.xlane.f32.xlu2 %v889_v44  ;;  %v895_v51 = vadd.f32 %v878_v46, %v877_v45  ;;  %v432_v53 = vperm.slane %v322_v35, %v4443_v41 }
  0xd4   : > { %809 = vst [vmem:[#allocation1 + $0x20] ss:$4 sm:$0xff] %v734_v5  ;;  %v614_v54 = vadd.f32 %v613_v25, %v612_v6  ;;  %v621_v27 = vadd.f32 %v620_v48, %v619_v1  ;;  %v628_v55 = vadd.f32 %v627_v2, %v626_v11  ;;  %v635_v28 = vadd.f32 %v634_v49, %v633_v43 }
  0xd5   : > { %810 = vst [vmem:[#allocation1 + $0x21] ss:$4 sm:$0xff] %v735_v14  ;;  %896 = vadd.xlane.f32.xlu1 %v895_v51  ;;  %v4510_v56 = vsub.f32 %v4381_v9, %v803_v50  ;;  %v4513_v57 = vsub.f32 %v4384_v10, %v804_v4  ;;  %v638_v58 = vsel %vm497_vm0, %v420_v47, 0.0  ;;  %v645_v59 = vsel %vm497_vm0, %v424_v26, 0.0 }
  0xd6   : > { %811 = vst [vmem:[#allocation1 + $0x22] ss:$4 sm:$0xff] %v736_v17  ;;  %v615_v60 = vrot.slane %v614_v54, 1  ;;  %v622_v61 = vrot.slane %v621_v27, 1  ;;  %v629_v62 = vrot.slane %v628_v55, 1  ;;  %v636_v63 = vrot.slane %v635_v28, 1 }
  0xd7   : > { %812 = vst [vmem:[#allocation1 + $0x23] ss:$4 sm:$0xff] %v737_v18  ;;  %v875_v3 = vmul.f32 %v4510_v56, %v4510_v56  ;;  %v876_v9 = vmul.f32 %v4513_v57, %v4513_v57  ;;  %v639_v5 = vrot.slane %v638_v58, 4  ;;  %v646_v14 = vrot.slane %v645_v59, 4 }
  0xd8   : > { %v616_v10 = vadd.f32 %v615_v60, %v614_v54  ;;  %v623_v23 = vadd.f32 %v622_v61, %v621_v27  ;;  %v630_v24 = vadd.f32 %v629_v62, %v628_v55  ;;  %v637_v31 = vadd.f32 %v636_v63, %v635_v28 }
  0xd9   : > { %v892_v32 = vadd.f32 %v876_v9, %v875_v3  ;;  %v640_v33 = vadd.f32 %v639_v5, %v638_v58  ;;  %v647_v17 = vadd.f32 %v646_v14, %v645_v59  ;;  %v652_v34 = vsel %vm497_vm0, %v428_v52, 0.0  ;;  %v325_v9 = vpop.xlane.xlu0 %324 }
  0xda   : > { %v738_v35 = vmul.f32 0.001953125, %v616_v10  ;;  %v739_v36 = vmul.f32 0.001953125, %v623_v23  ;;  %v740_v18 = vmul.f32 0.001953125, %v630_v24  ;;  %v653_v1 = vrot.slane %v652_v34, 4 }
  0xdb   : > { %893 = vadd.xlane.f32.xlu0 %v892_v32  ;;  %v641_v37 = vrot.slane %v640_v33, 2  ;;  %v648_v6 = vrot.slane %v647_v17, 2  ;;  %v659_v11 = vsel %vm497_vm0, %v432_v53, 0.0  ;;  %v741_v43 = vmul.f32 0.001953125, %v637_v31 }
  0xdc   : > { %817 = vst [vmem:[#allocation1] ss:$4 sm:$0xff] %v738_v35  ;;  %v660_v44 = vrot.slane %v659_v11, 4  ;;  %v654_v47 = vadd.f32 %v653_v1, %v652_v34  ;;  %v436_v34 = vperm.slane %v325_v9, %v4437_v38  ;;  %v440_v35 = vperm.slane %v325_v9, %v4439_v39 }
  0xdd   : > { %818 = vst [vmem:[#allocation1 + $0x1] ss:$4 sm:$0xff] %v739_v36  ;;  %v642_v45 = vadd.f32 %v641_v37, %v640_v33  ;;  %v649_v46 = vadd.f32 %v648_v6, %v647_v17  ;;  %v444_v36 = vperm.slane %v325_v9, %v4441_v40 }
  0xde   : > { %v815_v25 = vld.sshfl [vmem:[#allocation1 + $0x20] sm:$0xff pattern:$0x73625140]  ;;  %v816_v48 = vld.sshfl [vmem:[#allocation1 + $0x28] sm:$0xff pattern:$0x73625140]  ;;  %v661_v2 = vadd.f32 %v660_v44, %v659_v11 }
  0xdf   : > { %819 = vst [vmem:[#allocation1 + $0x2] ss:$4 sm:$0xff] %v740_v18  ;;  %v4524_v49 = vsub.f32 %v4389_v12, %v815_v25  ;;  %v4527_v50 = vsub.f32 %v4392_v13, %v816_v48  ;;  %v643_v4 = vrot.slane %v642_v45, 1  ;;  %v650_v51 = vrot.slane %v649_v46, 1  ;;  %v328_v12 = vpop.xlane.xlu1 %327 }
  0xe0   : > { %820 = vst [vmem:[#allocation1 + $0x3] ss:$4 sm:$0xff] %v741_v43  ;;  %v655_v26 = vrot.slane %v654_v47, 2  ;;  %v662_v52 = vrot.slane %v661_v2, 2  ;;  %v452_v61 = vperm.slane %v328_v12, %v4437_v38  ;;  %v456_v3 = vperm.slane %v328_v12, %v4439_v39 }
  0xe1   : > { %v879_v53 = vmul.f32 %v4524_v49, %v4524_v49  ;;  %v880_v54 = vmul.f32 %v4527_v50, %v4527_v50  ;;  %v644_v27 = vadd.f32 %v643_v4, %v642_v45  ;;  %v651_v55 = vadd.f32 %v650_v51, %v649_v46 }
  0xe2   : > { %v656_v28 = vadd.f32 %v655_v26, %v654_v47  ;;  %v663_v58 = vadd.f32 %v662_v52, %v661_v2  ;;  %v460_v5 = vperm.slane %v328_v12, %v4441_v40  ;;  %v464_v14 = vperm.slane %v328_v12, %v4443_v41 }
  0xe3   : > { %v898_v59 = vadd.f32 %v880_v54, %v879_v53  ;;  %v742_v60 = vmul.f32 0.001953125, %v644_v27  ;;  %v743_v13 = vmul.f32 0.001953125, %v651_v55  ;;  %v694_v10 = vsel %vm497_vm0, %v452_v61, 0.0 }
  0xe4   : > { %v657_v62 = vrot.slane %v656_v28, 1  ;;  %v664_v63 = vrot.slane %v663_v58, 1  ;;  %v695_v31 = vrot.slane %v694_v10, 4  ;;  %v701_v32 = vsel %vm497_vm0, %v456_v3, 0.0 }
  0xe5   : > { %899 = vadd.xlane.f32.xlu2 %v898_v59  ;;  %821 = vst [vmem:[#allocation1 + $0x20] ss:$4 sm:$0xff] %v742_v60  ;;  %v448_v18 = vperm.slane %v325_v9, %v4443_v41  ;;  %v702_v44 = vrot.slane %v701_v32, 4  ;;  %v708_v45 = vsel %vm497_vm0, %v460_v5, 0.0  ;;  %v715_v46 = vsel %vm497_vm0, %v464_v14, 0.0 }
  0xe6   : > { %v658_v23 = vadd.f32 %v657_v62, %v656_v28  ;;  %v665_v24 = vadd.f32 %v664_v63, %v663_v58  ;;  %822 = vst [vmem:[#allocation1 + $0x21] ss:$4 sm:$0xff] %v743_v13  ;;  %v696_v43 = vadd.f32 %v695_v31, %v694_v10  ;;  %v716_v48 = vrot.slane %v715_v46, 4 }
  0xe7   : > { %v825_v33 = vld.sshfl [vmem:[#allocation1] sm:$0xff pattern:$0x73625140]  ;;  %v826_v17 = vld.sshfl [vmem:[#allocation1 + $0x8] sm:$0xff pattern:$0x73625140]  ;;  %v703_v4 = vadd.f32 %v702_v44, %v701_v32 }
  0xe8   : > { %v4544_v37 = vsub.f32 %v4375_v7, %v825_v33  ;;  %v4547_v6 = vsub.f32 %v4378_v8, %v826_v17  ;;  %v744_v1 = vmul.f32 0.001953125, %v658_v23  ;;  %v745_v11 = vmul.f32 0.001953125, %v665_v24  ;;  %v1814_v8 = vld [vmem:[%s6068_s4 + $0x30] sm:$0xff] }
  0xe9   : > { %v709_v7 = vrot.slane %v708_v45, 4  ;;  %v697_v2 = vrot.slane %v696_v43, 2  ;;  %v666_v51 = vsel %vm497_vm0, %v436_v34, 0.0  ;;  %v673_v26 = vsel %vm497_vm0, %v440_v35, 0.0 }
  0xea   : > { %v881_v47 = vmul.f32 %v4544_v37, %v4544_v37  ;;  %v882_v25 = vmul.f32 %v4547_v6, %v4547_v6  ;;  %823 = vst [vmem:[#allocation1 + $0x22] ss:$4 sm:$0xff] %v744_v1  ;;  %v717_v54 = vadd.f32 %v716_v48, %v715_v46  ;;  %v667_v27 = vrot.slane %v666_v51, 4 }
  0xeb   : > { %824 = vst [vmem:[#allocation1 + $0x23] ss:$4 sm:$0xff] %v745_v11  ;;  %v710_v53 = vadd.f32 %v709_v7, %v708_v45  ;;  %v698_v55 = vadd.f32 %v697_v2, %v696_v43  ;;  %v704_v28 = vrot.slane %v703_v4, 2  ;;  %v674_v58 = vrot.slane %v673_v26, 4 }
  0xec   : > { %v901_v52 = vadd.f32 %v882_v25, %v881_v47  ;;  %v680_v12 = vsel %vm497_vm0, %v444_v36, 0.0  ;;  %v718_v60 = vrot.slane %v717_v54, 2  ;;  %v668_v13 = vadd.f32 %v667_v27, %v666_v51 }
  0xed   : > { %v711_v59 = vrot.slane %v710_v53, 2  ;;  %v681_v61 = vrot.slane %v680_v12, 4  ;;  %v699_v62 = vrot.slane %v698_v55, 1  ;;  %v705_v63 = vadd.f32 %v704_v28, %v703_v4 }
  0xee   : > { %902 = vadd.xlane.f32.xlu0 %v901_v52  ;;  %1848 = vperm.xlu1 %3821, %v1814_v8   ;;  %v675_v3 = vadd.f32 %v674_v58, %v673_v26  ;;  %v687_v9 = vsel %vm497_vm0, %v448_v18, 0.0  ;;  %v719_v14 = vadd.f32 %v718_v60, %v717_v54  ;;  %v669_v10 = vrot.slane %v668_v13, 2 }
  0xef   : > { %v712_v5 = vadd.f32 %v711_v59, %v710_v53  ;;  %v682_v23 = vadd.f32 %v681_v61, %v680_v12  ;;  %v700_v24 = vadd.f32 %v699_v62, %v698_v55  ;;  %v706_v31 = vrot.slane %v705_v63, 1  ;;  %v1813_v55 = vld [vmem:[%s6068_s4 + $0x28] sm:$0xff] }
  0xf0   : > { %v676_v32 = vrot.slane %v675_v3, 2  ;;  %v688_v33 = vrot.slane %v687_v9, 4  ;;  %v670_v35 = vadd.f32 %v669_v10, %v668_v13  ;;  %v720_v11 = vrot.slane %v719_v14, 1  ;;  %v1873_v61 = vld [vmem:[%s6069_s5 + $0x8] sm:$0xff] }
  0xf1   : > { %v707_v36 = vadd.f32 %v706_v31, %v705_v63  ;;  %v713_v1 = vrot.slane %v712_v5, 1  ;;  %v750_v43 = vmul.f32 0.001953125, %v700_v24  ;;  %v683_v46 = vrot.slane %v682_v23, 2 }
  0xf2   : > { %v827_v17 = vld.sshfl [vmem:[#allocation1 + $0x20] sm:$0xff pattern:$0x73625140]  ;;  %v828_v34 = vld.sshfl [vmem:[#allocation1 + $0x28] sm:$0xff pattern:$0x73625140]  ;;  %v677_v45 = vadd.f32 %v676_v32, %v675_v3  ;;  %v689_v47 = vadd.f32 %v688_v33, %v687_v9  ;;  %v721_v25 = vadd.f32 %v720_v11, %v719_v14 }
  0xf3   : > { %v671_v44 = vrot.slane %v670_v35, 1  ;;  %v714_v18 = vadd.f32 %v713_v1, %v712_v5  ;;  %v751_v7 = vmul.f32 0.001953125, %v707_v36  ;;  %833 = vst [vmem:[#allocation1 + $0x20] ss:$4 sm:$0xff] %v750_v43  ;;  %v684_v2 = vadd.f32 %v683_v46, %v682_v23  ;;  %v1872_v36 = vld [vmem:[%s6069_s5] sm:$0xff]  ;;  %v4603_v1 = vpop.permute.xlu1 %1818  ;;  %v1815_v11 = vld [vmem:[%s6068_s4 + $0x38] sm:$0xff] }
  0xf4   : > { %v678_v8 = vrot.slane %v677_v45, 1  ;;  %v690_v4 = vrot.slane %v689_v47, 2  ;;  %v753_v26 = vmul.f32 0.001953125, %v721_v25  ;;  %v4569_v62 = vsub.f32 %v4397_v15, %v827_v17  ;;  %v1876_v43 = vld [vmem:[%s6069_s5 + $0x20] sm:$0xff] }
  0xf5   : > { %v672_v48 = vadd.f32 %v671_v44, %v670_v35  ;;  %v752_v51 = vmul.f32 0.001953125, %v714_v18  ;;  %834 = vst [vmem:[#allocation1 + $0x21] ss:$4 sm:$0xff] %v751_v7  ;;  %v685_v53 = vrot.slane %v684_v2, 1  ;;  %v4572_v63 = vsub.f32 %v4400_v16, %v828_v34  ;;  %v1879_v18 = vld [vmem:[%s6069_s5 + $0x38] sm:$0xff] }
  0xf6   : > { %v679_v52 = vadd.f32 %v678_v8, %v677_v45  ;;  %v691_v54 = vadd.f32 %v690_v4, %v689_v47  ;;  %836 = vst [vmem:[#allocation1 + $0x23] ss:$4 sm:$0xff] %v753_v26  ;;  %v883_v3 = vmul.f32 %v4569_v62, %v4569_v62  ;;  %v1878_v45 = vld [vmem:[%s6069_s5 + $0x30] sm:$0xff] }
  0xf7   : > { %v746_v27 = vmul.f32 0.001953125, %v672_v48  ;;  %835 = vst [vmem:[#allocation1 + $0x22] ss:$4 sm:$0xff] %v752_v51  ;;  %v686_v28 = vadd.f32 %v685_v53, %v684_v2  ;;  %v884_v9 = vmul.f32 %v4572_v63, %v4572_v63  ;;  %v1874_v47 = vld [vmem:[%s6069_s5 + $0x10] sm:$0xff] }
  0xf8   : > { %v692_v58 = vrot.slane %v691_v54, 1  ;;  %v747_v12 = vmul.f32 0.001953125, %v679_v52 }
  0xf9   : > { %829 = vst [vmem:[#allocation1] ss:$4 sm:$0xff] %v746_v27  ;;  %v748_v60 = vmul.f32 0.001953125, %v686_v28  ;;  %v904_v5 = vadd.f32 %v884_v9, %v883_v3 }
  0xfa   : > { %v693_v59 = vadd.f32 %v692_v58, %v691_v54  ;;  %830 = vst [vmem:[#allocation1 + $0x1] ss:$4 sm:$0xff] %v747_v12  ;;  %v1877_v58 = vld [vmem:[%s6069_s5 + $0x28] sm:$0xff] }
  0xfb   : > { %831 = vst [vmem:[#allocation1 + $0x2] ss:$4 sm:$0xff] %v748_v60  ;;  %v4619_v46 = vpop.permute.xlu1 %1838 }
  0xfc   : > { %v749_v13 = vmul.f32 0.001953125, %v693_v59 }
  0xfd   : > { %1843 = vperm.xlu2 %3822, %v1813_v55  }
  0xfe   : > { %832 = vst [vmem:[#allocation1 + $0x3] ss:$4 sm:$0xff] %v749_v13  ;;  %v839_v15 = vld.sshfl [vmem:[#allocation1 + $0x20] sm:$0xff pattern:$0x73625140] }
  0xff   : > { %v840_v31 = vld.sshfl [vmem:[#allocation1 + $0x28] sm:$0xff pattern:$0x73625140]  ;;  %v4589_v33 = vsub.f32 %v4413_v21, %v839_v15  ;;  %v4601_v21 = vpop.permute.xlu2 %1823 }
 0x100   : > { %v4592_v17 = vsub.f32 %v4416_v22, %v840_v31  ;;  %v1875_v22 = vld [vmem:[%s6069_s5 + $0x18] sm:$0xff] }
 0x102   : > { %1887 = vperm.xlu0 %3823, %v1873_v61  }
 0x105   : > { %v837_v14 = vld.sshfl [vmem:[#allocation1] sm:$0xff pattern:$0x73625140]  ;;  %v838_v10 = vld.sshfl [vmem:[#allocation1 + $0x8] sm:$0xff pattern:$0x73625140] }
 0x106   : > { %v4579_v23 = vsub.f32 %v4407_v19, %v837_v14  ;;  %v4582_v24 = vsub.f32 %v4410_v20, %v838_v10  ;;  %v887_v19 = vmul.f32 %v4589_v33, %v4589_v33  ;;  %v888_v20 = vmul.f32 %v4592_v17, %v4592_v17 }
 0x107   : > { %v4614_v44 = vpop.permute.xlu2 %1833 }
 0x108   : > { %v885_v16 = vmul.f32 %v4579_v23, %v4579_v23  ;;  %v886_v32 = vmul.f32 %v4582_v24, %v4582_v24  ;;  %v910_v35 = vadd.f32 %v888_v20, %v887_v19  ;;  %v4646_v20 = vpop.permute.xlu0 %1828 }
 0x10a   : > { %v907_v34 = vadd.f32 %v886_v32, %v885_v16 }
 0x118   : > { %905 = vadd.xlane.f32.xlu1 %v904_v5 }
 0x126   : > { %908 = vadd.xlane.f32.xlu2 %v907_v34 }
 0x12c   : > { %911 = vadd.xlane.f32.xlu0 %v910_v35 }
 0x131   : > { %1882 = vperm.xlu1 %3821, %v1872_v36  }
 0x139   : > { %1897 = vperm.xlu1 %3821, %v1875_v22  }
 0x13e   : > { %1853 = vperm.xlu2 %3822, %v1815_v11  }
 0x140   : > { %1902 = vperm.xlu0 %3823, %v1876_v43  }
 0x141   : > { %1912 = vperm.xlu1 %3821, %v1878_v45  }
 0x146   : > { %1892 = vperm.xlu2 %3822, %v1874_v47   ;;  %v891_v25 = vpop.xlane.xlu2 %890 }
 0x147   : > { %v924_v7 = vperm.slane %v891_v25, %v4437_v38  ;;  %v928_v48 = vperm.slane %v891_v25, %v4439_v39  ;;  %v932_v8 = vperm.slane %v891_v25, %v4441_v40  ;;  %v936_v2 = vperm.slane %v891_v25, %v4443_v41 }
 0x148   : > { %1917 = vperm.xlu0 %3823, %v1879_v18   ;;  %v897_v4 = vpop.xlane.xlu1 %896 }
 0x149   : > { %v1081_v51 = vsel %vm497_vm0, %v924_v7, 0.0  ;;  %v1088_v26 = vsel %vm497_vm0, %v928_v48, 0.0  ;;  %v1095_v52 = vsel %vm497_vm0, %v932_v8, 0.0  ;;  %v1102_v53 = vsel %vm497_vm0, %v936_v2, 0.0 }
 0x14a   : > { %v1082_v54 = vrot.slane %v1081_v51, 4  ;;  %v1089_v27 = vrot.slane %v1088_v26, 4  ;;  %v1096_v55 = vrot.slane %v1095_v52, 4  ;;  %v1103_v28 = vrot.slane %v1102_v53, 4 }
 0x14b   : > { %v956_v12 = vperm.slane %v897_v4, %v4437_v38  ;;  %v960_v59 = vperm.slane %v897_v4, %v4439_v39  ;;  %v964_v60 = vperm.slane %v897_v4, %v4441_v40  ;;  %v968_v13 = vperm.slane %v897_v4, %v4443_v41 }
 0x14c   : > { %v1083_v61 = vadd.f32 %v1082_v54, %v1081_v51  ;;  %v1090_v3 = vadd.f32 %v1089_v27, %v1088_v26  ;;  %v1097_v9 = vadd.f32 %v1096_v55, %v1095_v52  ;;  %v1104_v5 = vadd.f32 %v1103_v28, %v1102_v53 }
 0x14d   : > { %v1137_v14 = vsel %vm497_vm0, %v956_v12, 0.0  ;;  %v1144_v10 = vsel %vm497_vm0, %v960_v59, 0.0  ;;  %v1151_v15 = vsel %vm497_vm0, %v964_v60, 0.0  ;;  %v1158_v31 = vsel %vm497_vm0, %v968_v13, 0.0 }
 0x14e   : > { %v1084_v16 = vrot.slane %v1083_v61, 2  ;;  %v1091_v32 = vrot.slane %v1090_v3, 2  ;;  %v1098_v34 = vrot.slane %v1097_v9, 2  ;;  %v1105_v19 = vrot.slane %v1104_v5, 2  ;;  %1907 = vperm.xlu2 %3822, %v1877_v58  }
 0x14f   : > { %v1138_v35 = vrot.slane %v1137_v14, 4  ;;  %v1145_v36 = vrot.slane %v1144_v10, 4  ;;  %v1152_v22 = vrot.slane %v1151_v15, 4  ;;  %v1159_v11 = vrot.slane %v1158_v31, 4 }
 0x150   : > { %v1085_v43 = vadd.f32 %v1084_v16, %v1083_v61  ;;  %v1092_v45 = vadd.f32 %v1091_v32, %v1090_v3  ;;  %v1099_v47 = vadd.f32 %v1098_v34, %v1097_v9  ;;  %v1106_v18 = vadd.f32 %v1105_v19, %v1104_v5  ;;  %v4648_v32 = vpop.xlane.xlu0 %893 }
 0x151   : > { %v1139_v25 = vadd.f32 %v1138_v35, %v1137_v14  ;;  %v1146_v7 = vadd.f32 %v1145_v36, %v1144_v10  ;;  %v1153_v48 = vadd.f32 %v1152_v22, %v1151_v15  ;;  %v1160_v8 = vadd.f32 %v1159_v11, %v1158_v31 }
 0x152   : > { %v1086_v2 = vrot.slane %v1085_v43, 1  ;;  %v1093_v4 = vrot.slane %v1092_v45, 1  ;;  %v1100_v51 = vrot.slane %v1099_v47, 1  ;;  %v1107_v26 = vrot.slane %v1106_v18, 1 }
 0x153   : > { %v1140_v52 = vrot.slane %v1139_v25, 2  ;;  %v1147_v53 = vrot.slane %v1146_v7, 2  ;;  %v1154_v54 = vrot.slane %v1153_v48, 2  ;;  %v1161_v27 = vrot.slane %v1160_v8, 2 }
 0x154   : > { %v1087_v55 = vadd.f32 %v1086_v2, %v1085_v43  ;;  %v1094_v28 = vadd.f32 %v1093_v4, %v1092_v45  ;;  %v1101_v58 = vadd.f32 %v1100_v51, %v1099_v47  ;;  %v1108_v12 = vadd.f32 %v1107_v26, %v1106_v18 }
 0x155   : > { %v1141_v59 = vadd.f32 %v1140_v52, %v1139_v25  ;;  %v1148_v60 = vadd.f32 %v1147_v53, %v1146_v7  ;;  %v1155_v13 = vadd.f32 %v1154_v54, %v1153_v48  ;;  %v1162_v61 = vadd.f32 %v1161_v27, %v1160_v8 }
 0x156   : > { %v1305_v3 = vmul.f32 0.001953125, %v1087_v55  ;;  %v1306_v9 = vmul.f32 0.001953125, %v1094_v28  ;;  %v1307_v5 = vmul.f32 0.001953125, %v1101_v58  ;;  %v1308_v14 = vmul.f32 0.001953125, %v1108_v12 }
 0x157   : > { %v1142_v10 = vrot.slane %v1141_v59, 1  ;;  %v1149_v15 = vrot.slane %v1148_v60, 1  ;;  %v1156_v31 = vrot.slane %v1155_v13, 1  ;;  %v1163_v16 = vrot.slane %v1162_v61, 1 }
 0x158   : > { %v4650_v34 = vadd.f32 1e-05, %v1305_v3  ;;  %v4652_v19 = vadd.f32 1e-05, %v1306_v9  ;;  %v4654_v35 = vadd.f32 1e-05, %v1307_v5  ;;  %v940_v45 = vperm.slane %v4648_v32, %v4437_v38 }
 0x159   : > { %v4656_v36 = vadd.f32 1e-05, %v1308_v14  ;;  %v1143_v22 = vadd.f32 %v1142_v10, %v1141_v59  ;;  %v1150_v11 = vadd.f32 %v1149_v15, %v1148_v60  ;;  %v1157_v43 = vadd.f32 %v1156_v31, %v1155_v13 }
 0x15a   : > { %3824 = vrsqrt.f32 %v4650_v34  ;;  %v1164_v47 = vadd.f32 %v1163_v16, %v1162_v61  ;;  %v944_v48 = vperm.slane %v4648_v32, %v4439_v39  ;;  %v1109_v26 = vsel %vm497_vm0, %v940_v45, 0.0 }
 0x15b   : > { %3826 = vrsqrt.f32 %v4652_v19  ;;  %v1313_v18 = vmul.f32 0.001953125, %v1143_v22  ;;  %v1314_v25 = vmul.f32 0.001953125, %v1150_v11  ;;  %v1315_v7 = vmul.f32 0.001953125, %v1157_v43 }
 0x15c   : > { %3828 = vrsqrt.f32 %v4654_v35  ;;  %v1316_v8 = vmul.f32 0.001953125, %v1164_v47  ;;  %v1110_v53 = vrot.slane %v1109_v26, 4  ;;  %v1116_v27 = vsel %vm497_vm0, %v944_v48, 0.0 }
 0x15d   : > { %3830 = vrsqrt.f32 %v4656_v36  ;;  %v4666_v2 = vadd.f32 1e-05, %v1313_v18  ;;  %v4668_v4 = vadd.f32 1e-05, %v1314_v25  ;;  %v4670_v51 = vadd.f32 1e-05, %v1315_v7 }
 0x15e   : > { %v4673_v52 = vadd.f32 1e-05, %v1316_v8  ;;  %vm1375_vm1 = vweird.f32 %v4650_v34  ;;  %vm1385_vm2 = vweird.f32 %v4652_v19  ;;  %v948_v59 = vperm.slane %v4648_v32, %v4441_v40 }
 0x15f   : > { %3832 = vrsqrt.f32 %v4666_v2  ;;  %v4694_v60 = vadd.f32 %v1110_v53, %v1109_v26  ;;  %vm1395_vm3 = vweird.f32 %v4654_v35  ;;  %v952_v9 = vperm.slane %v4648_v32, %v4443_v41 }
 0x160   : > { %v4676_v54 = vpop.eup %3824  ;;  %3834 = vrsqrt.f32 %v4668_v4  ;;  %v1117_v5 = vrot.slane %v1116_v27, 4  ;;  %vm1405_vm6 = vweird.f32 %v4656_v36  ;;  %vm1455_vm9 = vweird.f32 %v4666_v2 }
 0x161   : > { %v4680_v55 = vpop.eup %3826  ;;  %v1370_v28 = vmul.f32 %v4676_v54, %v4650_v34  ;;  %3836 = vrsqrt.f32 %v4670_v51  ;;  %vm1376_vm4 = vweird.f32 %v4676_v54  ;;  %v1112_v47 = vrot.slane %v4694_v60, 2 }
 0x162   : > { %v4686_v58 = vpop.eup %3828  ;;  %v1380_v12 = vmul.f32 %v4680_v55, %v4652_v19  ;;  %3838 = vrsqrt.f32 %v4673_v52  ;;  %vm1386_vm5 = vweird.f32 %v4680_v55  ;;  %v1118_v8 = vadd.f32 %v1117_v5, %v1116_v27  ;;  %vm1377_vm10 = vmor %vm1375_vm1, %vm1376_vm4 }
 0x163   : > { %v4696_v13 = vpop.eup %3830  ;;  %v1371_v61 = vmul.f32 %v4676_v54, %v1370_v28  ;;  %v1390_v3 = vmul.f32 %v4686_v58, %v4654_v35  ;;  %vm1396_vm7 = vweird.f32 %v4686_v58  ;;  %vm1465_vm11 = vweird.f32 %v4668_v4  ;;  %vm1387_vm12 = vmor %vm1385_vm2, %vm1386_vm5 }
 0x164   : > { %v1381_v14 = vmul.f32 %v4680_v55, %v1380_v12  ;;  %v1400_v10 = vmul.f32 %v4696_v13, %v4656_v36  ;;  %vm1406_vm8 = vweird.f32 %v4696_v13  ;;  %vm1475_vm13 = vweird.f32 %v4670_v51  ;;  %vm1397_vm14 = vmor %vm1395_vm3, %vm1396_vm7 }
 0x165   : > { %v4710_v15 = vpop.eup %3832  ;;  %v1372_v31 = vmul.f32 0.5, %v1371_v61  ;;  %v1391_v16 = vmul.f32 %v4686_v58, %v1390_v3  ;;  %vm1485_vm15 = vweird.f32 %v4673_v52  ;;  %vm1407_vm1 = vmor %vm1405_vm6, %vm1406_vm8  ;;  %v1119_v36 = vrot.slane %v1118_v8, 2 }
 0x166   : > { %v4715_v22 = vpop.eup %3834  ;;  %v1382_v11 = vmul.f32 0.5, %v1381_v14  ;;  %v1401_v43 = vmul.f32 %v4696_v13, %v1400_v10  ;;  %v1450_v45 = vmul.f32 %v4710_v15, %v4666_v2  ;;  %vm1456_vm2 = vweird.f32 %v4710_v15 }
 0x167   : > { %v4721_v18 = vpop.eup %3836  ;;  %v1373_v25 = vsub.f32 1.5, %v1372_v31  ;;  %v1392_v7 = vmul.f32 0.5, %v1391_v16  ;;  %v1460_v48 = vmul.f32 %v4715_v22, %v4668_v4  ;;  %v1123_v31 = vsel %vm497_vm0, %v948_v59, 0.0  ;;  %vm4779_vm6 = vmor %vm1455_vm9, %vm1456_vm2 }
 0x168   : > { %v4725_v26 = vpop.eup %3838  ;;  %v1383_v53 = vsub.f32 1.5, %v1382_v11  ;;  %v1402_v28 = vmul.f32 0.5, %v1401_v43  ;;  %v1451_v12 = vmul.f32 %v4710_v15, %v1450_v45  ;;  %v1470_v61 = vmul.f32 %v4721_v18, %v4670_v51 }
 0x169   : > { %v1374_v3 = vmul.f32 %v4676_v54, %v1373_v25  ;;  %v1393_v14 = vsub.f32 1.5, %v1392_v7  ;;  %v1461_v10 = vmul.f32 %v4715_v22, %v1460_v48  ;;  %v1480_v34 = vmul.f32 %v4725_v26, %v4673_v52 }
 0x16a   : > { %v1384_v27 = vmul.f32 %v4680_v55, %v1383_v53  ;;  %v1403_v5 = vsub.f32 1.5, %v1402_v28  ;;  %v1452_v16 = vmul.f32 0.5, %v1451_v12  ;;  %v1471_v11 = vmul.f32 %v4721_v18, %v1470_v61 }
 0x16b   : > { %v1378_v43 = vsel %vm1377_vm10, %v4676_v54, %v1374_v3  ;;  %v1394_v59 = vmul.f32 %v4686_v58, %v1393_v14  ;;  %v1462_v45 = vmul.f32 0.5, %v1461_v10  ;;  %v1481_v35 = vmul.f32 %v4725_v26, %v1480_v34  ;;  %v900_v14 = vpop.xlane.xlu2 %899 }
 0x16c   : > { %v1388_v25 = vsel %vm1387_vm12, %v4680_v55, %v1384_v27  ;;  %v1404_v54 = vmul.f32 %v4696_v13, %v1403_v5  ;;  %1721 = vst [vmem:[#allocation1] ss:$4 sm:$0xff] %v1378_v43  ;;  %v1453_v19 = vsub.f32 1.5, %v1452_v16  ;;  %v1472_v7 = vmul.f32 0.5, %v1471_v11 }
 0x16d   : > { %v1398_v48 = vsel %vm1397_vm14, %v4686_v58, %v1394_v59  ;;  %1723 = vst [vmem:[#allocation1 + $0x1] ss:$4 sm:$0xff] %v1388_v25  ;;  %v1463_v55 = vsub.f32 1.5, %v1462_v45  ;;  %vm1466_vm3 = vweird.f32 %v4715_v22  ;;  %v1113_v12 = vadd.f32 %v1112_v47, %v4694_v60 }
 0x16e   : > { %v1408_v53 = vsel %vm1407_vm1, %v4696_v13, %v1404_v54  ;;  %1725 = vst [vmem:[#allocation1 + $0x2] ss:$4 sm:$0xff] %v1398_v48  ;;  %v1473_v28 = vsub.f32 1.5, %v1472_v7  ;;  %v1454_v58 = vmul.f32 %v4710_v15, %v1453_v19  ;;  %v1482_v61 = vmul.f32 0.5, %v1481_v35  ;;  %vm4792_vm7 = vmor %vm1465_vm11, %vm1466_vm3  ;;  %v4819_v35 = vpop.xlane.xlu0 %902 }
 0x16f   : > { %1727 = vst [vmem:[#allocation1 + $0x3] ss:$4 sm:$0xff] %v1408_v53  ;;  %v1124_v3 = vrot.slane %v1123_v31, 4  ;;  %vm1476_vm4 = vweird.f32 %v4721_v18  ;;  %vm1486_vm5 = vweird.f32 %v4725_v26  ;;  %v1114_v10 = vrot.slane %v1113_v12, 1 }
 0x170   : > { %v1130_v13 = vsel %vm497_vm0, %v952_v9, 0.0  ;;  %v1464_v27 = vmul.f32 %v4715_v22, %v1463_v55  ;;  %v1483_v60 = vsub.f32 1.5, %v1482_v61  ;;  %v1120_v47 = vadd.f32 %v1119_v36, %v1118_v8  ;;  %vm4801_vm8 = vmor %vm1475_vm13, %vm1476_vm4 }
 0x171   : > { %v1125_v5 = vadd.f32 %v1124_v3, %v1123_v31  ;;  %v1474_v11 = vmul.f32 %v4721_v18, %v1473_v28  ;;  %v1115_v43 = vadd.f32 %v1114_v10, %v1113_v12  ;;  %v1131_v59 = vrot.slane %v1130_v13, 4  ;;  %vm4814_vm9 = vmor %vm1485_vm15, %vm1486_vm5 }
 0x172   : > { %v972_v32 = vperm.slane %v900_v14, %v4437_v38  ;;  %v1458_v9 = vsel %vm4779_vm6, %v4710_v15, %v1454_v58  ;;  %v1484_v8 = vmul.f32 %v4725_v26, %v1483_v60  ;;  %v1121_v31 = vrot.slane %v1120_v47, 1 }
 0x173   : > { %v1126_v45 = vrot.slane %v1125_v5, 2  ;;  %v1132_v15 = vadd.f32 %v1131_v59, %v1130_v13  ;;  %v1309_v25 = vmul.f32 0.001953125, %v1115_v43  ;;  %v976_v4 = vperm.slane %v900_v14, %v4439_v39 }
 0x174   : > { %v980_v54 = vperm.slane %v900_v14, %v4441_v40  ;;  %v1468_v19 = vsel %vm4792_vm7, %v4715_v22, %v1464_v27  ;;  %v1122_v7 = vadd.f32 %v1121_v31, %v1120_v47  ;;  %v1165_v55 = vsel %vm497_vm0, %v972_v32, 0.0 }
 0x175   : > { %v1127_v48 = vadd.f32 %v1126_v45, %v1125_v5  ;;  %v1478_v22 = vsel %vm4801_vm8, %v4721_v18, %v1474_v11  ;;  %v1488_v52 = vsel %vm4814_vm9, %v4725_v26, %v1484_v8  ;;  %v984_v12 = vperm.slane %v900_v14, %v4443_v41 }
 0x176   : > { %v4821_v53 = vld.sshfl [vmem:[#allocation1] sm:$0xff pattern:$0x73625140]  ;;  %v4823_v28 = vld.sshfl [vmem:[#allocation1 + $0x8] sm:$0xff pattern:$0x73625140]  ;;  %v988_v18 = vperm.slane %v4819_v35, %v4437_v38 }
 0x177   : > { %1740 = vst [vmem:[#allocation1] ss:$4 sm:$0xff] %v1458_v9  ;;  %v1128_v58 = vrot.slane %v1127_v48, 1  ;;  %v1133_v61 = vrot.slane %v1132_v15, 2  ;;  %v1310_v36 = vmul.f32 0.001953125, %v1122_v7  ;;  %v1166_v3 = vrot.slane %v1165_v55, 4 }
 0x178   : > { %1741 = vst [vmem:[#allocation1 + $0x1] ss:$4 sm:$0xff] %v1468_v19  ;;  %v4832_v10 = vadd.f32 1e-05, %v1309_v25  ;;  %v1172_v13 = vsel %vm497_vm0, %v976_v4, 0.0  ;;  %v1179_v27 = vsel %vm497_vm0, %v980_v54, 0.0  ;;  %v992_v7 = vperm.slane %v4819_v35, %v4439_v39 }
 0x179   : > { %1742 = vst [vmem:[#allocation1 + $0x2] ss:$4 sm:$0xff] %v1478_v22  ;;  %v1129_v60 = vadd.f32 %v1128_v58, %v1127_v48  ;;  %v1134_v26 = vadd.f32 %v1133_v61, %v1132_v15  ;;  %v4838_v47 = vadd.f32 1e-05, %v1310_v36  ;;  %v1167_v14 = vadd.f32 %v1166_v3, %v1165_v55 }
 0x17a   : > { %1743 = vst [vmem:[#allocation1 + $0x3] ss:$4 sm:$0xff] %v1488_v52  ;;  %3840 = vrsqrt.f32 %v4832_v10  ;;  %v1173_v5 = vrot.slane %v1172_v13, 4  ;;  %v1180_v16 = vrot.slane %v1179_v27, 4  ;;  %v1186_v2 = vsel %vm497_vm0, %v984_v12, 0.0 }
 0x17b   : > { %v1135_v11 = vrot.slane %v1134_v26, 1  ;;  %v1311_v43 = vmul.f32 0.001953125, %v1129_v60  ;;  %3842 = vrsqrt.f32 %v4838_v47  ;;  %v1168_v59 = vrot.slane %v1167_v14, 2 }
 0x17c   : > { %v1174_v32 = vadd.f32 %v1173_v5, %v1172_v13  ;;  %v1181_v9 = vadd.f32 %v1180_v16, %v1179_v27  ;;  %v1187_v45 = vrot.slane %v1186_v2, 4  ;;  %v1193_v34 = vsel %vm497_vm0, %v988_v18, 0.0 }
 0x17d   : > { %v1136_v8 = vadd.f32 %v1135_v11, %v1134_v26  ;;  %v4843_v31 = vadd.f32 1e-05, %v1311_v43  ;;  %v1169_v15 = vadd.f32 %v1168_v59, %v1167_v14  ;;  %v1194_v54 = vrot.slane %v1193_v34, 4 }
 0x17e   : > { %v1175_v25 = vrot.slane %v1174_v32, 2  ;;  %v1182_v4 = vrot.slane %v1181_v9, 2  ;;  %v1188_v51 = vadd.f32 %v1187_v45, %v1186_v2  ;;  %v996_v12 = vperm.slane %v4819_v35, %v4441_v40 }
 0x17f   : > { %v1312_v19 = vmul.f32 0.001953125, %v1136_v8  ;;  %3844 = vrsqrt.f32 %v4843_v31  ;;  %v1170_v55 = vrot.slane %v1169_v15, 1  ;;  %v1195_v13 = vadd.f32 %v1194_v54, %v1193_v34 }
 0x180   : > { %v3841_v48 = vpop.eup %3840  ;;  %v1176_v22 = vadd.f32 %v1175_v25, %v1174_v32  ;;  %v1183_v52 = vadd.f32 %v1182_v4, %v1181_v9  ;;  %v1189_v3 = vrot.slane %v1188_v51, 2  ;;  %v1000_v26 = vperm.slane %v4819_v35, %v4443_v41 }
 0x181   : > { %v3843_v58 = vpop.eup %3842  ;;  %v4851_v61 = vadd.f32 1e-05, %v1312_v19  ;;  %v1410_v36 = vmul.f32 %v3841_v48, %v4832_v10  ;;  %v1171_v18 = vadd.f32 %v1170_v55, %v1169_v15  ;;  %vm1415_vm10 = vweird.f32 %v4832_v10 }
 0x182   : > { %v1420_v27 = vmul.f32 %v3843_v58, %v4838_v47  ;;  %v1177_v60 = vrot.slane %v1176_v22, 1  ;;  %v1184_v5 = vrot.slane %v1183_v52, 1  ;;  %v1190_v43 = vadd.f32 %v1189_v3, %v1188_v51 }
 0x183   : > { %v1411_v14 = vmul.f32 %v3841_v48, %v1410_v36  ;;  %3846 = vrsqrt.f32 %v4851_v61  ;;  %v1317_v59 = vmul.f32 0.001953125, %v1171_v18  ;;  %vm1416_vm11 = vweird.f32 %v3841_v48 }
 0x184   : > { %v1421_v16 = vmul.f32 %v3843_v58, %v1420_v27  ;;  %v1178_v11 = vadd.f32 %v1177_v60, %v1176_v22  ;;  %v1185_v2 = vadd.f32 %v1184_v5, %v1183_v52  ;;  %v1196_v8 = vrot.slane %v1195_v13, 2  ;;  %vm1417_vm13 = vmor %vm1415_vm10, %vm1416_vm11 }
 0x185   : > { %v3845_v32 = vpop.eup %3844  ;;  %v1412_v9 = vmul.f32 0.5, %v1411_v14  ;;  %vm1426_vm12 = vweird.f32 %v3843_v58  ;;  %v1191_v15 = vrot.slane %v1190_v43, 1  ;;  %v4860_v19 = vadd.f32 1e-05, %v1317_v59 }
 0x186   : > { %v1422_v45 = vmul.f32 0.5, %v1421_v16  ;;  %v1430_v34 = vmul.f32 %v3845_v32, %v4843_v31  ;;  %v1318_v4 = vmul.f32 0.001953125, %v1178_v11  ;;  %v1319_v54 = vmul.f32 0.001953125, %v1185_v2 }
 0x187   : > { %v1413_v25 = vsub.f32 1.5, %v1412_v9  ;;  %v1192_v22 = vadd.f32 %v1191_v15, %v1190_v43  ;;  %v1197_v51 = vadd.f32 %v1196_v8, %v1195_v13  ;;  %3848 = vrsqrt.f32 %v4860_v19 }
 0x188   : > { %v1423_v55 = vsub.f32 1.5, %v1422_v45  ;;  %v1431_v36 = vmul.f32 %v3845_v32, %v1430_v34  ;;  %v4864_v18 = vadd.f32 1e-05, %v1318_v4  ;;  %v4866_v52 = vadd.f32 1e-05, %v1319_v54 }
 0x189   : > { %v4862_v3 = vpop.eup %3846  ;;  %v1414_v27 = vmul.f32 %v3841_v48, %v1413_v25  ;;  %vm1425_vm14 = vweird.f32 %v4838_v47  ;;  %v1320_v16 = vmul.f32 0.001953125, %v1192_v22  ;;  %v1200_v11 = vsel %vm497_vm0, %v992_v7, 0.0 }
 0x18a   : > { %v1424_v60 = vmul.f32 %v3843_v58, %v1423_v55  ;;  %v1432_v14 = vmul.f32 0.5, %v1431_v36  ;;  %v1440_v13 = vmul.f32 %v4862_v3, %v4851_v61  ;;  %vm1427_vm15 = vmor %vm1425_vm14, %vm1426_vm12  ;;  %3850 = vrsqrt.f32 %v4864_v18 }
 0x18b   : > { %v1418_v5 = vsel %vm1417_vm13, %v3841_v48, %v1414_v27  ;;  %vm1436_vm1 = vweird.f32 %v3845_v32  ;;  %vm1435_vm2 = vweird.f32 %v4843_v31  ;;  %v4880_v47 = vadd.f32 1e-05, %v1320_v16  ;;  %v4906_v27 = vpop.permute.xlu1 %1848 }
 0x18c   : > { %v1428_v43 = vsel %vm1427_vm15, %v3843_v58, %v1424_v60  ;;  %v1433_v59 = vsub.f32 1.5, %v1432_v14  ;;  %v1441_v10 = vmul.f32 %v4862_v3, %v1440_v13  ;;  %1729 = vst [vmem:[#allocation1 + $0x20] ss:$4 sm:$0xff] %v1418_v5  ;;  %3852 = vrsqrt.f32 %v4866_v52  ;;  %vm1437_vm3 = vmor %vm1435_vm2, %vm1436_vm1 }
 0x18d   : > { %1731 = vst [vmem:[#allocation1 + $0x21] ss:$4 sm:$0xff] %v1428_v43  ;;  %v1198_v48 = vrot.slane %v1197_v51, 1  ;;  %v1201_v8 = vrot.slane %v1200_v11, 4  ;;  %v1207_v7 = vsel %vm497_vm0, %v996_v12, 0.0  ;;  %v4887_v58 = vpop.eup %3848  ;;  %vm1445_vm4 = vweird.f32 %v4851_v61 }
 0x18e   : > { %v1434_v9 = vmul.f32 %v3845_v32, %v1433_v59  ;;  %v1442_v2 = vmul.f32 0.5, %v1441_v10  ;;  %3854 = vrsqrt.f32 %v4880_v47  ;;  %v1208_v45 = vrot.slane %v1207_v7, 4 }
 0x18f   : > { %v1199_v31 = vadd.f32 %v1198_v48, %v1197_v51  ;;  %vm1446_vm5 = vweird.f32 %v4862_v3  ;;  %v1490_v25 = vmul.f32 %v4887_v58, %v4860_v19  ;;  %vm1495_vm6 = vweird.f32 %v4860_v19 }
 0x190   : > { %v1438_v34 = vsel %vm1437_vm3, %v3845_v32, %v1434_v9  ;;  %v1443_v15 = vsub.f32 1.5, %v1442_v2  ;;  %v4894_v4 = vpop.eup %3850  ;;  %v1202_v12 = vadd.f32 %v1201_v8, %v1200_v11  ;;  %v1209_v54 = vadd.f32 %v1208_v45, %v1207_v7  ;;  %vm1447_vm8 = vmor %vm1445_vm4, %vm1446_vm5 }
 0x191   : > { %1733 = vst [vmem:[#allocation1 + $0x22] ss:$4 sm:$0xff] %v1438_v34  ;;  %v1214_v55 = vsel %vm497_vm0, %v1000_v26, 0.0  ;;  %v1321_v36 = vmul.f32 0.001953125, %v1199_v31  ;;  %v1491_v22 = vmul.f32 %v4887_v58, %v1490_v25  ;;  %v1500_v51 = vmul.f32 %v4894_v4, %v4864_v18 }
 0x192   : > { %v1444_v32 = vmul.f32 %v4862_v3, %v1443_v15  ;;  %vm1505_vm7 = vweird.f32 %v4864_v18  ;;  %v4908_v60 = vpop.eup %3852  ;;  %vm1496_vm9 = vweird.f32 %v4887_v58  ;;  %v1203_v35 = vrot.slane %v1202_v12, 2 }
 0x193   : > { %v1210_v26 = vrot.slane %v1209_v54, 2  ;;  %v1215_v14 = vrot.slane %v1214_v55, 4  ;;  %v1492_v5 = vmul.f32 0.5, %v1491_v22  ;;  %v1501_v16 = vmul.f32 %v4894_v4, %v1500_v51  ;;  %vm4932_vm13 = vmor %vm1495_vm6, %vm1496_vm9 }
 0x194   : > { %v1448_v13 = vsel %vm1447_vm8, %v4862_v3, %v1444_v32  ;;  %v1510_v11 = vmul.f32 %v4908_v60, %v4866_v52  ;;  %vm1515_vm10 = vweird.f32 %v4866_v52  ;;  %v3855_v43 = vpop.eup %3854  ;;  %v1204_v59 = vadd.f32 %v1203_v35, %v1202_v12 }
 0x195   : > { %1735 = vst [vmem:[#allocation1 + $0x23] ss:$4 sm:$0xff] %v1448_v13  ;;  %v1211_v61 = vadd.f32 %v1210_v26, %v1209_v54  ;;  %v1216_v10 = vadd.f32 %v1215_v14, %v1214_v55  ;;  %v4920_v48 = vadd.f32 1e-05, %v1321_v36  ;;  %v1493_v9 = vsub.f32 1.5, %v1492_v5  ;;  %v906_v26 = vpop.xlane.xlu1 %905 }
 0x196   : > { %v1502_v2 = vmul.f32 0.5, %v1501_v16  ;;  %v1511_v8 = vmul.f32 %v4908_v60, %v1510_v11  ;;  %v1520_v3 = vmul.f32 %v3855_v43, %v4880_v47  ;;  %vm1525_vm11 = vweird.f32 %v4880_v47 }
 0x197   : > { %vm1506_vm12 = vweird.f32 %v4894_v4  ;;  %v1205_v7 = vrot.slane %v1204_v59, 1  ;;  %v1212_v31 = vrot.slane %v1211_v61, 1  ;;  %v1217_v45 = vrot.slane %v1216_v10, 2 }
 0x198   : > { %v1494_v34 = vmul.f32 %v4887_v58, %v1493_v9  ;;  %v1503_v15 = vsub.f32 1.5, %v1502_v2  ;;  %v1512_v25 = vmul.f32 0.5, %v1511_v8  ;;  %v1521_v12 = vmul.f32 %v3855_v43, %v1520_v3  ;;  %vm4945_vm15 = vmor %vm1505_vm7, %vm1506_vm12 }
 0x199   : > { %v1206_v54 = vadd.f32 %v1205_v7, %v1204_v59  ;;  %v1213_v55 = vadd.f32 %v1212_v31, %v1211_v61  ;;  %v1218_v36 = vadd.f32 %v1217_v45, %v1216_v10  ;;  %3856 = vrsqrt.f32 %v4920_v48 }
 0x19a   : > { %v1504_v22 = vmul.f32 %v4894_v4, %v1503_v15  ;;  %v1513_v51 = vsub.f32 1.5, %v1512_v25  ;;  %vm1516_vm14 = vweird.f32 %v4908_v60  ;;  %v1522_v35 = vmul.f32 0.5, %v1521_v12  ;;  %v1888_v25 = vpop.permute.xlu0 %1887 }
 0x19b   : > { %v1498_v14 = vsel %vm4932_vm13, %v4887_v58, %v1494_v34  ;;  %v1219_v13 = vrot.slane %v1218_v36, 1  ;;  %v1322_v5 = vmul.f32 0.001953125, %v1206_v54  ;;  %v1323_v16 = vmul.f32 0.001953125, %v1213_v55  ;;  %vm4955_vm2 = vmor %vm1515_vm10, %vm1516_vm14 }
 0x19c   : > { %v1508_v11 = vsel %vm4945_vm15, %v4894_v4, %v1504_v22  ;;  %v1514_v59 = vmul.f32 %v4908_v60, %v1513_v51  ;;  %v1523_v61 = vsub.f32 1.5, %v1522_v35  ;;  %vm1526_vm1 = vweird.f32 %v3855_v43  ;;  %v1738_v58 = vld.sshfl [vmem:[#allocation1 + $0x20] sm:$0xff pattern:$0x73625140] }
 0x19d   : > { %v1739_v10 = vld.sshfl [vmem:[#allocation1 + $0x28] sm:$0xff pattern:$0x73625140]  ;;  %v1220_v9 = vadd.f32 %v1219_v13, %v1218_v36  ;;  %v4959_v2 = vadd.f32 1e-05, %v1322_v5  ;;  %v1794_v8 = vmul.f32 %v1738_v58, %v4510_v56  ;;  %v1004_v3 = vperm.slane %v906_v26, %v4437_v38  ;;  %vm1527_vm3 = vmor %vm1525_vm11, %vm1526_vm1 }
 0x19e   : > { %v1518_v4 = vsel %vm4955_vm2, %v4908_v60, %v1514_v59  ;;  %v1524_v7 = vmul.f32 %v3855_v43, %v1523_v61  ;;  %1744 = vst [vmem:[#allocation1 + $0x20] ss:$4 sm:$0xff] %v1498_v14  ;;  %v4966_v31 = vadd.f32 1e-05, %v1323_v16  ;;  %v1795_v52 = vmul.f32 %v1739_v10, %v4513_v57 }
 0x19f   : > { %v4969_v45 = vpop.eup %3856  ;;  %1745 = vst [vmem:[#allocation1 + $0x21] ss:$4 sm:$0xff] %v1508_v11  ;;  %v1324_v34 = vmul.f32 0.001953125, %v1220_v9  ;;  %3858 = vrsqrt.f32 %v4959_v2  ;;  %v1858_v56 = vmul.f32 %v4601_v21, %v1794_v8  ;;  %v1008_v57 = vperm.slane %v906_v26, %v4439_v39 }
 0x1a0   : > { %v1528_v15 = vsel %vm1527_vm3, %v3855_v43, %v1524_v7  ;;  %1746 = vst [vmem:[#allocation1 + $0x22] ss:$4 sm:$0xff] %v1518_v4  ;;  %v1530_v60 = vmul.f32 %v4969_v45, %v4920_v48  ;;  %3860 = vrsqrt.f32 %v4966_v31  ;;  %v1859_v47 = vmul.f32 %v4601_v21, %v1795_v52 }
 0x1a1   : > { %1747 = vst [vmem:[#allocation1 + $0x23] ss:$4 sm:$0xff] %v1528_v15  ;;  %v4979_v12 = vadd.f32 1e-05, %v1324_v34  ;;  %v1922_v54 = vadd.f32 %v1888_v25, %v1858_v56  ;;  %v1012_v36 = vperm.slane %v906_v26, %v4441_v40  ;;  %v1016_v43 = vperm.slane %v906_v26, %v4443_v41 }
 0x1a2   : > { %v1531_v55 = vmul.f32 %v4969_v45, %v1530_v60  ;;  %v1221_v32 = vsel %vm497_vm0, %v1004_v3, 0.0  ;;  %vm1535_vm4 = vweird.f32 %v4920_v48  ;;  %v1923_v22 = vadd.f32 %v1888_v25, %v1859_v47  ;;  %v5005_v34 = vld.sshfl [vmem:[#allocation1] sm:$0xff pattern:$0x73625140] }
 0x1a3   : > { %3862 = vrsqrt.f32 %v4979_v12  ;;  %v1222_v51 = vrot.slane %v1221_v32, 4  ;;  %v1228_v14 = vsel %vm497_vm0, %v1008_v57, 0.0  ;;  %v1235_v21 = vsel %vm497_vm0, %v1012_v36, 0.0  ;;  %v5007_v56 = vld.sshfl [vmem:[#allocation1 + $0x8] sm:$0xff pattern:$0x73625140]  ;;  %v912_v36 = vpop.xlane.xlu0 %911 }
 0x1a4   : > { %v1532_v35 = vmul.f32 0.5, %v1531_v55  ;;  %v1242_v19 = vsel %vm497_vm0, %v1016_v43, 0.0  ;;  %v1937_v5 = vpack.c.bf16 %v1923_v22, %v1922_v54  ;;  %v1229_v26 = vrot.slane %v1228_v14, 4 }
 0x1a5   : > { %v4991_v13 = vpop.eup %3858  ;;  %v1223_v16 = vadd.f32 %v1222_v51, %v1221_v32  ;;  %v1236_v11 = vrot.slane %v1235_v21, 4  ;;  %vm1536_vm5 = vweird.f32 %v4969_v45  ;;  %vm1545_vm6 = vweird.f32 %v4959_v2 }
 0x1a6   : > { %v4993_v59 = vpop.eup %3860  ;;  %v1533_v61 = vsub.f32 1.5, %v1532_v35  ;;  %v1540_v58 = vmul.f32 %v4991_v13, %v4959_v2  ;;  %v1243_v18 = vrot.slane %v1242_v19, 4  ;;  %vm1546_vm7 = vweird.f32 %v4991_v13  ;;  %1945 = vst [vmem:[#allocation2 + $0x8] sm:$0xff] %v1937_v5  ;;  %vm1537_vm9 = vmor %vm1535_vm4, %vm1536_vm5 }
 0x1a7   : > { %v1550_v10 = vmul.f32 %v4993_v59, %v4966_v31  ;;  %vm1555_vm8 = vweird.f32 %v4966_v31  ;;  %v1224_v9 = vrot.slane %v1223_v16, 2  ;;  %v1230_v8 = vadd.f32 %v1229_v26, %v1228_v14  ;;  %vm1547_vm13 = vmor %vm1545_vm6, %vm1546_vm7 }
 0x1a8   : > { %v1534_v3 = vmul.f32 %v4969_v45, %v1533_v61  ;;  %v1541_v4 = vmul.f32 %v4991_v13, %v1540_v58  ;;  %v1237_v7 = vadd.f32 %v1236_v11, %v1235_v21  ;;  %v1244_v52 = vadd.f32 %v1243_v18, %v1242_v19  ;;  %v5020_v61 = vpop.permute.xlu2 %1843 }
 0x1a9   : > { %v3863_v15 = vpop.eup %3862  ;;  %v1551_v60 = vmul.f32 %v4993_v59, %v1550_v10  ;;  %vm1556_vm10 = vweird.f32 %v4993_v59  ;;  %v1225_v25 = vadd.f32 %v1224_v9, %v1223_v16  ;;  %v1231_v57 = vrot.slane %v1230_v8, 2 }
 0x1aa   : > { %v1538_v47 = vsel %vm1537_vm9, %v4969_v45, %v1534_v3  ;;  %v1542_v54 = vmul.f32 0.5, %v1541_v4  ;;  %v1560_v55 = vmul.f32 %v3863_v15, %v4979_v12  ;;  %vm1565_vm11 = vweird.f32 %v4979_v12  ;;  %vm1557_vm14 = vmor %vm1555_vm8, %vm1556_vm10 }
 0x1ab   : > { %vm1566_vm12 = vweird.f32 %v3863_v15  ;;  %v1552_v43 = vmul.f32 0.5, %v1551_v60  ;;  %v1226_v32 = vrot.slane %v1225_v25, 1  ;;  %v1232_v22 = vadd.f32 %v1231_v57, %v1230_v8  ;;  %1752 = vst [vmem:[#allocation1] ss:$4 sm:$0xff] %v1538_v47 }
 0x1ac   : > { %v1238_v48 = vrot.slane %v1237_v7, 2  ;;  %v1543_v51 = vsub.f32 1.5, %v1542_v54  ;;  %v1561_v35 = vmul.f32 %v3863_v15, %v1560_v55  ;;  %v1245_v14 = vrot.slane %v1244_v52, 2  ;;  %vm1567_vm15 = vmor %vm1565_vm11, %vm1566_vm12 }
 0x1ad   : > { %v1036_v21 = vperm.slane %v912_v36, %v4437_v38  ;;  %v1553_v19 = vsub.f32 1.5, %v1552_v43  ;;  %v1227_v5 = vadd.f32 %v1226_v32, %v1225_v25  ;;  %v1233_v45 = vrot.slane %v1232_v22, 1 }
 0x1ae   : > { %v1239_v16 = vadd.f32 %v1238_v48, %v1237_v7  ;;  %v1544_v26 = vmul.f32 %v4991_v13, %v1543_v51  ;;  %v1562_v11 = vmul.f32 0.5, %v1561_v35  ;;  %v1246_v58 = vadd.f32 %v1245_v14, %v1244_v52 }
 0x1af   : > { %v1040_v18 = vperm.slane %v912_v36, %v4439_v39  ;;  %v1554_v10 = vmul.f32 %v4993_v59, %v1553_v19  ;;  %v1234_v9 = vadd.f32 %v1233_v45, %v1232_v22  ;;  %v1325_v3 = vmul.f32 0.001953125, %v1227_v5 }
 0x1b0   : > { %v1240_v8 = vrot.slane %v1239_v16, 1  ;;  %v1548_v4 = vsel %vm1547_vm13, %v4991_v13, %v1544_v26  ;;  %v1563_v7 = vsub.f32 1.5, %v1562_v11  ;;  %v1247_v52 = vrot.slane %v1246_v58, 1  ;;  %v5053_v5 = vpop.xlane.xlu2 %908 }
 0x1b1   : > { %v1044_v60 = vperm.slane %v912_v36, %v4441_v40  ;;  %v1558_v25 = vsel %vm1557_vm14, %v4993_v59, %v1554_v10  ;;  %v1326_v57 = vmul.f32 0.001953125, %v1234_v9  ;;  %v5035_v47 = vadd.f32 1e-05, %v1325_v3  ;;  %1753 = vst [vmem:[#allocation1 + $0x1] ss:$4 sm:$0xff] %v1548_v4 }
 0x1b2   : > { %v1241_v2 = vadd.f32 %v1240_v8, %v1239_v16  ;;  %v1564_v54 = vmul.f32 %v3863_v15, %v1563_v7  ;;  %v1248_v55 = vadd.f32 %v1247_v52, %v1246_v58  ;;  %v1048_v13 = vperm.slane %v912_v36, %v4443_v41  ;;  %1754 = vst [vmem:[#allocation1 + $0x2] ss:$4 sm:$0xff] %v1558_v25 }
 0x1b3   : > { %v1277_v43 = vsel %vm497_vm0, %v1036_v21, 0.0  ;;  %v5042_v32 = vadd.f32 1e-05, %v1326_v57  ;;  %3864 = vrsqrt.f32 %v5035_v47  ;;  %v1284_v51 = vsel %vm497_vm0, %v1040_v18, 0.0 }
 0x1b4   : > { %v1327_v31 = vmul.f32 0.001953125, %v1241_v2  ;;  %v1568_v59 = vsel %vm1567_vm15, %v3863_v15, %v1564_v54  ;;  %v1328_v22 = vmul.f32 0.001953125, %v1248_v55  ;;  %v1278_v48 = vrot.slane %v1277_v43, 4 }
 0x1b5   : > { %3866 = vrsqrt.f32 %v5042_v32  ;;  %v1285_v36 = vrot.slane %v1284_v51, 4  ;;  %1755 = vst [vmem:[#allocation1 + $0x3] ss:$4 sm:$0xff] %v1568_v59  ;;  %v1291_v21 = vsel %vm497_vm0, %v1044_v60, 0.0  ;;  %v1298_v19 = vsel %vm497_vm0, %v1048_v13, 0.0 }
 0x1b6   : > { %v5046_v35 = vadd.f32 1e-05, %v1327_v31  ;;  %v5049_v14 = vadd.f32 1e-05, %v1328_v22  ;;  %v1279_v12 = vadd.f32 %v1278_v48, %v1277_v43  ;;  %v1292_v45 = vrot.slane %v1291_v21, 4 }
 0x1b7   : > { %v1286_v15 = vadd.f32 %v1285_v36, %v1284_v51  ;;  %v1299_v26 = vrot.slane %v1298_v19, 4  ;;  %v1020_v10 = vperm.slane %v5053_v5, %v4437_v38  ;;  %vm1575_vm1 = vweird.f32 %v5035_v47 }
 0x1b8   : > { %3868 = vrsqrt.f32 %v5046_v35  ;;  %v1280_v16 = vrot.slane %v1279_v12, 2  ;;  %v1293_v18 = vadd.f32 %v1292_v45, %v1291_v21  ;;  %vm1585_vm3 = vweird.f32 %v5042_v32 }
 0x1b9   : > { %3870 = vrsqrt.f32 %v5049_v14  ;;  %v3865_v11 = vpop.eup %3864  ;;  %v1287_v58 = vrot.slane %v1286_v15, 2  ;;  %v1300_v3 = vadd.f32 %v1299_v26, %v1298_v19  ;;  %vm1595_vm5 = vweird.f32 %v5046_v35 }
 0x1ba   : > { %v1570_v9 = vmul.f32 %v3865_v11, %v5035_v47  ;;  %v1281_v8 = vadd.f32 %v1280_v16, %v1279_v12  ;;  %vm1576_vm2 = vweird.f32 %v3865_v11  ;;  %v1294_v60 = vrot.slane %v1293_v18, 2 }
 0x1bb   : > { %v3867_v7 = vpop.eup %3866  ;;  %v1288_v52 = vadd.f32 %v1287_v58, %v1286_v15  ;;  %v1301_v31 = vrot.slane %v1300_v3, 2  ;;  %v1249_v36 = vsel %vm497_vm0, %v1020_v10, 0.0  ;;  %vm1577_vm7 = vmor %vm1575_vm1, %vm1576_vm2  ;;  %vm1605_vm11 = vweird.f32 %v5049_v14 }
 0x1bc   : > { %v1571_v2 = vmul.f32 %v3865_v11, %v1570_v9  ;;  %v1580_v57 = vmul.f32 %v3867_v7, %v5042_v32  ;;  %v1282_v38 = vrot.slane %v1281_v8, 1  ;;  %vm1586_vm4 = vweird.f32 %v3867_v7 }
 0x1bd   : > { %v1289_v13 = vrot.slane %v1288_v52, 1  ;;  %v1295_v43 = vadd.f32 %v1294_v60, %v1293_v18  ;;  %v1302_v18 = vadd.f32 %v1301_v31, %v1300_v3  ;;  %vm1587_vm8 = vmor %vm1585_vm3, %vm1586_vm4 }
 0x1be   : > { %v3869_v55 = vpop.eup %3868  ;;  %v1572_v22 = vmul.f32 0.5, %v1571_v2  ;;  %v1581_v48 = vmul.f32 %v3867_v7, %v1580_v57  ;;  %v1283_v21 = vadd.f32 %v1282_v38, %v1281_v8  ;;  %v5073_v2 = vld.sshfl [vmem:[#allocation1 + $0x20] sm:$0xff pattern:$0x73625140] }
 0x1bf   : > { %v3871_v59 = vpop.eup %3870  ;;  %v1590_v51 = vmul.f32 %v3869_v55, %v5046_v35  ;;  %vm1596_vm6 = vweird.f32 %v3869_v55  ;;  %v1290_v19 = vadd.f32 %v1289_v13, %v1288_v52  ;;  %v1296_v26 = vrot.slane %v1295_v43, 1  ;;  %v5082_v13 = vld.sshfl [vmem:[#allocation1 + $0x28] sm:$0xff pattern:$0x73625140] }
 0x1c0   : > { %v1600_v12 = vmul.f32 %v3871_v59, %v5049_v14  ;;  %v1573_v15 = vsub.f32 1.5, %v1572_v22  ;;  %v1582_v45 = vmul.f32 0.5, %v1581_v48  ;;  %v1333_v9 = vmul.f32 0.001953125, %v1283_v21  ;;  %vm1597_vm10 = vmor %vm1595_vm5, %vm1596_vm6 }
 0x1c1   : > { %v1591_v16 = vmul.f32 %v3869_v55, %v1590_v51  ;;  %v1334_v60 = vmul.f32 0.001953125, %v1290_v19  ;;  %v1297_v4 = vadd.f32 %v1296_v26, %v1295_v43  ;;  %v1303_v8 = vrot.slane %v1302_v18, 1  ;;  %v5088_v51 = vpop.permute.xlu2 %1853 }
 0x1c2   : > { %v1601_v58 = vmul.f32 %v3871_v59, %v1600_v12  ;;  %v1574_v57 = vmul.f32 %v3865_v11, %v1573_v15  ;;  %v1583_v54 = vsub.f32 1.5, %v1582_v45  ;;  %v5078_v52 = vadd.f32 1e-05, %v1333_v9 }
 0x1c3   : > { %v1592_v25 = vmul.f32 0.5, %v1591_v16  ;;  %v5080_v38 = vadd.f32 1e-05, %v1334_v60  ;;  %v1335_v48 = vmul.f32 0.001953125, %v1297_v4  ;;  %vm1606_vm9 = vweird.f32 %v3871_v59 }
 0x1c4   : > { %v1602_v10 = vmul.f32 0.5, %v1601_v58  ;;  %v1578_v3 = vsel %vm1577_vm7, %v3865_v11, %v1574_v57  ;;  %v1584_v31 = vmul.f32 %v3867_v7, %v1583_v54  ;;  %v1304_v47 = vadd.f32 %v1303_v8, %v1302_v18  ;;  %vm1607_vm12 = vmor %vm1605_vm11, %vm1606_vm9 }
 0x1c5   : > { %v1593_v22 = vsub.f32 1.5, %v1592_v25  ;;  %1756 = vst [vmem:[#allocation1 + $0x20] ss:$4 sm:$0xff] %v1578_v3  ;;  %3872 = vrsqrt.f32 %v5078_v52  ;;  %v5090_v19 = vadd.f32 1e-05, %v1335_v48  ;;  %v1250_v4 = vrot.slane %v1249_v36, 4 }
 0x1c6   : > { %v1603_v43 = vsub.f32 1.5, %v1602_v10  ;;  %v1588_v12 = vsel %vm1587_vm8, %v3867_v7, %v1584_v31  ;;  %3874 = vrsqrt.f32 %v5080_v38  ;;  %v1336_v11 = vmul.f32 0.001953125, %v1304_v47 }
 0x1c7   : > { %v1594_v21 = vmul.f32 %v3869_v55, %v1593_v22  ;;  %1757 = vst [vmem:[#allocation1 + $0x21] ss:$4 sm:$0xff] %v1588_v12  ;;  %3876 = vrsqrt.f32 %v5090_v19  ;;  %v6124_v7 = vperm.slane %v5053_v5, %v4439_v39  ;;  %v1796_v35 = vmul.f32 %v5005_v34, %v4496_v42 }
 0x1c8   : > { %v1604_v32 = vmul.f32 %v3871_v59, %v1603_v43  ;;  %v5105_v45 = vadd.f32 1e-05, %v1336_v11  ;;  %v1251_v14 = vadd.f32 %v1250_v4, %v1249_v36  ;;  %v6126_v39 = vperm.slane %v5053_v5, %v4443_v41 }
 0x1c9   : > { %v1598_v25 = vsel %vm1597_vm10, %v3869_v55, %v1594_v21  ;;  %v1256_v54 = vsel %vm497_vm0, %v6124_v7, 0.0  ;;  %v6125_v55 = vperm.slane %v5053_v5, %v4441_v40  ;;  %vm1655_vm13 = vweird.f32 %v5078_v52  ;;  %v1893_v43 = vpop.permute.xlu2 %1892 }
 0x1ca   : > { %v1608_v15 = vsel %vm1607_vm12, %v3871_v59, %v1604_v32  ;;  %1758 = vst [vmem:[#allocation1 + $0x22] ss:$4 sm:$0xff] %v1598_v25  ;;  %v1257_v16 = vrot.slane %v1256_v54, 4  ;;  %v1270_v58 = vsel %vm497_vm0, %v6126_v39, 0.0  ;;  %3878 = vrsqrt.f32 %v5105_v45 }
 0x1cb   : > { %1759 = vst [vmem:[#allocation1 + $0x23] ss:$4 sm:$0xff] %v1608_v15  ;;  %v1263_v26 = vsel %vm497_vm0, %v6125_v55, 0.0  ;;  %v5115_v18 = vpop.eup %3872  ;;  %v1252_v42 = vrot.slane %v1251_v14, 2  ;;  %v1797_v59 = vmul.f32 %v5007_v56, %v4499_v0  ;;  %v1271_v41 = vrot.slane %v1270_v58, 4 }
 0x1cc   : > { %v1258_v34 = vadd.f32 %v1257_v16, %v1256_v54  ;;  %v5120_v36 = vpop.eup %3874  ;;  %v1650_v40 = vmul.f32 %v5115_v18, %v5078_v52  ;;  %v1264_v9 = vrot.slane %v1263_v26, 4  ;;  %v1860_v5 = vmul.f32 %v4646_v20, %v1796_v35 }
 0x1cd   : > { %vm1656_vm0 = vweird.f32 %v5115_v18  ;;  %v1660_v60 = vmul.f32 %v5120_v36, %v5080_v38  ;;  %vm1665_vm14 = vweird.f32 %v5080_v38  ;;  %v1253_v57 = vadd.f32 %v1252_v42, %v1251_v14  ;;  %v5130_v56 = vpop.eup %3876 }
 0x1ce   : > { %v1259_v0 = vrot.slane %v1258_v34, 2  ;;  %v1651_v10 = vmul.f32 %v5115_v18, %v1650_v40  ;;  %vm1666_vm15 = vweird.f32 %v5120_v36  ;;  %v1265_v8 = vadd.f32 %v1264_v9, %v1263_v26  ;;  %vm1657_vm3 = vmor %vm1655_vm13, %vm1656_vm0 }
 0x1cf   : > { %v1272_v3 = vadd.f32 %v1271_v41, %v1270_v58  ;;  %v1661_v31 = vmul.f32 %v5120_v36, %v1660_v60  ;;  %v1670_v22 = vmul.f32 %v5130_v56, %v5090_v19  ;;  %vm1675_vm1 = vweird.f32 %v5090_v19  ;;  %vm1667_vm4 = vmor %vm1665_vm14, %vm1666_vm15 }
 0x1d0   : > { %v1254_v48 = vrot.slane %v1253_v57, 1  ;;  %v1861_v47 = vmul.f32 %v4646_v20, %v1797_v59  ;;  %v1652_v12 = vmul.f32 0.5, %v1651_v10  ;;  %v1260_v21 = vadd.f32 %v1259_v0, %v1258_v34  ;;  %v5139_v4 = vpop.eup %3878  ;;  %v1760_v0 = vld.sshfl [vmem:[#allocation1] sm:$0xff pattern:$0x73625140] }
 0x1d1   : > { %v1266_v32 = vrot.slane %v1265_v8, 2  ;;  %v1273_v11 = vrot.slane %v1272_v3, 2  ;;  %v1662_v25 = vmul.f32 0.5, %v1661_v31  ;;  %v1671_v7 = vmul.f32 %v5130_v56, %v1670_v22 }
 0x1d2   : > { %vm1676_vm2 = vweird.f32 %v5130_v56  ;;  %v1255_v54 = vadd.f32 %v1254_v48, %v1253_v57  ;;  %v1653_v35 = vsub.f32 1.5, %v1652_v12  ;;  %v1680_v15 = vmul.f32 %v5139_v4, %v5105_v45  ;;  %v1762_v58 = vld.sshfl [vmem:[#allocation1 + $0x20] sm:$0xff pattern:$0x73625140] }
 0x1d3   : > { %v1261_v14 = vrot.slane %v1260_v21, 1  ;;  %v1924_v16 = vadd.f32 %v1893_v43, %v1860_v5  ;;  %v1663_v55 = vsub.f32 1.5, %v1662_v25  ;;  %v1672_v20 = vmul.f32 0.5, %v1671_v7  ;;  %v1763_v9 = vld.sshfl [vmem:[#allocation1 + $0x28] sm:$0xff pattern:$0x73625140]  ;;  %vm1677_vm5 = vmor %vm1675_vm1, %vm1676_vm2 }
 0x1d4   : > { %v1267_v26 = vadd.f32 %v1266_v32, %v1265_v8  ;;  %v1274_v39 = vadd.f32 %v1273_v11, %v1272_v3  ;;  %v1654_v42 = vmul.f32 %v5115_v18, %v1653_v35  ;;  %v1681_v34 = vmul.f32 %v5139_v4, %v1680_v15 }
 0x1d5   : > { %v1262_v59 = vadd.f32 %v1261_v14, %v1260_v21  ;;  %v1329_v40 = vmul.f32 0.001953125, %v1255_v54  ;;  %v1664_v41 = vmul.f32 %v5120_v36, %v1663_v55  ;;  %v1673_v5 = vsub.f32 1.5, %v1672_v20  ;;  %v1761_v21 = vld.sshfl [vmem:[#allocation1 + $0x8] sm:$0xff pattern:$0x73625140]  ;;  %v1903_v14 = vpop.permute.xlu0 %1902  ;;  %v1883_v55 = vpop.permute.xlu1 %1882 }
 0x1d6   : > { %v1268_v60 = vrot.slane %v1267_v26, 1  ;;  %v1275_v57 = vrot.slane %v1274_v39, 1  ;;  %v1658_v10 = vsel %vm1657_vm3, %v5115_v18, %v1654_v42  ;;  %v1682_v8 = vmul.f32 0.5, %v1681_v34 }
 0x1d7   : > { %v1330_v3 = vmul.f32 0.001953125, %v1262_v59  ;;  %v5157_v31 = vadd.f32 1e-05, %v1329_v40  ;;  %v1668_v52 = vsel %vm1667_vm4, %v5120_v36, %v1664_v41  ;;  %v1674_v22 = vmul.f32 %v5130_v56, %v1673_v5  ;;  %1768 = vst [vmem:[#allocation1 + $0x20] ss:$4 sm:$0xff] %v1658_v10 }
 0x1d8   : > { %v1269_v48 = vadd.f32 %v1268_v60, %v1267_v26  ;;  %v1276_v12 = vadd.f32 %v1275_v57, %v1274_v39  ;;  %v1683_v18 = vsub.f32 1.5, %v1682_v8  ;;  %vm1686_vm6 = vweird.f32 %v5139_v4  ;;  %1769 = vst [vmem:[#allocation1 + $0x21] ss:$4 sm:$0xff] %v1668_v52 }
 0x1d9   : > { %v5166_v38 = vadd.f32 1e-05, %v1330_v3  ;;  %3880 = vrsqrt.f32 %v5157_v31  ;;  %v1678_v36 = vsel %vm1677_vm5, %v5130_v56, %v1674_v22  ;;  %v1925_v25 = vadd.f32 %v1893_v43, %v1861_v47 }
 0x1da   : > { %v1331_v32 = vmul.f32 0.001953125, %v1269_v48  ;;  %v1332_v11 = vmul.f32 0.001953125, %v1276_v12  ;;  %v1684_v7 = vmul.f32 %v5139_v4, %v1683_v18  ;;  %vm1685_vm7 = vweird.f32 %v5105_v45  ;;  %1770 = vst [vmem:[#allocation1 + $0x22] ss:$4 sm:$0xff] %v1678_v36 }
 0x1db   : > { %3882 = vrsqrt.f32 %v5166_v38  ;;  %v1800_v19 = vmul.f32 %v1760_v0, %v4544_v37  ;;  %vm1687_vm8 = vmor %vm1685_vm7, %vm1686_vm6  ;;  %v1938_v15 = vpack.c.bf16 %v1925_v25, %v1924_v16  ;;  %v1801_v56 = vmul.f32 %v1761_v21, %v4547_v6 }
 0x1dc   : > { %v5174_v54 = vadd.f32 1e-05, %v1331_v32  ;;  %v5176_v35 = vadd.f32 1e-05, %v1332_v11  ;;  %v1688_v43 = vsel %vm1687_vm8, %v5139_v4, %v1684_v7  ;;  %v1792_v45 = vmul.f32 %v4821_v53, %v4486_v29 }
 0x1dd   : > { %v1864_v47 = vmul.f32 %v4619_v46, %v1800_v19  ;;  %v1793_v37 = vmul.f32 %v4823_v28, %v4489_v30  ;;  %1771 = vst [vmem:[#allocation1 + $0x23] ss:$4 sm:$0xff] %v1688_v43  ;;  %v1865_v20 = vmul.f32 %v4619_v46, %v1801_v56  ;;  %v1802_v30 = vmul.f32 %v1762_v58, %v4569_v62  ;;  %v1898_v48 = vpop.permute.xlu1 %1897 }
 0x1de   : > { %3884 = vrsqrt.f32 %v5174_v54  ;;  %1946 = vst [vmem:[#allocation2 + $0x10] sm:$0xff] %v1938_v15  ;;  %v1856_v4 = vmul.f32 %v4603_v1, %v1792_v45  ;;  %vm1615_vm9 = vweird.f32 %v5157_v31  ;;  %v1803_v42 = vmul.f32 %v1763_v9, %v4572_v63  ;;  %v1908_v9 = vpop.permute.xlu2 %1907 }
 0x1df   : > { %v5187_v16 = vpop.eup %3880  ;;  %3886 = vrsqrt.f32 %v5176_v35  ;;  %v1928_v6 = vadd.f32 %v1903_v14, %v1864_v47  ;;  %v1857_v26 = vmul.f32 %v4603_v1, %v1793_v37  ;;  %v1929_v53 = vadd.f32 %v1903_v14, %v1865_v20 }
 0x1e0   : > { %v1610_v29 = vmul.f32 %v5187_v16, %v5157_v31  ;;  %v1920_v46 = vadd.f32 %v1883_v55, %v1856_v4  ;;  %v1798_v40 = vmul.f32 %v5073_v2, %v4524_v49  ;;  %vm1625_vm10 = vweird.f32 %v5166_v38 }
 0x1e1   : > { %v5195_v28 = vpop.eup %3882  ;;  %v1921_v39 = vadd.f32 %v1883_v55, %v1857_v26  ;;  %v1940_v1 = vpack.c.bf16 %v1929_v53, %v1928_v6  ;;  %v1866_v58 = vmul.f32 %v5020_v61, %v1802_v30  ;;  %v1867_v41 = vmul.f32 %v5020_v61, %v1803_v42  ;;  %v1918_v55 = vpop.permute.xlu0 %1917 }
 0x1e2   : > { %v1611_v34 = vmul.f32 %v5187_v16, %v1610_v29  ;;  %v1620_v59 = vmul.f32 %v5195_v28, %v5166_v38  ;;  %vm1616_vm11 = vweird.f32 %v5187_v16  ;;  %v1799_v57 = vmul.f32 %v5082_v13, %v4527_v50 }
 0x1e3   : > { %v1936_v62 = vpack.c.bf16 %v1921_v39, %v1920_v46  ;;  %1948 = vst [vmem:[#allocation2 + $0x20] sm:$0xff] %v1940_v1  ;;  %vm1626_vm12 = vweird.f32 %v5195_v28  ;;  %v1930_v8 = vadd.f32 %v1908_v9, %v1866_v58  ;;  %v1931_v61 = vadd.f32 %v1908_v9, %v1867_v41  ;;  %vm1617_vm13 = vmor %vm1615_vm9, %vm1616_vm11 }
 0x1e4   : > { %v3885_v5 = vpop.eup %3884  ;;  %v1612_v60 = vmul.f32 0.5, %v1611_v34  ;;  %v1621_v63 = vmul.f32 %v5195_v28, %v1620_v59  ;;  %v1774_v2 = vld.sshfl [vmem:[#allocation1 + $0x20] sm:$0xff pattern:$0x73625140]  ;;  %v1862_v12 = vmul.f32 %v4614_v44, %v1798_v40  ;;  %v1863_v25 = vmul.f32 %v4614_v44, %v1799_v57  ;;  %vm1627_vm0 = vmor %vm1625_vm10, %vm1626_vm12 }
 0x1e5   : > { %v3887_v0 = vpop.eup %3886  ;;  %v1630_v49 = vmul.f32 %v3885_v5, %v5174_v54  ;;  %v1775_v10 = vld.sshfl [vmem:[#allocation1 + $0x28] sm:$0xff pattern:$0x73625140]  ;;  %1944 = vst [vmem:[#allocation2] sm:$0xff] %v1936_v62  ;;  %v1806_v50 = vmul.f32 %v1774_v2, %v4589_v33  ;;  %v1941_v18 = vpack.c.bf16 %v1931_v61, %v1930_v8  ;;  %vm1636_vm14 = vweird.f32 %v3885_v5  ;;  %v1913_v46 = vpop.permute.xlu1 %1912 }
 0x1e6   : > { %v1613_v3 = vsub.f32 1.5, %v1612_v60  ;;  %v1622_v52 = vmul.f32 0.5, %v1621_v63  ;;  %v1640_v22 = vmul.f32 %v3887_v0, %v5176_v35  ;;  %v1807_v13 = vmul.f32 %v1775_v10, %v4592_v17 }
 0x1e7   : > { %v1631_v21 = vmul.f32 %v3885_v5, %v1630_v49  ;;  %v1870_v19 = vmul.f32 %v5088_v51, %v1806_v50  ;;  %1949 = vst [vmem:[#allocation2 + $0x28] sm:$0xff] %v1941_v18  ;;  %v1926_v33 = vadd.f32 %v1898_v48, %v1862_v12  ;;  %v1927_v43 = vadd.f32 %v1898_v48, %v1863_v25 }
 0x1e8   : > { %v1614_v36 = vmul.f32 %v5187_v16, %v1613_v3  ;;  %v1623_v32 = vsub.f32 1.5, %v1622_v52  ;;  %v1641_v11 = vmul.f32 %v3887_v0, %v1640_v22  ;;  %v1871_v15 = vmul.f32 %v5088_v51, %v1807_v13 }
 0x1e9   : > { %v1632_v7 = vmul.f32 0.5, %v1631_v21  ;;  %v1934_v31 = vadd.f32 %v1918_v55, %v1870_v19  ;;  %vm1646_vm15 = vweird.f32 %v3887_v0  ;;  %v1939_v37 = vpack.c.bf16 %v1927_v43, %v1926_v33 }
 0x1ea   : > { %v1618_v17 = vsel %vm1617_vm13, %v5187_v16, %v1614_v36  ;;  %v1624_v56 = vmul.f32 %v5195_v28, %v1623_v32  ;;  %v1642_v14 = vmul.f32 0.5, %v1641_v11  ;;  %v1935_v47 = vadd.f32 %v1918_v55, %v1871_v15 }
 0x1eb   : > { %v1633_v44 = vsub.f32 1.5, %v1632_v7  ;;  %1764 = vst [vmem:[#allocation1] ss:$4 sm:$0xff] %v1618_v17  ;;  %vm1635_vm1 = vweird.f32 %v5174_v54  ;;  %vm1645_vm3 = vweird.f32 %v5176_v35 }
 0x1ec   : > { %v1628_v51 = vsel %vm1627_vm0, %v5195_v28, %v1624_v56  ;;  %v1643_v45 = vsub.f32 1.5, %v1642_v14  ;;  %v1943_v16 = vpack.c.bf16 %v1935_v47, %v1934_v31  ;;  %vm1637_vm2 = vmor %vm1635_vm1, %vm1636_vm14  ;;  %1947 = vst [vmem:[#allocation2 + $0x18] sm:$0xff] %v1939_v37 }
 0x1ed   : > { %v1634_v20 = vmul.f32 %v3885_v5, %v1633_v44  ;;  %1765 = vst [vmem:[#allocation1 + $0x1] ss:$4 sm:$0xff] %v1628_v51  ;;  %vm1647_vm4 = vmor %vm1645_vm3, %vm1646_vm15 }
 0x1ee   : > { %v1644_v6 = vmul.f32 %v3887_v0, %v1643_v45  ;;  %1951 = vst [vmem:[#allocation2 + $0x38] sm:$0xff] %v1943_v16 }
 0x1ef   : > { %v1638_v38 = vsel %vm1637_vm2, %v3885_v5, %v1634_v20 }
 0x1f0   : > { %v1648_v4 = vsel %vm1647_vm4, %v3887_v0, %v1644_v6  ;;  %1766 = vst [vmem:[#allocation1 + $0x2] ss:$4 sm:$0xff] %v1638_v38 }
 0x1f1   : > { %1767 = vst [vmem:[#allocation1 + $0x3] ss:$4 sm:$0xff] %v1648_v4 }
 0x1f8   : > { %v1772_v26 = vld.sshfl [vmem:[#allocation1] sm:$0xff pattern:$0x73625140]  ;;  %v1773_v29 = vld.sshfl [vmem:[#allocation1 + $0x8] sm:$0xff pattern:$0x73625140] }
 0x1f9   : > { %v1804_v53 = vmul.f32 %v1772_v26, %v4579_v23  ;;  %v1805_v30 = vmul.f32 %v1773_v29, %v4582_v24 }
 0x1fb   : > { %v1868_v54 = vmul.f32 %v4906_v27, %v1804_v53  ;;  %v1869_v28 = vmul.f32 %v4906_v27, %v1805_v30 }
 0x1fd   : > { %v1932_v39 = vadd.f32 %v1913_v46, %v1868_v54  ;;  %v1933_v35 = vadd.f32 %v1913_v46, %v1869_v28 }
 0x1ff   : > { %v1942_v42 = vpack.c.bf16 %v1933_v35, %v1932_v39 }
 0x201   : > { %1950 = vst [vmem:[#allocation2 + $0x30] sm:$0xff] %v1942_v42 }
 0x202 PF: > { %v3690_v59 = vld [vmem:[#allocation2 + $0x34] sm:$0xf0]  ;;  %v3521_v62 = vld [vmem:[#allocation2 + $0x38] sm:$0xf0]  ;;  %v3511_v58 = vld [vmem:[#allocation2 + $0x20] sm:$0xf] }
 0x203   : > { %v3688_v23 = vld [vmem:[#allocation2 + $0x24] sm:$0xf0]  ;;  %v3687_v24 = vld [vmem:[#allocation2 + $0x24] sm:$0xf]  ;;  %v3513_v5 = vld [vmem:[#allocation2 + $0x28] sm:$0xf0] }
 0x204   : > { %v3512_v60 = vor.u32 %v3688_v23, %v3511_v58  ;;  %v3516_v27 = vor.u32 %v3687_v24, %v3513_v5  ;;  %v3503_v63 = vld [vmem:[#allocation2 + $0x10] sm:$0xf]  ;;  %v3686_v9 = vld [vmem:[#allocation2 + $0x14] sm:$0xf0]  ;;  %v3685_v57 = vld [vmem:[#allocation2 + $0x14] sm:$0xf] }
 0x205   : > { %v3505_v0 = vld [vmem:[#allocation2 + $0x18] sm:$0xf0]  ;;  %v3504_v49 = vor.u32 %v3686_v9, %v3503_v63  ;;  %s3691_s30 = smul.u32 48, %s4195_s24  ;;  %v3495_v10 = vld [vmem:[#allocation2] sm:$0xf]  ;;  %vm2045_vm5 = vcmask 523264  }
 0x206   : > { %v3508_v2 = vor.u32 %v3685_v57, %v3505_v0  ;;  %v3684_v8 = vld [vmem:[#allocation2 + $0x4] sm:$0xf0]  ;;  %v3683_v61 = vld [vmem:[#allocation2 + $0x4] sm:$0xf]  ;;  %v3497_v3 = vld [vmem:[#allocation2 + $0x8] sm:$0xf0] }
 0x207   : > { %v3496_v52 = vor.u32 %v3684_v8, %v3495_v10  ;;  %s5242_s18 = scalar_lea.vmem %s6065_s1, %s3691_s30  ;;  %v3500_v22 = vor.u32 %v3683_v61, %v3497_v3  ;;  %vm2244_vm6 = vcmask 261120   ;;  %s3537_s26 = sshll.u32 %s4195_s24, 5 }
 0x208   : > { %v3519_v34 = vld [vmem:[#allocation2 + $0x30] sm:$0xf]  ;;  %v3689_v1 = vld [vmem:[#allocation2 + $0x34] sm:$0xf]  ;;  %v3692_v48 = vld [vmem:[%s5242_s18] sm:$0xff]  ;;  %s3087_s7 = scalar_lea.vmem [#allocation3], %s3537_s26 }
 0x209   : > { %v3520_v40 = vor.u32 %v3690_v59, %v3519_v34  ;;  %v3524_v41 = vor.u32 %v3689_v1, %v3521_v62  ;;  %v3693_v12 = vld [vmem:[%s5242_s18 + $0x8] sm:$0xff]  ;;  %v3694_v21 = vld [vmem:[%s5242_s18 + $0x10] sm:$0xff]  ;;  %v3695_v50 = vld [vmem:[%s5242_s18 + $0x18] sm:$0xff]  ;;  %p3620_p5 = scmp.ne.s32.totalorder %s4195_s24, 1 }
 0x20b   : > { %2068 = vmatpush.bf16.msra.mxu0 %v3520_v40  ;;  %2107 = vmatpush.bf16.msra.mxu1 %v3524_v41 }
 0x20f   : > { %2069 = vmatpush.bf16.msra.mxu0 %v3512_v60  ;;  %2108 = vmatpush.bf16.msra.mxu1 %v3516_v27 }
 0x213   : > { %2070 = vmatpush.bf16.msra.mxu0 %v3504_v49  ;;  %2109 = vmatpush.bf16.msra.mxu1 %v3508_v2 }
 0x217   : > { %2071 = vmatpush.bf16.msra.mxu0 %v3496_v52  ;;  %2110 = vmatpush.bf16.msra.mxu1 %v3500_v22 }
 0x21a   : > { %3525 = vmatmul.msk.bf16.vlgmr.msra.gmra.mxu0 %vm2045_vm5, %v3692_v48  ;;  %3531 = vmatmul.msk.bf16.vlgmr.msra.gmra.mxu1 %vm2045_vm5, %v3692_v48 }
 0x22a   : > { %3526 = vmatmul.msk.bf16.gmra.mxu0 %vm2045_vm5, %v3693_v12  ;;  %3532 = vmatmul.msk.bf16.gmra.mxu1 %vm2045_vm5, %v3693_v12 }
 0x23a   : > { %3527 = vmatmul.msk.bf16.gmra.mxu0 %vm2045_vm5, %v3694_v21  ;;  %3533 = vmatmul.msk.bf16.gmra.mxu1 %vm2045_vm5, %v3694_v21 }
 0x24a   : > { %3528 = vmatmul.msk.bf16.gmra.mxu0 %vm2045_vm5, %v3695_v50  ;;  %3534 = vmatmul.msk.bf16.gmra.mxu1 %vm2045_vm5, %v3695_v50 }
 0x297   : > { %v2073_v13 = vpop.f32.mrf.mxu0  ;;  %v2112_v18 = vpop.f32.mrf.mxu1 }
 0x298   : > { %v2142_v36 = vpack.c.bf16 %v2112_v18, %v2073_v13 }
 0x29a   : > { %2154 = vst [vmem:[#allocation4] sm:$0xff] %v2142_v36 }
 0x29f   : > { %v2075_v32 = vpop.f32.mrf.mxu0  ;;  %v2114_v11 = vpop.f32.mrf.mxu1 }
 0x2a0   : > { %v2143_v25 = vpack.c.bf16 %v2114_v11, %v2075_v32 }
 0x2a1   : > { %v3706_v33 = vld [vmem:[#allocation4 + $0x4] sm:$0xf]  ;;  %v3540_v17 = vld [vmem:[#allocation4] sm:$0xf] }
 0x2a2   : > { %2155 = vst [vmem:[#allocation4 + $0x8] sm:$0xff] %v2143_v25 }
 0x2a7   : > { %v2078_v7 = vpop.f32.mrf.mxu0  ;;  %v2117_v19 = vpop.f32.mrf.mxu1 }
 0x2a8   : > { %v2144_v15 = vpack.c.bf16 %v2117_v19, %v2078_v7 }
 0x2a9   : > { %v3542_v56 = vld [vmem:[#allocation4 + $0x8] sm:$0xf0]  ;;  %v3707_v14 = vld [vmem:[#allocation4 + $0x4] sm:$0xf0] }
 0x2aa   : > { %2156 = vst [vmem:[#allocation4 + $0x10] sm:$0xff] %v2144_v15  ;;  %v3541_v55 = vor.u32 %v3707_v14, %v3540_v17  ;;  %v3545_v43 = vor.u32 %v3706_v33, %v3542_v56 }
 0x2ac   : > { %2200 = vxpose.binary.xlu0.c.b16.start [1/4] (short) %v3545_v43, %v3541_v55, 128 }
 0x2af   : > { %v2080_v44 = vpop.f32.mrf.mxu0  ;;  %v2119_v31 = vpop.f32.mrf.mxu1 }
 0x2b0   : > { %v2145_v47 = vpack.c.bf16 %v2119_v31, %v2080_v44 }
 0x2b1   : > { %v3708_v37 = vld [vmem:[#allocation4 + $0x14] sm:$0xf]  ;;  %v3548_v16 = vld [vmem:[#allocation4 + $0x10] sm:$0xf] }
 0x2b2   : > { %2157 = vst [vmem:[#allocation4 + $0x18] sm:$0xff] %v2145_v47 }
 0x2b7   : > { %v2083_v51 = vpop.f32.mrf.mxu0  ;;  %v2122_v45 = vpop.f32.mrf.mxu1 }
 0x2b8   : > { %v2146_v20 = vpack.c.bf16 %v2122_v45, %v2083_v51 }
 0x2b9   : > { %v3550_v6 = vld [vmem:[#allocation4 + $0x18] sm:$0xf0]  ;;  %v3709_v38 = vld [vmem:[#allocation4 + $0x14] sm:$0xf0] }
 0x2ba   : > { %v3549_v4 = vor.u32 %v3709_v38, %v3548_v16  ;;  %v3553_v26 = vor.u32 %v3708_v37, %v3550_v6  ;;  %2158 = vst [vmem:[#allocation4 + $0x20] sm:$0xff] %v2146_v20 }
 0x2bc   : > { %2201 = vxpose.binary.xlu0.c.b16.end [2/4] (short) %v3553_v26, %v3549_v4, 128 }
 0x2bf   : > { %v2085_v29 = vpop.f32.mrf.mxu0  ;;  %v2124_v53 = vpop.f32.mrf.mxu1 }
 0x2c0   : > { %v2147_v30 = vpack.c.bf16 %v2124_v53, %v2085_v29 }
 0x2c1   : > { %v3556_v1 = vld [vmem:[#allocation4 + $0x20] sm:$0xf]  ;;  %v3698_v62 = vld [vmem:[#allocation4 + $0x24] sm:$0xf] }
 0x2c2   : > { %2159 = vst [vmem:[#allocation4 + $0x28] sm:$0xff] %v2147_v30 }
 0x2c7   : > { %v2088_v54 = vpop.f32.mrf.mxu0  ;;  %v2127_v28 = vpop.f32.mrf.mxu1 }
 0x2c8   : > { %v2148_v46 = vpack.c.bf16 %v2127_v28, %v2088_v54 }
 0x2c9   : > { %v3699_v40 = vld [vmem:[#allocation4 + $0x24] sm:$0xf0]  ;;  %v3558_v41 = vld [vmem:[#allocation4 + $0x28] sm:$0xf0] }
 0x2ca   : > { %2160 = vst [vmem:[#allocation4 + $0x30] sm:$0xff] %v2148_v46  ;;  %v3557_v60 = vor.u32 %v3699_v40, %v3556_v1  ;;  %v3561_v27 = vor.u32 %v3698_v62, %v3558_v41 }
 0x2cf   : > { %v2090_v39 = vpop.f32.mrf.mxu0  ;;  %v2129_v35 = vpop.f32.mrf.mxu1 }
 0x2d0   : > { %v2149_v42 = vpack.c.bf16 %v2129_v35, %v2090_v39 }
 0x2d1   : > { %v3564_v34 = vld [vmem:[#allocation4 + $0x30] sm:$0xf]  ;;  %v3700_v59 = vld [vmem:[#allocation4 + $0x34] sm:$0xf] }
 0x2d2   : > { %2161 = vst [vmem:[#allocation4 + $0x38] sm:$0xff] %v2149_v42 }
 0x2d9   : > { %v3701_v58 = vld [vmem:[#allocation4 + $0x34] sm:$0xf0]  ;;  %v3566_v23 = vld [vmem:[#allocation4 + $0x38] sm:$0xf0] }
 0x2da   : > { %v3565_v24 = vor.u32 %v3701_v58, %v3564_v34  ;;  %v3569_v5 = vor.u32 %v3700_v59, %v3566_v23 }
 0x2dc   : > { %2299 = vmatpush.bf16.msra.mxu2 %v3565_v24  ;;  %2388 = vmatpush.bf16.msra.mxu3 %v3569_v5 }
 0x2e0   : > { %2300 = vmatpush.bf16.msra.mxu2 %v3557_v60  ;;  %2389 = vmatpush.bf16.msra.mxu3 %v3561_v27 }
 0x358   : > { %v2208_v63 = vpop.trf.xlu0 }
 0x359   : > { %3570 = vmatmul.msk.bf16.vlgmr.msra.gmra.mxu2 %vm2244_vm6, %v2208_v63  ;;  %3586 = vmatmul.msk.bf16.vlgmr.msra.gmra.mxu3 %vm2244_vm6, %v2208_v63 }
 0x360   : > { %v2209_v9 = vpop.trf.xlu0 }
 0x368   : > { %v2210_v57 = vpop.trf.xlu0 }
 0x369   : > { %3571 = vmatmul.msk.bf16.gmra.mxu2 %vm2244_vm6, %v2210_v57  ;;  %3587 = vmatmul.msk.bf16.gmra.mxu3 %vm2244_vm6, %v2210_v57 }
 0x370   : > { %v2211_v0 = vpop.trf.xlu0 }
 0x378   : > { %v2212_v49 = vpop.trf.xlu0 }
 0x379   : > { %3572 = vmatmul.msk.bf16.gmra.mxu2 %vm2244_vm6, %v2212_v49  ;;  %3588 = vmatmul.msk.bf16.gmra.mxu3 %vm2244_vm6, %v2212_v49 }
 0x380   : > { %v2213_v2 = vpop.trf.xlu0 }
 0x388   : > { %v2214_v10 = vpop.trf.xlu0 }
 0x389   : > { %3573 = vmatmul.msk.bf16.gmra.mxu2 %vm2244_vm6, %v2214_v10  ;;  %3589 = vmatmul.msk.bf16.gmra.mxu3 %vm2244_vm6, %v2214_v10 }
 0x390   : > { %v2215_v8 = vpop.trf.xlu0 }
 0x398   : > { %v2216_v61 = vpop.trf.xlu0 }
 0x399   : > { %3574 = vmatmul.msk.bf16.gmra.mxu2 %vm2244_vm6, %v2216_v61  ;;  %3590 = vmatmul.msk.bf16.gmra.mxu3 %vm2244_vm6, %v2216_v61 }
 0x3a0   : > { %v2217_v3 = vpop.trf.xlu0 }
 0x3a8   : > { %v2218_v52 = vpop.trf.xlu0 }
 0x3a9   : > { %3575 = vmatmul.msk.bf16.gmra.mxu2 %vm2244_vm6, %v2218_v52  ;;  %3591 = vmatmul.msk.bf16.gmra.mxu3 %vm2244_vm6, %v2218_v52 }
 0x3b0   : > { %v2219_v22 = vpop.trf.xlu0 }
 0x3b8   : > { %v2220_v48 = vpop.trf.xlu0 }
 0x3b9   : > { %3576 = vmatmul.msk.bf16.gmra.mxu2 %vm2244_vm6, %v2220_v48  ;;  %3592 = vmatmul.msk.bf16.gmra.mxu3 %vm2244_vm6, %v2220_v48 }
 0x3c0   : > { %v5270_v12 = vpop.trf.xlu0 }
 0x3c8   : > { %v2222_v21 = vpop.trf.xlu0 }
 0x3c9   : > { %3577 = vmatmul.msk.bf16.gmra.mxu2 %vm2244_vm6, %v2222_v21  ;;  %3593 = vmatmul.msk.bf16.gmra.mxu3 %vm2244_vm6, %v2222_v21 }
 0x3d0   : > { %v2223_v58 = vpop.trf.xlu0 }
 0x3d9   : > { %3578 = vmatmul.msk.bf16.gmra.mxu2 %vm2244_vm6, %v2209_v9  ;;  %3594 = vmatmul.msk.bf16.gmra.mxu3 %vm2244_vm6, %v2209_v9 }
 0x3dc   : > { %v5276_v50 = vpop.f32.mrf.mxu2  ;;  %v5278_v13 = vpop.f32.mrf.mxu3 }
 0x3dd   : > { %v2471_v4 = vmax.f32 %v5276_v50, %v5278_v13 }
 0x3e4   : > { %v5280_v18 = vpop.f32.mrf.mxu2  ;;  %v5282_v36 = vpop.f32.mrf.mxu3 }
 0x3e5   : > { %v2474_v30 = vmax.f32 %v5280_v18, %v5282_v36 }
 0x3e9   : > { %3579 = vmatmul.msk.bf16.gmra.mxu2 %vm2244_vm6, %v2211_v0  ;;  %3595 = vmatmul.msk.bf16.gmra.mxu3 %vm2244_vm6, %v2211_v0 }
 0x3ec   : > { %v5286_v32 = vpop.f32.mrf.mxu2  ;;  %v5288_v11 = vpop.f32.mrf.mxu3 }
 0x3ed   : > { %v2477_v37 = vmax.f32 %v5286_v32, %v5288_v11 }
 0x3f4   : > { %v5290_v25 = vpop.f32.mrf.mxu2  ;;  %v5292_v7 = vpop.f32.mrf.mxu3 }
 0x3f5   : > { %v2480_v26 = vmax.f32 %v5290_v25, %v5292_v7 }
 0x3f9   : > { %3580 = vmatmul.msk.bf16.gmra.mxu2 %vm2244_vm6, %v2213_v2  ;;  %3596 = vmatmul.msk.bf16.gmra.mxu3 %vm2244_vm6, %v2213_v2 }
 0x3fc   : > { %v5296_v19 = vpop.f32.mrf.mxu2  ;;  %v5298_v15 = vpop.f32.mrf.mxu3 }
 0x3fd   : > { %v2483_v31 = vmax.f32 %v5296_v19, %v5298_v15 }
 0x404   : > { %v5300_v33 = vpop.f32.mrf.mxu2  ;;  %v5302_v17 = vpop.f32.mrf.mxu3 }
 0x405   : > { %v2486_v20 = vmax.f32 %v5300_v33, %v5302_v17 }
 0x409   : > { %3581 = vmatmul.msk.bf16.gmra.mxu2 %vm2244_vm6, %v2215_v8  ;;  %3597 = vmatmul.msk.bf16.gmra.mxu3 %vm2244_vm6, %v2215_v8 }
 0x40c   : > { %v5306_v56 = vpop.f32.mrf.mxu2  ;;  %v5308_v14 = vpop.f32.mrf.mxu3 }
 0x40d   : > { %v2489_v55 = vmax.f32 %v5306_v56, %v5308_v14 }
 0x40f   : > { %2490 = vmax.xlane.f32.xlu2 %v2489_v55 }
 0x414   : > { %v5312_v43 = vpop.f32.mrf.mxu2  ;;  %v5314_v44 = vpop.f32.mrf.mxu3 }
 0x415   : > { %v2492_v47 = vmax.f32 %v5312_v43, %v5314_v44 }
 0x417   : > { %2484 = vmax.xlane.f32.xlu2 %v2483_v31  ;;  %2493 = vmax.xlane.f32.xlu1 %v2492_v47 }
 0x419   : > { %3582 = vmatmul.msk.bf16.gmra.mxu2 %vm2244_vm6, %v2217_v3  ;;  %3598 = vmatmul.msk.bf16.gmra.mxu3 %vm2244_vm6, %v2217_v3 }
 0x41c   : > { %v5322_v51 = vpop.f32.mrf.mxu2  ;;  %v5324_v45 = vpop.f32.mrf.mxu3 }
 0x41d   : > { %v2495_v16 = vmax.f32 %v5322_v51, %v5324_v45 }
 0x41f   : > { %2478 = vmax.xlane.f32.xlu2 %v2477_v37  ;;  %2487 = vmax.xlane.f32.xlu1 %v2486_v20 }
 0x420   : > { %2496 = vmax.xlane.f32.xlu0 %v2495_v16 }
 0x424   : > { %v5332_v6 = vpop.f32.mrf.mxu2  ;;  %v5334_v38 = vpop.f32.mrf.mxu3 }
 0x425   : > { %v2498_v46 = vmax.f32 %v5332_v6, %v5334_v38 }
 0x427   : > { %2472 = vmax.xlane.f32.xlu2 %v2471_v4  ;;  %2481 = vmax.xlane.f32.xlu1 %v2480_v26 }
 0x429   : > { %3583 = vmatmul.msk.bf16.gmra.mxu2 %vm2244_vm6, %v2219_v22  ;;  %3599 = vmatmul.msk.bf16.gmra.mxu3 %vm2244_vm6, %v2219_v22 }
 0x42c   : > { %v5342_v29 = vpop.f32.mrf.mxu2  ;;  %v5344_v53 = vpop.f32.mrf.mxu3 }
 0x42d   : > { %v2501_v34 = vmax.f32 %v5342_v29, %v5344_v53 }
 0x42f   : > { %2475 = vmax.xlane.f32.xlu1 %v2474_v30 }
 0x434   : > { %v5348_v54 = vpop.f32.mrf.mxu2  ;;  %v5350_v28 = vpop.f32.mrf.mxu3 }
 0x435   : > { %v2504_v39 = vmax.f32 %v5348_v54, %v5350_v28 }
 0x437   : > { %2499 = vmax.xlane.f32.xlu1 %v2498_v46  ;;  %2505 = vmax.xlane.f32.xlu2 %v2504_v39 }
 0x439   : > { %3584 = vmatmul.msk.bf16.gmra.mxu2 %vm2244_vm6, %v5270_v12  ;;  %3600 = vmatmul.msk.bf16.gmra.mxu3 %vm2244_vm6, %v5270_v12 }
 0x43c   : > { %v5360_v35 = vpop.f32.mrf.mxu2  ;;  %v5362_v42 = vpop.f32.mrf.mxu3 }
 0x43d   : > { %v2507_v59 = vmax.f32 %v5360_v35, %v5362_v42 }
 0x43f   : > { %2502 = vmax.xlane.f32.xlu1 %v2501_v34  ;;  %2508 = vmax.xlane.f32.xlu2 %v2507_v59 }
 0x444   : > { %v5368_v1 = vpop.f32.mrf.mxu2  ;;  %v5370_v40 = vpop.f32.mrf.mxu3 }
 0x445   : > { %v2510_v62 = vmax.f32 %v5368_v1, %v5370_v40 }
 0x447   : > { %2511 = vmax.xlane.f32.xlu2 %v2510_v62 }
 0x449   : > { %3585 = vmatmul.msk.bf16.gmra.mxu2 %vm2244_vm6, %v2223_v58  ;;  %3601 = vmatmul.msk.bf16.gmra.mxu3 %vm2244_vm6, %v2223_v58 }
 0x44c   : > { %v5376_v23 = vpop.f32.mrf.mxu2  ;;  %v5378_v41 = vpop.f32.mrf.mxu3 }
 0x44d   : > { %v2513_v24 = vmax.f32 %v5376_v23, %v5378_v41 }
 0x44f   : > { %2514 = vmax.xlane.f32.xlu1 %v2513_v24 }
 0x454   : > { %v5382_v5 = vpop.f32.mrf.mxu2  ;;  %v5384_v60 = vpop.f32.mrf.mxu3 }
 0x455   : > { %v2516_v27 = vmax.f32 %v5382_v5, %v5384_v60 }
 0x457   : > { %2517 = vmax.xlane.f32.xlu1 %v2516_v27 }
 0x45c   : > { %v5388_v63 = vpop.f32.mrf.mxu2  ;;  %v5390_v9 = vpop.f32.mrf.mxu3 }
 0x464   : > { %v5392_v57 = vpop.f32.mrf.mxu2  ;;  %v5394_v0 = vpop.f32.mrf.mxu3 }
 0x46c   : > { %v5396_v49 = vpop.f32.mrf.mxu2  ;;  %v5398_v2 = vpop.f32.mrf.mxu3 }
 0x46d   : > { %6127 = vst [vmem:[#allocation15_spill] sm:$0xff] %v5396_v49  ;;  %v2525_v10 = vmax.f32 %v5396_v49, %v5398_v2 }
 0x46e   : > { %6128 = vst [vmem:[#allocation16_spill] sm:$0xff] %v5398_v2 }
 0x46f   : > { %2526 = vmax.xlane.f32.xlu2 %v2525_v10 }
 0x474   : > { %v5402_v8 = vpop.f32.mrf.mxu2  ;;  %v5404_v61 = vpop.f32.mrf.mxu3 }
 0x475   : > { %v2528_v3 = vmax.f32 %v5402_v8, %v5404_v61 }
 0x477   : > { %2529 = vmax.xlane.f32.xlu1 %v2528_v3 }
 0x47c   : > { %v5408_v52 = vpop.f32.mrf.mxu2  ;;  %v5410_v22 = vpop.f32.mrf.mxu3 }
 0x47d   : > { %6129 = vst [vmem:[#allocation17_spill] sm:$0xff] %v5408_v52  ;;  %v2531_v48 = vmax.f32 %v5408_v52, %v5410_v22 }
 0x47e   : > { %6130 = vst [vmem:[#allocation18_spill] sm:$0xff] %v5410_v22 }
 0x47f   : > { %2532 = vmax.xlane.f32.xlu2 %v2531_v48 }
 0x482   : > { %v5420_v31 = vpop.xlane.xlu2 %2490 }
 0x484   : > { %v5414_v12 = vpop.f32.mrf.mxu2  ;;  %v5416_v21 = vpop.f32.mrf.mxu3 }
 0x485   : > { %6131 = vst [vmem:[#allocation19_spill] sm:$0xff] %v5414_v12  ;;  %v2534_v55 = vmax.f32 %v5414_v12, %v5416_v21 }
 0x486   : > { %6132 = vst [vmem:[#allocation20_spill] sm:$0xff] %v5416_v21 }
 0x487   : > { %2535 = vmax.xlane.f32.xlu1 %v2534_v55 }
 0x48a   : > { %v5422_v47 = vpop.xlane.xlu1 %2493  ;;  %v5430_v4 = vpop.xlane.xlu2 %2484 }
 0x48c   : > { %v5424_v37 = vpop.f32.mrf.mxu2  ;;  %v5426_v20 = vpop.f32.mrf.mxu3 }
 0x48d   : > { %6133 = vst [vmem:[#allocation21_spill] sm:$0xff] %v5424_v37  ;;  %v2537_v16 = vmax.f32 %v5424_v37, %v5426_v20 }
 0x48e   : > { %6134 = vst [vmem:[#allocation22_spill] sm:$0xff] %v5426_v20 }
 0x48f   : > { %2538 = vmax.xlane.f32.xlu2 %v2537_v16 }
 0x492   : > { %v5432_v26 = vpop.xlane.xlu1 %2487  ;;  %v5444_v10 = vpop.xlane.xlu2 %2478 }
 0x493   : > { %v2497_v30 = vpop.xlane.xlu0 %2496 }
 0x494   : > { %v2583_v46 = vsub.f32 %v5322_v51, %v2497_v30  ;;  %v2584_v39 = vsub.f32 %v5324_v45, %v2497_v30  ;;  %v5436_v34 = vpop.f32.mrf.mxu2  ;;  %v5438_v59 = vpop.f32.mrf.mxu3 }
 0x495   : > { %6135 = vst [vmem:[#allocation23_spill] sm:$0xff] %v5436_v34  ;;  %v2540_v62 = vmax.f32 %v5436_v34, %v5438_v59 }
 0x496   : > { %6136 = vst [vmem:[#allocation24_spill] sm:$0xff] %v5438_v59  ;;  %v2663_v58 = vmul.f32 1.442695, %v2583_v46  ;;  %v2665_v24 = vmul.f32 1.442695, %v2584_v39 }
 0x497   : > { %2541 = vmax.xlane.f32.xlu1 %v2540_v62 }
 0x498   : > { %3888 = vpow2.f32 %v2663_v58 }
 0x499   : > { %3890 = vpow2.f32 %v2665_v24 }
 0x49a   : > { %v5442_v27 = vpop.xlane.xlu1 %2481  ;;  %v5466_v58 = vpop.xlane.xlu2 %2472 }
 0x49c   : > { %v5446_v3 = vpop.f32.mrf.mxu2  ;;  %v5448_v51 = vpop.f32.mrf.mxu3 }
 0x49d   : > { %6137 = vst [vmem:[#allocation25_spill] sm:$0xff] %v5446_v3  ;;  %v2543_v45 = vmax.f32 %v5446_v3, %v5448_v51 }
 0x49e   : > { %6138 = vst [vmem:[#allocation26_spill] sm:$0xff] %v5448_v51  ;;  %v5452_v48 = vpop.eup %3888 }
 0x49f   : > { %2544 = vmax.xlane.f32.xlu2 %v2543_v45  ;;  %v5454_v55 = vpop.eup %3890 }
 0x4a0   : > { %v2783_v39 = vadd.f32 %v5454_v55, %v5452_v48 }
 0x4a2   : > { %v5456_v16 = vpop.xlane.xlu1 %2475 }
 0x4a4   : > { %v5458_v30 = vpop.f32.mrf.mxu2  ;;  %v5460_v46 = vpop.f32.mrf.mxu3 }
 0x4a5   : > { %6139 = vst [vmem:[#allocation27_spill] sm:$0xff] %v5458_v30  ;;  %v2546_v62 = vmax.f32 %v5458_v30, %v5460_v46 }
 0x4a6   : > { %6140 = vst [vmem:[#allocation28_spill] sm:$0xff] %v5460_v46 }
 0x4a7   : > { %2784 = vadd.xlane.f32.xlu2 %v2783_v39  ;;  %2547 = vmax.xlane.f32.xlu1 %v2546_v62 }
 0x4aa   : > { %v2500_v24 = vpop.xlane.xlu1 %2499  ;;  %v2506_v22 = vpop.xlane.xlu2 %2505 }
 0x4ab   : > { %v2585_v45 = vsub.f32 %v5332_v6, %v2500_v24  ;;  %v2586_v21 = vsub.f32 %v5334_v38, %v2500_v24 }
 0x4ac   : > { %v5470_v12 = vpop.f32.mrf.mxu2  ;;  %v5472_v2 = vpop.f32.mrf.mxu3 }
 0x4ad   : > { %v2667_v49 = vmul.f32 1.442695, %v2585_v45  ;;  %v2669_v59 = vmul.f32 1.442695, %v2586_v21  ;;  %v2549_v34 = vmax.f32 %v5470_v12, %v5472_v2  ;;  %v2589_v21 = vsub.f32 %v5348_v54, %v2506_v22 }
 0x4af   : > { %3892 = vpow2.f32 %v2667_v49  ;;  %2550 = vmax.xlane.f32.xlu2 %v2549_v34  ;;  %v2590_v49 = vsub.f32 %v5350_v28, %v2506_v22  ;;  %v2675_v34 = vmul.f32 1.442695, %v2589_v21 }
 0x4b0   : > { %3894 = vpow2.f32 %v2669_v59 }
 0x4b1   : > { %v2677_v59 = vmul.f32 1.442695, %v2590_v49 }
 0x4b2   : > { %v2503_v39 = vpop.xlane.xlu1 %2502 }
 0x4b3   : > { %v2587_v62 = vsub.f32 %v5342_v29, %v2503_v39  ;;  %v2588_v6 = vsub.f32 %v5344_v53, %v2503_v39  ;;  %v2509_v53 = vpop.xlane.xlu2 %2508 }
 0x4b4   : > { %v5478_v52 = vpop.f32.mrf.mxu2  ;;  %v5480_v38 = vpop.f32.mrf.mxu3  ;;  %v2591_v54 = vsub.f32 %v5360_v35, %v2509_v53 }
 0x4b5   : > { %v5482_v24 = vpop.eup %3892  ;;  %v2671_v45 = vmul.f32 1.442695, %v2587_v62  ;;  %v2673_v46 = vmul.f32 1.442695, %v2588_v6  ;;  %v2592_v6 = vsub.f32 %v5362_v42, %v2509_v53  ;;  %v2552_v21 = vmax.f32 %v5478_v52, %v5480_v38 }
 0x4b6   : > { %v5485_v30 = vpop.eup %3894 }
 0x4b7   : > { %3896 = vpow2.f32 %v2671_v45  ;;  %v2786_v29 = vadd.f32 %v5485_v30, %v5482_v24  ;;  %v2679_v45 = vmul.f32 1.442695, %v2591_v54  ;;  %v2681_v49 = vmul.f32 1.442695, %v2592_v6 }
 0x4b8   : > { %3898 = vpow2.f32 %v2673_v46 }
 0x4b9   : > { %2787 = vadd.xlane.f32.xlu1 %v2786_v29  ;;  %3900 = vpow2.f32 %v2675_v34 }
 0x4ba   : > { %3902 = vpow2.f32 %v2677_v59 }
 0x4bb   : > { %v2512_v35 = vpop.xlane.xlu2 %2511  ;;  %3904 = vpow2.f32 %v2679_v45 }
 0x4bc   : > { %v5496_v28 = vpop.f32.mrf.mxu2  ;;  %v5498_v22 = vpop.f32.mrf.mxu3  ;;  %v2593_v42 = vsub.f32 %v5368_v1, %v2512_v35  ;;  %3906 = vpow2.f32 %v2681_v49  ;;  %v2594_v53 = vsub.f32 %v5370_v40, %v2512_v35  ;;  %v2579_v40 = vsub.f32 %v5306_v56, %v5420_v31 }
 0x4bd   : > { %v5490_v39 = vpop.eup %3896  ;;  %v2555_v54 = vmax.f32 %v5496_v28, %v5498_v22  ;;  %v2580_v49 = vsub.f32 %v5308_v14, %v5420_v31  ;;  %v2581_v14 = vsub.f32 %v5312_v43, %v5422_v47 }
 0x4be   : > { %v5493_v62 = vpop.eup %3898  ;;  %v2685_v20 = vmul.f32 1.442695, %v2594_v53 }
 0x4bf   : > { %v2789_v46 = vadd.f32 %v5493_v62, %v5490_v39  ;;  %v5504_v29 = vpop.eup %3900 }
 0x4c0   : > { %v5506_v34 = vpop.eup %3902 }
 0x4c1   : > { %2790 = vadd.xlane.f32.xlu2 %v2789_v46  ;;  %2553 = vmax.xlane.f32.xlu1 %v2552_v21  ;;  %v2792_v59 = vadd.f32 %v5506_v34, %v5504_v29  ;;  %v2683_v21 = vmul.f32 1.442695, %v2593_v42  ;;  %v5518_v45 = vpop.eup %3904 }
 0x4c2   : > { %6141 = vst [vmem:[#allocation29_spill] sm:$0xff] %v5518_v45  ;;  %v5520_v1 = vpop.eup %3906  ;;  %v2515_v53 = vpop.xlane.xlu1 %2514 }
 0x4c3   : > { %6142 = vst [vmem:[#allocation30_spill] sm:$0xff] %v5520_v1  ;;  %3908 = vpow2.f32 %v2683_v21  ;;  %v2795_v35 = vadd.f32 %v5520_v1, %v5518_v45  ;;  %v2595_v21 = vsub.f32 %v5376_v23, %v2515_v53 }
 0x4c4   : > { %v5514_v46 = vpop.f32.mrf.mxu2  ;;  %v5516_v6 = vpop.f32.mrf.mxu3  ;;  %3910 = vpow2.f32 %v2685_v20  ;;  %v2582_v20 = vsub.f32 %v5314_v44, %v5422_v47 }
 0x4c5   : > { %v2558_v42 = vmax.f32 %v5514_v46, %v5516_v6  ;;  %v2687_v43 = vmul.f32 1.442695, %v2595_v21 }
 0x4c6   : > { %v2661_v1 = vmul.f32 1.442695, %v2582_v20  ;;  %v2575_v20 = vsub.f32 %v5296_v19, %v5430_v4 }
 0x4c9   : > { %2793 = vadd.xlane.f32.xlu1 %v2792_v59  ;;  %2556 = vmax.xlane.f32.xlu2 %v2555_v54  ;;  %v2655_v59 = vmul.f32 1.442695, %v2579_v40  ;;  %v2657_v54 = vmul.f32 1.442695, %v2580_v49  ;;  %v5534_v56 = vpop.eup %3908  ;;  %v2596_v49 = vsub.f32 %v5378_v41, %v2515_v53 }
 0x4ca   : > { %v5538_v31 = vpop.eup %3910 }
 0x4cb   : > { %3912 = vpow2.f32 %v2655_v59  ;;  %v2689_v45 = vmul.f32 1.442695, %v2596_v49 }
 0x4cc   : > { %v5530_v37 = vpop.f32.mrf.mxu2  ;;  %v5532_v51 = vpop.f32.mrf.mxu3  ;;  %3914 = vpow2.f32 %v2657_v54 }
 0x4cd   : > { %v2561_v40 = vmax.f32 %v5530_v37, %v5532_v51 }
 0x4d1   : > { %2796 = vadd.xlane.f32.xlu2 %v2795_v35  ;;  %2559 = vmax.xlane.f32.xlu1 %v2558_v42  ;;  %v2659_v35 = vmul.f32 1.442695, %v2581_v14  ;;  %v2798_v42 = vadd.f32 %v5538_v31, %v5534_v56  ;;  %v5548_v3 = vpop.eup %3912  ;;  %v2518_v14 = vpop.xlane.xlu1 %2517 }
 0x4d2   : > { %v5550_v44 = vpop.eup %3914  ;;  %v2598_v49 = vsub.f32 %v5384_v60, %v2518_v14  ;;  %v2571_v60 = vsub.f32 %v5286_v32, %v5444_v10  ;;  %v2522_v32 = vmax.f32 %v5392_v57, %v5394_v0 }
 0x4d3   : > { %3916 = vpow2.f32 %v2659_v35  ;;  %6143 = vst [vmem:[#allocation31_spill] sm:$0xff] %v5550_v44  ;;  %v2777_v59 = vadd.f32 %v5550_v44, %v5548_v3  ;;  %v2647_v35 = vmul.f32 1.442695, %v2575_v20 }
 0x4d4   : > { %3918 = vpow2.f32 %v2661_v1  ;;  %v5552_v23 = vpop.f32.mrf.mxu2  ;;  %v5554_v47 = vpop.f32.mrf.mxu3  ;;  %v2693_v19 = vmul.f32 1.442695, %v2598_v49 }
 0x4d5   : > { %3920 = vpow2.f32 %v2687_v43  ;;  %v2564_v41 = vmax.f32 %v5552_v23, %v5554_v47 }
 0x4d6   : > { %3922 = vpow2.f32 %v2689_v45  ;;  %v2576_v45 = vsub.f32 %v5298_v15, %v5430_v4  ;;  %v2572_v4 = vsub.f32 %v5288_v11, %v5444_v10 }
 0x4d7   : > { %3924 = vpow2.f32 %v2647_v35 }
 0x4d8   : > { %v2641_v10 = vmul.f32 1.442695, %v2572_v4 }
 0x4d9   : > { %2799 = vadd.xlane.f32.xlu1 %v2798_v42  ;;  %2562 = vmax.xlane.f32.xlu2 %v2561_v40  ;;  %v5560_v53 = vpop.eup %3916  ;;  %v2597_v40 = vsub.f32 %v5382_v5, %v2518_v14 }
 0x4da   : > { %v5562_v54 = vpop.eup %3918 }
 0x4db   : > { %v5564_v1 = vpop.eup %3920  ;;  %v2780_v43 = vadd.f32 %v5562_v54, %v5560_v53 }
 0x4dc   : > { %v5568_v21 = vpop.eup %3922 }
 0x4dd   : > { %v2801_v42 = vadd.f32 %v5568_v21, %v5564_v1  ;;  %v5592_v11 = vpop.eup %3924 }
 0x4e1   : > { %2778 = vadd.xlane.f32.xlu2 %v2777_v59  ;;  %2565 = vmax.xlane.f32.xlu1 %v2564_v41  ;;  %v2649_v41 = vmul.f32 1.442695, %v2576_v45  ;;  %v2691_v59 = vmul.f32 1.442695, %v2597_v40  ;;  %v2577_v45 = vsub.f32 %v5300_v33, %v5432_v26  ;;  %v2578_v40 = vsub.f32 %v5302_v17, %v5432_v26 }
 0x4e3   : > { %3926 = vpow2.f32 %v2649_v41  ;;  %v2651_v33 = vmul.f32 1.442695, %v2577_v45  ;;  %v2653_v17 = vmul.f32 1.442695, %v2578_v40  ;;  %v2574_v41 = vsub.f32 %v5292_v7, %v5442_v27 }
 0x4e4   : > { %3928 = vpow2.f32 %v2691_v59 }
 0x4e5   : > { %3930 = vpow2.f32 %v2693_v19  ;;  %v2645_v4 = vmul.f32 1.442695, %v2574_v41 }
 0x4e9   : > { %2802 = vadd.xlane.f32.xlu2 %v2801_v42  ;;  %2781 = vadd.xlane.f32.xlu1 %v2780_v43  ;;  %v2573_v43 = vsub.f32 %v5290_v25, %v5442_v27 }
 0x4ea   : > { %v2530_v44 = vpop.xlane.xlu1 %2529 }
 0x4eb   : > { %v2605_v15 = vsub.f32 %v5402_v8, %v2530_v44  ;;  %v2606_v5 = vsub.f32 %v5404_v61, %v2530_v44  ;;  %v2519_v8 = vmax.f32 %v5388_v63, %v5390_v9  ;;  %v2639_v61 = vmul.f32 1.442695, %v2571_v60  ;;  %v5594_v44 = vpop.eup %3926 }
 0x4ec   : > { %6144 = vst [vmem:[#allocation32_spill] sm:$0xff] %v5594_v44  ;;  %v5596_v49 = vpop.eup %3928  ;;  %v2771_v19 = vadd.f32 %v5594_v44, %v5592_v11  ;;  %v2643_v60 = vmul.f32 1.442695, %v2573_v43 }
 0x4ed   : > { %v2707_v14 = vmul.f32 1.442695, %v2605_v15  ;;  %v2709_v20 = vmul.f32 1.442695, %v2606_v5  ;;  %v5598_v26 = vpop.eup %3930 }
 0x4ee   : > { %v2804_v15 = vadd.f32 %v5598_v26, %v5596_v49 }
 0x4ef   : > { %3932 = vpow2.f32 %v2707_v14 }
 0x4f0   : > { %3934 = vpow2.f32 %v2709_v20  ;;  %v5624_v20 = vpop.xlane.xlu2 %2526 }
 0x4f1   : > { %2520 = vmax.xlane.f32.xlu2 %v2519_v8  ;;  %2523 = vmax.xlane.f32.xlu1 %v2522_v32  ;;  %3936 = vpow2.f32 %v2639_v61 }
 0x4f2   : > { %3938 = vpow2.f32 %v2641_v10 }
 0x4f3   : > { %3940 = vpow2.f32 %v2651_v33 }
 0x4f4   : > { %3942 = vpow2.f32 %v2653_v17 }
 0x4f5   : > { %v5600_v35 = vpop.eup %3932  ;;  %3944 = vpow2.f32 %v2643_v60 }
 0x4f6   : > { %6145 = vst [vmem:[#allocation33_spill] sm:$0xff] %v5600_v35  ;;  %v5602_v42 = vpop.eup %3934  ;;  %3946 = vpow2.f32 %v2645_v4 }
 0x4f7   : > { %6146 = vst [vmem:[#allocation34_spill] sm:$0xff] %v5602_v42  ;;  %v2816_v59 = vadd.f32 %v5602_v42, %v5600_v35  ;;  %v5614_v5 = vpop.eup %3936 }
 0x4f8   : > { %6147 = vst [vmem:[#allocation35_spill] sm:$0xff] %v5614_v5  ;;  %v5616_v25 = vpop.eup %3938  ;;  %v5632_v32 = vpop.xlane.xlu2 %2532 }
 0x4f9   : > { %2817 = vadd.xlane.f32.xlu0 %v2816_v59  ;;  %2772 = vadd.xlane.f32.xlu2 %v2771_v19  ;;  %6148 = vst [vmem:[#allocation36_spill] sm:$0xff] %v5616_v25  ;;  %v5618_v14 = vpop.eup %3940  ;;  %v2765_v27 = vadd.f32 %v5616_v25, %v5614_v5 }
 0x4fa   : > { %2805 = vadd.xlane.f32.xlu1 %v2804_v15  ;;  %v5620_v7 = vpop.eup %3942  ;;  %v5638_v33 = vpop.xlane.xlu1 %2535 }
 0x4fb   : > { %v2774_v45 = vadd.f32 %v5620_v7, %v5618_v14  ;;  %v5628_v40 = vpop.eup %3944 }
 0x4fc   : > { %6149 = vst [vmem:[#allocation37_spill] sm:$0xff] %v5628_v40  ;;  %v5630_v8 = vpop.eup %3946 }
 0x4fd   : > { %6150 = vst [vmem:[#allocation38_spill] sm:$0xff] %v5630_v8  ;;  %v2768_v61 = vadd.f32 %v5630_v8, %v5628_v40 }
 0x501   : > { %2766 = vadd.xlane.f32.xlu2 %v2765_v27 }
 0x502   : > { %2775 = vadd.xlane.f32.xlu1 %v2774_v45  ;;  %v5636_v10 = vpop.xlane.xlu2 %2538 }
 0x50a   : > { %2769 = vadd.xlane.f32.xlu1 %v2768_v61  ;;  %v5642_v43 = vpop.xlane.xlu1 %2541 }
 0x512   : > { %v5640_v17 = vpop.xlane.xlu2 %2544 }
 0x51a   : > { %v2785_v41 = vpop.xlane.xlu2 %2784  ;;  %v5644_v59 = vpop.xlane.xlu1 %2547 }
 0x51b   : > { %3948 = vrcp.f32 %v2785_v41 }
 0x521   : > { %v3949_v60 = vpop.eup %3948 }
 0x522   : > { %v2551_v19 = vpop.xlane.xlu2 %2550  ;;  %v5649_v61 = vmul.f32 %v3949_v60, %v5452_v48  ;;  %v5655_v35 = vmul.f32 %v3949_v60, %v5454_v55 }
 0x52c   : > { %v2788_v15 = vpop.xlane.xlu1 %2787 }
 0x52d   : > { %3950 = vrcp.f32 %v2788_v15  ;;  %v3696_v15 = vld [vmem:[%s5242_s18 + $0x20] sm:$0xff] }
 0x52e   : > { %3529 = vmatmul.msk.bf16.gmra.mxu0 %vm2045_vm5, %v3696_v15  ;;  %3535 = vmatmul.msk.bf16.gmra.mxu1 %vm2045_vm5, %v3696_v15 }
 0x533   : > { %v3951_v4 = vpop.eup %3950 }
 0x534   : > { %v2791_v27 = vpop.xlane.xlu2 %2790  ;;  %v5646_v45 = vpop.xlane.xlu1 %2553  ;;  %v5652_v42 = vmul.f32 %v3951_v4, %v5482_v24  ;;  %v5658_v25 = vmul.f32 %v3951_v4, %v5485_v30 }
 0x535   : > { %3952 = vrcp.f32 %v2791_v27  ;;  %v2621_v15 = vsub.f32 %v5478_v52, %v5646_v45 }
 0x53b   : > { %v3953_v60 = vpop.eup %3952 }
 0x53c   : > { %v2794_v5 = vpop.xlane.xlu1 %2793  ;;  %v2557_v8 = vpop.xlane.xlu2 %2556  ;;  %v5669_v44 = vmul.f32 %v3953_v60, %v5490_v39  ;;  %v2620_v39 = vsub.f32 %v5472_v2, %v2551_v19 }
 0x53d   : > { %3954 = vrcp.f32 %v2794_v5  ;;  %v2623_v48 = vsub.f32 %v5496_v28, %v2557_v8  ;;  %v2624_v24 = vsub.f32 %v5498_v22, %v2557_v8  ;;  %v5675_v5 = vmul.f32 %v3953_v60, %v5493_v62 }
 0x53f   : > { %v2743_v40 = vmul.f32 1.442695, %v2623_v48  ;;  %v2745_v55 = vmul.f32 1.442695, %v2624_v24 }
 0x541   : > { %3956 = vpow2.f32 %v2743_v40 }
 0x542   : > { %3958 = vpow2.f32 %v2745_v55 }
 0x543   : > { %v3955_v30 = vpop.eup %3954 }
 0x544   : > { %v5666_v4 = vpop.xlane.xlu2 %2796  ;;  %v2560_v41 = vpop.xlane.xlu1 %2559  ;;  %v5672_v27 = vmul.f32 %v3955_v30, %v5504_v29  ;;  %v5678_v28 = vmul.f32 %v3955_v30, %v5506_v34  ;;  %v2619_v30 = vsub.f32 %v5470_v12, %v2551_v19  ;;  %v2568_v19 = vsub.f32 %v5278_v13, %v5466_v58 }
 0x545   : > { %v2625_v22 = vsub.f32 %v5514_v46, %v2560_v41  ;;  %v2626_v40 = vsub.f32 %v5516_v6, %v2560_v41 }
 0x547   : > { %v5686_v48 = vpop.eup %3956  ;;  %v2747_v29 = vmul.f32 1.442695, %v2625_v22  ;;  %v2749_v24 = vmul.f32 1.442695, %v2626_v40 }
 0x548   : > { %v5688_v62 = vpop.eup %3958 }
 0x549   : > { %3960 = vpow2.f32 %v2747_v29  ;;  %v2843_v34 = vadd.f32 %v5688_v62, %v5686_v48 }
 0x54a   : > { %3962 = vpow2.f32 %v2749_v24 }
 0x54b   : > { %2844 = vadd.xlane.f32.xlu2 %v2843_v34  ;;  %v2567_v34 = vsub.f32 %v5276_v50, %v5466_v58  ;;  %v2622_v50 = vsub.f32 %v5480_v38, %v5646_v45  ;;  %v2633_v58 = vmul.f32 1.442695, %v2568_v19  ;;  %v2570_v45 = vsub.f32 %v5282_v36, %v5456_v16 }
 0x54c   : > { %v5692_v46 = vpop.xlane.xlu1 %2799  ;;  %v2563_v6 = vpop.xlane.xlu2 %2562 }
 0x54d   : > { %v2627_v41 = vsub.f32 %v5530_v37, %v2563_v6  ;;  %v2628_v55 = vsub.f32 %v5532_v51, %v2563_v6  ;;  %v2735_v37 = vmul.f32 1.442695, %v2619_v30  ;;  %v2737_v51 = vmul.f32 1.442695, %v2620_v39 }
 0x54f   : > { %v5696_v60 = vpop.eup %3960  ;;  %v2751_v22 = vmul.f32 1.442695, %v2627_v41  ;;  %v2753_v40 = vmul.f32 1.442695, %v2628_v55 }
 0x550   : > { %v5700_v29 = vpop.eup %3962 }
 0x551   : > { %3964 = vpow2.f32 %v2751_v22  ;;  %v2846_v24 = vadd.f32 %v5700_v29, %v5696_v60  ;;  %v2741_v22 = vmul.f32 1.442695, %v2622_v50  ;;  %v6155_v50 = vld [vmem:[#allocation21_spill] sm:$0xff] }
 0x552   : > { %3966 = vpow2.f32 %v2753_v40 }
 0x553   : > { %2847 = vadd.xlane.f32.xlu1 %v2846_v24  ;;  %3968 = vpow2.f32 %v2735_v37  ;;  %v2569_v24 = vsub.f32 %v5280_v18, %v5456_v16  ;;  %v3697_v37 = vld [vmem:[%s5242_s18 + $0x28] sm:$0xff]  ;;  %v2637_v16 = vmul.f32 1.442695, %v2570_v45 }
 0x554   : > { %v2566_v12 = vpop.xlane.xlu1 %2565  ;;  %3970 = vpow2.f32 %v2737_v51  ;;  %v5742_v18 = vpop.xlane.xlu2 %2778  ;;  %3530 = vmatmul.msk.bf16.gmra.mxu0 %vm2045_vm5, %v3697_v37  ;;  %3536 = vmatmul.msk.bf16.gmra.mxu1 %vm2045_vm5, %v3697_v37  ;;  %v6157_v37 = vld [vmem:[#allocation27_spill] sm:$0xff] }
 0x555   : > { %v2629_v6 = vsub.f32 %v5552_v23, %v2566_v12  ;;  %v2630_v2 = vsub.f32 %v5554_v47, %v2566_v12  ;;  %v2631_v23 = vmul.f32 1.442695, %v2567_v34  ;;  %v2739_v47 = vmul.f32 1.442695, %v2621_v15  ;;  %v6153_v12 = vld [vmem:[#allocation25_spill] sm:$0xff] }
 0x556   : > { %v2615_v34 = vsub.f32 %v6153_v12, %v5640_v17  ;;  %v2635_v15 = vmul.f32 1.442695, %v2569_v24 }
 0x557   : > { %v5713_v41 = vpop.eup %3964  ;;  %v2755_v55 = vmul.f32 1.442695, %v2629_v6  ;;  %v2757_v30 = vmul.f32 1.442695, %v2630_v2  ;;  %v6154_v2 = vld [vmem:[#allocation26_spill] sm:$0xff] }
 0x558   : > { %v5717_v39 = vpop.eup %3966  ;;  %v2616_v19 = vsub.f32 %v6154_v2, %v5640_v17  ;;  %v2611_v17 = vsub.f32 %v6155_v50, %v5636_v10  ;;  %v2617_v2 = vsub.f32 %v6157_v37, %v5644_v59 }
 0x559   : > { %3972 = vpow2.f32 %v2755_v55  ;;  %v2849_v13 = vadd.f32 %v5717_v39, %v5713_v41  ;;  %v5725_v40 = vpop.eup %3968 }
 0x55a   : > { %3974 = vpow2.f32 %v2757_v30  ;;  %6151 = vst [vmem:[#allocation39_spill] sm:$0xff] %v5725_v40  ;;  %v5729_v38 = vpop.eup %3970 }
 0x55b   : > { %2850 = vadd.xlane.f32.xlu2 %v2849_v13  ;;  %3976 = vpow2.f32 %v2631_v23  ;;  %6152 = vst [vmem:[#allocation40_spill] sm:$0xff] %v5729_v38  ;;  %v2837_v55 = vadd.f32 %v5729_v38, %v5725_v40  ;;  %v2727_v23 = vmul.f32 1.442695, %v2615_v34  ;;  %v2719_v34 = vmul.f32 1.442695, %v2611_v17 }
 0x55c   : > { %v5723_v52 = vpop.xlane.xlu1 %2781  ;;  %3978 = vpow2.f32 %v2633_v58  ;;  %v6156_v58 = vld [vmem:[#allocation22_spill] sm:$0xff]  ;;  %v2803_v8 = vpop.xlane.xlu2 %2802 }
 0x55d   : > { %3980 = vpow2.f32 %v2739_v47  ;;  %v2612_v47 = vsub.f32 %v6156_v58, %v5636_v10 }
 0x55e   : > { %3982 = vpow2.f32 %v2741_v22  ;;  %v2729_v22 = vmul.f32 1.442695, %v2616_v19 }
 0x55f   : > { %v5734_v51 = vpop.eup %3972  ;;  %3984 = vpow2.f32 %v2635_v15  ;;  %v6159_v15 = vld [vmem:[#allocation17_spill] sm:$0xff] }
 0x560   : > { %v5738_v6 = vpop.eup %3974  ;;  %3986 = vpow2.f32 %v2637_v16  ;;  %v2607_v58 = vsub.f32 %v6159_v15, %v5632_v32  ;;  %v2731_v16 = vmul.f32 1.442695, %v2617_v2  ;;  %v6163_v15 = vld [vmem:[#allocation23_spill] sm:$0xff] }
 0x561   : > { %v2852_v36 = vadd.f32 %v5738_v6, %v5734_v51  ;;  %v5750_v30 = vpop.eup %3976  ;;  %3988 = vpow2.f32 %v2727_v23 }
 0x562   : > { %v5754_v13 = vpop.eup %3978  ;;  %3990 = vpow2.f32 %v2729_v22  ;;  %v2711_v2 = vmul.f32 1.442695, %v2607_v58 }
 0x563   : > { %2838 = vadd.xlane.f32.xlu2 %v2837_v55  ;;  %2853 = vadd.xlane.f32.xlu1 %v2852_v36  ;;  %v5760_v12 = vpop.eup %3980  ;;  %v2721_v55 = vmul.f32 1.442695, %v2612_v47  ;;  %v6158_v36 = vld [vmem:[#allocation28_spill] sm:$0xff]  ;;  %v2759_v10 = vadd.f32 %v5754_v13, %v5750_v30  ;;  %3992 = vpow2.f32 %v2719_v34  ;;  %v2613_v34 = vsub.f32 %v6163_v15, %v5642_v43 }
 0x564   : > { %v5758_v24 = vpop.xlane.xlu1 %2523  ;;  %v5762_v45 = vpop.eup %3982  ;;  %v2618_v50 = vsub.f32 %v6158_v36, %v5644_v59  ;;  %v6160_v59 = vld [vmem:[#allocation18_spill] sm:$0xff]  ;;  %v6166_v15 = vld [vmem:[#allocation16_spill] sm:$0xff] }
 0x565   : > { %v2840_v19 = vadd.f32 %v5762_v45, %v5760_v12  ;;  %v5774_v38 = vpop.eup %3984  ;;  %v2608_v23 = vsub.f32 %v6160_v59, %v5632_v32  ;;  %3994 = vpow2.f32 %v2721_v55 }
 0x566   : > { %v5776_v17 = vpop.eup %3986  ;;  %v2733_v47 = vmul.f32 1.442695, %v2618_v50  ;;  %3996 = vrcp.f32 %v2803_v8 }
 0x567   : > { %v5780_v22 = vpop.eup %3988  ;;  %3998 = vpow2.f32 %v2731_v16  ;;  %v2762_v8 = vadd.f32 %v5776_v17, %v5774_v38  ;;  %v2723_v16 = vmul.f32 1.442695, %v2613_v34 }
 0x568   : > { %6161 = vst [vmem:[#allocation25_spill] sm:$0xff] %v5780_v22  ;;  %v5782_v36 = vpop.eup %3990 }
 0x569   : > { %6162 = vst [vmem:[#allocation26_spill] sm:$0xff] %v5782_v36  ;;  %v5788_v32 = vpop.eup %3992  ;;  %v2831_v55 = vadd.f32 %v5782_v36, %v5780_v22 }
 0x56b   : > { %2760 = vadd.xlane.f32.xlu2 %v2759_v10  ;;  %2841 = vadd.xlane.f32.xlu1 %v2840_v19  ;;  %v2713_v10 = vmul.f32 1.442695, %v2608_v23  ;;  %v6164_v19 = vld [vmem:[#allocation24_spill] sm:$0xff]  ;;  %v5794_v50 = vpop.eup %3994 }
 0x56c   : > { %v2614_v40 = vsub.f32 %v6164_v19, %v5642_v43  ;;  %v3997_v58 = vpop.eup %3996  ;;  %v2604_v19 = vsub.f32 %v6166_v15, %v5624_v20 }
 0x56d   : > { %v2806_v37 = vpop.xlane.xlu1 %2805  ;;  %v5797_v59 = vpop.eup %3998  ;;  %v2915_v34 = vmul.f32 %v3997_v58, %v5564_v1 }
 0x56e   : > { %4000 = vrcp.f32 %v2806_v37  ;;  %v2725_v43 = vmul.f32 1.442695, %v2614_v40  ;;  %v6167_v40 = vld [vmem:[#allocation19_spill] sm:$0xff] }
 0x56f   : > { %4002 = vpow2.f32 %v2733_v47  ;;  %v6165_v47 = vld [vmem:[#allocation15_spill] sm:$0xff] }
 0x570   : > { %4004 = vpow2.f32 %v2711_v2  ;;  %v2603_v37 = vsub.f32 %v6165_v47, %v5624_v20  ;;  %v6168_v20 = vld [vmem:[#allocation20_spill] sm:$0xff] }
 0x571   : > { %4006 = vrcp.f32 %v5692_v46  ;;  %v2610_v15 = vsub.f32 %v6168_v20, %v5638_v33 }
 0x572   : > { %4008 = vpow2.f32 %v2713_v10  ;;  %v2703_v1 = vmul.f32 1.442695, %v2603_v37 }
 0x573   : > { %2832 = vadd.xlane.f32.xlu2 %v2831_v55  ;;  %2763 = vadd.xlane.f32.xlu1 %v2762_v8  ;;  %4010 = vrcp.f32 %v5666_v4  ;;  %v2916_v55 = vmul.f32 %v3997_v58, %v5568_v21  ;;  %v2609_v8 = vsub.f32 %v6167_v40, %v5638_v33  ;;  %v2705_v58 = vmul.f32 1.442695, %v2604_v19 }
 0x574   : > { %v4001_v23 = vpop.eup %4000  ;;  %4012 = vpow2.f32 %v2723_v16  ;;  %v2521_v16 = vpop.xlane.xlu2 %2520  ;;  %v2717_v33 = vmul.f32 1.442695, %v2610_v15 }
 0x575   : > { %v5804_v2 = vpop.eup %4002  ;;  %v2917_v46 = vmul.f32 %v4001_v23, %v5596_v49  ;;  %v2918_v10 = vmul.f32 %v4001_v23, %v5598_v26  ;;  %4014 = vpow2.f32 %v2725_v43  ;;  %v2825_v49 = vadd.f32 %v5794_v50, %v5788_v32 }
 0x576   : > { %v5812_v47 = vpop.eup %4004  ;;  %v2834_v21 = vadd.f32 %v5804_v2, %v5797_v59  ;;  %v2715_v40 = vmul.f32 1.442695, %v2609_v8  ;;  %4016 = vpow2.f32 %v2703_v1  ;;  %v2600_v19 = vsub.f32 %v5390_v9, %v2521_v16  ;;  %v6170_v8 = vld [vmem:[#allocation30_spill] sm:$0xff] }
 0x577   : > { %v2965_v4 = vpack.c.bf16 %v2917_v46, %v2915_v34  ;;  %v2966_v36 = vpack.c.bf16 %v2918_v10, %v2916_v55  ;;  %v4007_v22 = vpop.eup %4006  ;;  %v2599_v46 = vsub.f32 %v5388_v63, %v2521_v16  ;;  %4018 = vpow2.f32 %v2705_v58 }
 0x578   : > { %v5820_v26 = vpop.eup %4008  ;;  %v2913_v43 = vmul.f32 %v4007_v22, %v5534_v56  ;;  %v2914_v37 = vmul.f32 %v4007_v22, %v5538_v31  ;;  %4020 = vpow2.f32 %v2715_v40  ;;  %v2601_v56 = vsub.f32 %v5392_v57, %v5758_v24 }
 0x579   : > { %3003 = vmatpush.bf16.xpose.msrb.mxu0 %v2965_v4  ;;  %3022 = vmatpush.bf16.xpose.msrb.mxu1 %v2966_v36  ;;  %v4011_v23 = vpop.eup %4010  ;;  %v6169_v36 = vld [vmem:[#allocation29_spill] sm:$0xff]  ;;  %4022 = vpow2.f32 %v2717_v33  ;;  %v2602_v31 = vsub.f32 %v5394_v0, %v5758_v24  ;;  %v2695_v63 = vmul.f32 1.442695, %v2599_v46  ;;  %v2819_v4 = vadd.f32 %v5820_v26, %v5812_v47 }
 0x57a   : > { %v5824_v34 = vpop.eup %4012  ;;  %v2911_v10 = vmul.f32 %v4011_v23, %v6169_v36  ;;  %v2912_v20 = vmul.f32 %v4011_v23, %v6170_v8  ;;  %v2697_v1 = vmul.f32 1.442695, %v2600_v19  ;;  %v6171_v40 = vpack.c.bf16 %v5672_v27, %v5669_v44  ;;  %v2776_v44 = vpop.xlane.xlu1 %2775 }
 0x57b   : > { %2826 = vadd.xlane.f32.xlu2 %v2825_v49  ;;  %2835 = vadd.xlane.f32.xlu1 %v2834_v21  ;;  %v5827_v55 = vpop.eup %4014  ;;  %v2699_v21 = vmul.f32 1.442695, %v2601_v56  ;;  %v2701_v0 = vmul.f32 1.442695, %v2602_v31  ;;  %4024 = vpow2.f32 %v2695_v63  ;;  %v6172_v33 = vpack.c.bf16 %v5678_v28, %v5675_v5  ;;  %v6175_v31 = vld [vmem:[#allocation31_spill] sm:$0xff] }
 0x57c   : > { %v2963_v22 = vpack.c.bf16 %v2913_v43, %v2911_v10  ;;  %v2964_v15 = vpack.c.bf16 %v2914_v37, %v2912_v20  ;;  %v2828_v9 = vadd.f32 %v5827_v55, %v5824_v34  ;;  %v5840_v49 = vpop.eup %4016  ;;  %4026 = vpow2.f32 %v2697_v1  ;;  %v2773_v27 = vpop.xlane.xlu2 %2772 }
 0x57d   : > { %v5842_v57 = vpop.eup %4018  ;;  %4028 = vpow2.f32 %v2699_v21  ;;  %v6174_v10 = vpack.c.bf16 %v5658_v25, %v5655_v35 }
 0x57e   : > { %v5844_v24 = vpop.eup %4020  ;;  %4030 = vpow2.f32 %v2701_v0  ;;  %v2813_v16 = vadd.f32 %v5842_v57, %v5840_v49 }
 0x57f   : > { %v5846_v58 = vpop.eup %4022  ;;  %4032 = vrcp.f32 %v5723_v52  ;;  %v6173_v52 = vpack.c.bf16 %v5652_v42, %v5649_v61 }
 0x580   : > { %v2822_v23 = vadd.f32 %v5846_v58, %v5844_v24  ;;  %4034 = vrcp.f32 %v5742_v18 }
 0x581   : > { %3004 = vmatpush.bf16.xpose.msrb.mxu0 %v2963_v22  ;;  %3023 = vmatpush.bf16.xpose.msrb.mxu1 %v2964_v15  ;;  %v5858_v43 = vpop.eup %4024  ;;  %4036 = vrcp.f32 %v2776_v44 }
 0x582   : > { %v5861_v37 = vpop.eup %4026  ;;  %4038 = vrcp.f32 %v2773_v27  ;;  %v2770_v15 = vpop.xlane.xlu1 %2769  ;;  %v6179_v27 = vld [vmem:[#allocation35_spill] sm:$0xff] }
 0x583   : > { %2820 = vadd.xlane.f32.xlu2 %v2819_v4  ;;  %2829 = vadd.xlane.f32.xlu1 %v2828_v9  ;;  %v5863_v46 = vpop.eup %4028  ;;  %v2807_v5 = vadd.f32 %v5861_v37, %v5858_v43  ;;  %4040 = vrcp.f32 %v2770_v15  ;;  %v6176_v9 = vld [vmem:[#allocation32_spill] sm:$0xff] }
 0x584   : > { %v5866_v19 = vpop.eup %4030  ;;  %v2767_v4 = vpop.xlane.xlu2 %2766 }
 0x585   : > { %v4033_v36 = vpop.eup %4032  ;;  %v2810_v28 = vadd.f32 %v5866_v19, %v5863_v46  ;;  %4042 = vrcp.f32 %v2767_v4 }
 0x586   : > { %v4035_v18 = vpop.eup %4034  ;;  %v2901_v8 = vmul.f32 %v4033_v36, %v5560_v53  ;;  %v2902_v20 = vmul.f32 %v4033_v36, %v5562_v54 }
 0x587   : > { %v2899_v56 = vmul.f32 %v4035_v18, %v5548_v3  ;;  %v2900_v22 = vmul.f32 %v4035_v18, %v6175_v31  ;;  %v4037_v63 = vpop.eup %4036 }
 0x588   : > { %v4039_v35 = vpop.eup %4038  ;;  %v2897_v25 = vmul.f32 %v4037_v63, %v5618_v14  ;;  %v2898_v53 = vmul.f32 %v4037_v63, %v5620_v7  ;;  %v6180_v14 = vld [vmem:[#allocation36_spill] sm:$0xff] }
 0x589   : > { %3005 = vmatpush.bf16.xpose.msrb.mxu0 %v6171_v40  ;;  %3024 = vmatpush.bf16.xpose.msrb.mxu1 %v6172_v33  ;;  %v2957_v42 = vpack.c.bf16 %v2901_v8, %v2899_v56  ;;  %v2958_v61 = vpack.c.bf16 %v2902_v20, %v2900_v22  ;;  %v2895_v54 = vmul.f32 %v4039_v35, %v5592_v11  ;;  %v4041_v0 = vpop.eup %4040  ;;  %v6178_v33 = vld [vmem:[#allocation38_spill] sm:$0xff] }
 0x58a   : > { %v2896_v3 = vmul.f32 %v4039_v35, %v6176_v9  ;;  %v2894_v44 = vmul.f32 %v4041_v0, %v6178_v33 }
 0x58b   : > { %2814 = vadd.xlane.f32.xlu2 %v2813_v16  ;;  %2823 = vadd.xlane.f32.xlu1 %v2822_v23  ;;  %v2955_v1 = vpack.c.bf16 %v2897_v25, %v2895_v54  ;;  %v4043_v16 = vpop.eup %4042  ;;  %v6177_v23 = vld [vmem:[#allocation37_spill] sm:$0xff] }
 0x58c   : > { %v2956_v21 = vpack.c.bf16 %v2898_v53, %v2896_v3  ;;  %v2893_v40 = vmul.f32 %v4041_v0, %v6177_v23  ;;  %v2891_v36 = vmul.f32 %v4043_v16, %v6179_v27 }
 0x58e   : > { %v2953_v7 = vpack.c.bf16 %v2893_v40, %v2891_v36 }
 0x591   : > { %3006 = vmatpush.bf16.xpose.msrb.mxu0 %v6173_v52  ;;  %3025 = vmatpush.bf16.xpose.msrb.mxu1 %v6174_v10 }
 0x593   : > { %2808 = vadd.xlane.f32.xlu1 %v2807_v5  ;;  %2811 = vadd.xlane.f32.xlu2 %v2810_v28  ;;  %v2892_v5 = vmul.f32 %v4043_v16, %v6180_v14 }
 0x595   : > { %v2954_v28 = vpack.c.bf16 %v2894_v44, %v2892_v5 }
 0x599   : > { %3007 = vmatpush.bf16.xpose.msrb.mxu0 %v2957_v42  ;;  %3026 = vmatpush.bf16.xpose.msrb.mxu1 %v2958_v61 }
 0x5a1   : > { %3008 = vmatpush.bf16.xpose.msrb.mxu0 %v2955_v1  ;;  %3027 = vmatpush.bf16.xpose.msrb.mxu1 %v2956_v21 }
 0x5a9   : > { %3009 = vmatpush.bf16.xpose.msrb.mxu0 %v2953_v7  ;;  %3028 = vmatpush.bf16.xpose.msrb.mxu1 %v2954_v28 }
 0x5ab   : > { %v2093_v10 = vpop.f32.mrf.mxu0  ;;  %v2132_v8 = vpop.f32.mrf.mxu1 }
 0x5ac   : > { %v2150_v20 = vpack.c.bf16 %v2132_v8, %v2093_v10 }
 0x5ae   : > { %2162 = vst [vmem:[#allocation4 + $0x40] sm:$0xff] %v2150_v20 }
 0x5b3   : > { %v2095_v31 = vpop.f32.mrf.mxu0  ;;  %v2134_v22 = vpop.f32.mrf.mxu1 }
 0x5b4   : > { %v2151_v15 = vpack.c.bf16 %v2134_v22, %v2095_v31 }
 0x5b6   : > { %2163 = vst [vmem:[#allocation4 + $0x48] sm:$0xff] %v2151_v15 }
 0x5be   : > { %v2845_v11 = vpop.xlane.xlu2 %2844 }
 0x5c6   : > { %v2848_v52 = vpop.xlane.xlu1 %2847 }
 0x5ce   : > { %v2851_v18 = vpop.xlane.xlu2 %2850 }
 0x5d1   : > { %v2098_v63 = vpop.f32.mrf.mxu0  ;;  %v2137_v4 = vpop.f32.mrf.mxu1 }
 0x5d2   : > { %v2152_v35 = vpack.c.bf16 %v2137_v4, %v2098_v63  ;;  %v6181_v4 = vld [vmem:[#allocation39_spill] sm:$0xff] }
 0x5d4   : > { %2164 = vst [vmem:[#allocation4 + $0x50] sm:$0xff] %v2152_v35  ;;  %v6182_v35 = vld [vmem:[#allocation40_spill] sm:$0xff] }
 0x5d6   : > { %v2854_v56 = vpop.xlane.xlu1 %2853  ;;  %v2839_v42 = vpop.xlane.xlu2 %2838 }
 0x5d7   : > { %4044 = vrcp.f32 %v2854_v56 }
 0x5d9   : > { %v2100_v54 = vpop.f32.mrf.mxu0  ;;  %v2139_v9 = vpop.f32.mrf.mxu1 }
 0x5da   : > { %v2153_v3 = vpack.c.bf16 %v2139_v9, %v2100_v54 }
 0x5db   : > { %v3612_v9 = vld [vmem:[#allocation4 + $0x50] sm:$0xf] }
 0x5dc   : > { %2165 = vst [vmem:[#allocation4 + $0x58] sm:$0xff] %v2153_v3 }
 0x5dd   : > { %v4045_v1 = vpop.eup %4044 }
 0x5de   : > { %v2842_v61 = vpop.xlane.xlu1 %2841  ;;  %v2761_v25 = vpop.xlane.xlu2 %2760  ;;  %v2949_v23 = vmul.f32 %v4045_v1, %v5734_v51  ;;  %v2950_v40 = vmul.f32 %v4045_v1, %v5738_v6  ;;  %v3604_v51 = vld [vmem:[#allocation4 + $0x40] sm:$0xf]  ;;  %v3703_v6 = vld [vmem:[#allocation4 + $0x44] sm:$0xf0] }
 0x5df   : > { %4046 = vrcp.f32 %v2761_v25 }
 0x5e0   : > { %4048 = vrcp.f32 %v2851_v18 }
 0x5e3   : > { %v3705_v1 = vld [vmem:[#allocation4 + $0x54] sm:$0xf0] }
 0x5e5   : > { %v4047_v21 = vpop.eup %4046 }
 0x5e6   : > { %v2764_v53 = vpop.xlane.xlu1 %2763  ;;  %v4049_v0 = vpop.eup %4048  ;;  %v2887_v33 = vmul.f32 %v4047_v21, %v5750_v30  ;;  %v2888_v27 = vmul.f32 %v4047_v21, %v5754_v13  ;;  %v3702_v30 = vld [vmem:[#allocation4 + $0x44] sm:$0xf]  ;;  %v3704_v21 = vld [vmem:[#allocation4 + $0x54] sm:$0xf] }
 0x5e7   : > { %4050 = vrcp.f32 %v2764_v53  ;;  %v2947_v14 = vmul.f32 %v4049_v0, %v5713_v41  ;;  %v2948_v5 = vmul.f32 %v4049_v0, %v5717_v39  ;;  %v2833_v7 = vpop.xlane.xlu2 %2832  ;;  %v3614_v0 = vld [vmem:[#allocation4 + $0x58] sm:$0xf0] }
 0x5e8   : > { %4052 = vrcp.f32 %v2848_v52 }
 0x5e9   : > { %4054 = vrcp.f32 %v2845_v11  ;;  %v2981_v11 = vpack.c.bf16 %v2949_v23, %v2947_v14  ;;  %v2982_v10 = vpack.c.bf16 %v2950_v40, %v2948_v5  ;;  %v5914_v40 = vor.u32 %v3705_v1, %v3612_v9 }
 0x5ea   : > { %4056 = vrcp.f32 %v2842_v61 }
 0x5eb   : > { %4058 = vrcp.f32 %v2839_v42 }
 0x5ed   : > { %v4051_v16 = vpop.eup %4050 }
 0x5ee   : > { %v2889_v44 = vmul.f32 %v4051_v16, %v5774_v38  ;;  %v2890_v36 = vmul.f32 %v4051_v16, %v5776_v17  ;;  %v4053_v18 = vpop.eup %4052  ;;  %v3606_v38 = vld [vmem:[#allocation4 + $0x48] sm:$0xf0]  ;;  %v2836_v13 = vpop.xlane.xlu1 %2835  ;;  %v5900_v17 = vor.u32 %v3703_v6, %v3604_v51 }
 0x5ef   : > { %v4055_v8 = vpop.eup %4054  ;;  %v2945_v41 = vmul.f32 %v4053_v18, %v5696_v60  ;;  %v2946_v39 = vmul.f32 %v4053_v18, %v5700_v29  ;;  %v5902_v20 = vor.u32 %v3702_v30, %v3606_v38  ;;  %v2827_v63 = vpop.xlane.xlu2 %2826  ;;  %4060 = vrcp.f32 %v2836_v13 }
 0x5f0   : > { %v2951_v28 = vpack.c.bf16 %v2889_v44, %v2887_v33  ;;  %v2952_v52 = vpack.c.bf16 %v2890_v36, %v2888_v27  ;;  %v2943_v56 = vmul.f32 %v4055_v8, %v5686_v48  ;;  %v2944_v31 = vmul.f32 %v4055_v8, %v5688_v62  ;;  %v4057_v61 = vpop.eup %4056  ;;  %v6183_v44 = vld [vmem:[#allocation25_spill] sm:$0xff]  ;;  %v6184_v36 = vld [vmem:[#allocation26_spill] sm:$0xff]  ;;  %v2818_v8 = vpop.xlane.xlu0 %2817 }
 0x5f1   : > { %v4059_v60 = vpop.eup %4058  ;;  %v2941_v29 = vmul.f32 %v4057_v61, %v5760_v12  ;;  %v2942_v42 = vmul.f32 %v4057_v61, %v5762_v45  ;;  %4062 = vrcp.f32 %v2833_v7  ;;  %v5916_v33 = vor.u32 %v3704_v21, %v3614_v0 }
 0x5f2   : > { %3010 = vmatpush.bf16.xpose.msrb.mxu0 %v2951_v28  ;;  %3029 = vmatpush.bf16.xpose.msrb.mxu1 %v2952_v52  ;;  %v2979_v22 = vpack.c.bf16 %v2945_v41, %v2943_v56  ;;  %v2980_v15 = vpack.c.bf16 %v2946_v39, %v2944_v31  ;;  %v2939_v62 = vmul.f32 %v4059_v60, %v6181_v4 }
 0x5f3   : > { %v2940_v25 = vmul.f32 %v4059_v60, %v6182_v35  ;;  %v6186_v60 = vld [vmem:[#allocation34_spill] sm:$0xff] }
 0x5f4   : > { %v2977_v53 = vpack.c.bf16 %v2941_v29, %v2939_v62 }
 0x5f5   : > { %v2978_v54 = vpack.c.bf16 %v2942_v42, %v2940_v25  ;;  %v4061_v3 = vpop.eup %4060 }
 0x5f6   : > { %v2830_v48 = vpop.xlane.xlu1 %2829  ;;  %v2937_v12 = vmul.f32 %v4061_v3, %v5797_v59  ;;  %v2938_v45 = vmul.f32 %v4061_v3, %v5804_v2 }
 0x5f7   : > { %v4063_v16 = vpop.eup %4062  ;;  %v2821_v23 = vpop.xlane.xlu2 %2820  ;;  %4064 = vrcp.f32 %v2830_v48 }
 0x5f8   : > { %4066 = vrcp.f32 %v2827_v63  ;;  %v2935_v27 = vmul.f32 %v4063_v16, %v6183_v44  ;;  %v2936_v14 = vmul.f32 %v4063_v16, %v6184_v36 }
 0x5f9   : > { %3011 = vmatmul.bf16.vlgmr.msrb.gmra.mxu0 %v5900_v17  ;;  %3030 = vmatmul.bf16.vlgmr.msrb.gmra.mxu1 %v5902_v20 }
 0x5fa   : > { %3041 = vmatpush.bf16.xpose.msra.mxu0 %v2981_v11  ;;  %3060 = vmatpush.bf16.xpose.msra.mxu1 %v2982_v10  ;;  %v2975_v7 = vpack.c.bf16 %v2937_v12, %v2935_v27  ;;  %v2976_v28 = vpack.c.bf16 %v2938_v45, %v2936_v14 }
 0x5fd   : > { %v4065_v52 = vpop.eup %4064 }
 0x5fe   : > { %v2824_v5 = vpop.xlane.xlu1 %2823  ;;  %v4067_v59 = vpop.eup %4066  ;;  %v2933_v2 = vmul.f32 %v4065_v52, %v5824_v34  ;;  %v2934_v11 = vmul.f32 %v4065_v52, %v5827_v55 }
 0x5ff   : > { %4068 = vrcp.f32 %v2824_v5  ;;  %v2815_v10 = vpop.xlane.xlu2 %2814  ;;  %v2931_v51 = vmul.f32 %v4067_v59, %v5788_v32  ;;  %v2932_v18 = vmul.f32 %v4067_v59, %v5794_v50 }
 0x600   : > { %4070 = vrcp.f32 %v2821_v23 }
 0x601   : > { %v2973_v6 = vpack.c.bf16 %v2933_v2, %v2931_v51  ;;  %v2974_v30 = vpack.c.bf16 %v2934_v11, %v2932_v18  ;;  %4072 = vrcp.f32 %v2815_v10 }
 0x602   : > { %3042 = vmatpush.bf16.xpose.msra.mxu0 %v2979_v22  ;;  %3061 = vmatpush.bf16.xpose.msra.mxu1 %v2980_v15  ;;  %4074 = vrcp.f32 %v2818_v8 }
 0x605   : > { %v4069_v38 = vpop.eup %4068 }
 0x606   : > { %v4071_v13 = vpop.eup %4070  ;;  %v2929_v41 = vmul.f32 %v4069_v38, %v5844_v24  ;;  %v2930_v34 = vmul.f32 %v4069_v38, %v5846_v58  ;;  %v2809_v56 = vpop.xlane.xlu1 %2808  ;;  %v6185_v58 = vld [vmem:[#allocation33_spill] sm:$0xff] }
 0x607   : > { %v2927_v55 = vmul.f32 %v4071_v13, %v5812_v47  ;;  %v2928_v39 = vmul.f32 %v4071_v13, %v5820_v26  ;;  %v2812_v32 = vpop.xlane.xlu2 %2811  ;;  %v4073_v22 = vpop.eup %4072 }
 0x608   : > { %4076 = vrcp.f32 %v2812_v32  ;;  %v4075_v15 = vpop.eup %4074  ;;  %v2923_v61 = vmul.f32 %v4073_v22, %v5840_v49  ;;  %v2924_v24 = vmul.f32 %v4073_v22, %v5842_v57 }
 0x609   : > { %3016 = vmatmul.bf16.gmra.mxu0 %v5914_v40  ;;  %3035 = vmatmul.bf16.gmra.mxu1 %v5916_v33  ;;  %v2971_v50 = vpack.c.bf16 %v2929_v41, %v2927_v55  ;;  %v2972_v31 = vpack.c.bf16 %v2930_v34, %v2928_v39  ;;  %4078 = vrcp.f32 %v2809_v56  ;;  %v2925_v63 = vmul.f32 %v4075_v15, %v6185_v58 }
 0x60a   : > { %3043 = vmatpush.bf16.xpose.msra.mxu0 %v2977_v53  ;;  %3062 = vmatpush.bf16.xpose.msra.mxu1 %v2978_v54  ;;  %v2926_v47 = vmul.f32 %v4075_v15, %v6186_v60 }
 0x60b   : > { %v2969_v26 = vpack.c.bf16 %v2925_v63, %v2923_v61 }
 0x60c   : > { %v2970_v42 = vpack.c.bf16 %v2926_v47, %v2924_v24 }
 0x60e   : > { %v4077_v29 = vpop.eup %4076 }
 0x60f   : > { %v4079_v48 = vpop.eup %4078  ;;  %v2921_v62 = vmul.f32 %v4077_v29, %v5863_v46  ;;  %v2922_v49 = vmul.f32 %v4077_v29, %v5866_v19 }
 0x610   : > { %v2919_v4 = vmul.f32 %v4079_v48, %v5858_v43  ;;  %v2920_v35 = vmul.f32 %v4079_v48, %v5861_v37 }
 0x612   : > { %3044 = vmatpush.bf16.xpose.msra.mxu0 %v2975_v7  ;;  %3063 = vmatpush.bf16.xpose.msra.mxu1 %v2976_v28  ;;  %v2967_v25 = vpack.c.bf16 %v2921_v62, %v2919_v4  ;;  %v2968_v57 = vpack.c.bf16 %v2922_v49, %v2920_v35 }
 0x61a   : > { %3045 = vmatpush.bf16.xpose.msra.mxu0 %v2973_v6  ;;  %3064 = vmatpush.bf16.xpose.msra.mxu1 %v2974_v30 }
 0x622   : > { %3046 = vmatpush.bf16.xpose.msra.mxu0 %v2971_v50  ;;  %3065 = vmatpush.bf16.xpose.msra.mxu1 %v2972_v31 }
 0x62a   : > { %3047 = vmatpush.bf16.xpose.msra.mxu0 %v2969_v26  ;;  %3066 = vmatpush.bf16.xpose.msra.mxu1 %v2970_v42 }
 0x632   : > { %3048 = vmatpush.bf16.xpose.msra.mxu0 %v2967_v25  ;;  %3067 = vmatpush.bf16.xpose.msra.mxu1 %v2968_v57 }
 0x639   : > { %3049 = vmatmul.bf16.vlgmr.msra.gmra.mxu0 %v5900_v17  ;;  %3068 = vmatmul.bf16.vlgmr.msra.gmra.mxu1 %v5902_v20 }
 0x649   : > { %3054 = vmatmul.bf16.gmra.mxu0 %v5914_v40  ;;  %3073 = vmatmul.bf16.gmra.mxu1 %v5916_v33 }
 0x676   : > { %v3012_v43 = vpop.f32.mrf.mxu0  ;;  %v3031_v53 = vpop.f32.mrf.mxu1 }
 0x677   : > { %v3032_v0 = vadd.f32 %v3031_v53, %v3012_v43 }
 0x67e   : > { %v3014_v46 = vpop.f32.mrf.mxu0  ;;  %v3033_v54 = vpop.f32.mrf.mxu1 }
 0x67f   : > { %v3034_v12 = vadd.f32 %v3033_v54, %v3014_v46 }
 0x686   : > { %v3017_v37 = vpop.f32.mrf.mxu0  ;;  %v3036_v9 = vpop.f32.mrf.mxu1 }
 0x687   : > { %v3037_v27 = vadd.f32 %v3036_v9, %v3017_v37 }
 0x68e   : > { %v3019_v19 = vpop.f32.mrf.mxu0  ;;  %v3038_v3 = vpop.f32.mrf.mxu1 }
 0x68f   : > { %v3039_v28 = vadd.f32 %v3038_v3, %v3019_v19 }
 0x6b6   : > { %v3050_v1 = vpop.f32.mrf.mxu0  ;;  %v3069_v21 = vpop.f32.mrf.mxu1 }
 0x6b7   : > { %v3070_v16 = vadd.f32 %v3069_v21, %v3050_v1 }
 0x6b9   : > { %v3079_v17 = vpack.c.bf16 %v3070_v16, %v3032_v0 }
 0x6bb   : > { %3088 = vst [vmem:[%s3087_s7] sm:$0xff] %v3079_v17 }
 0x6be   : > { %v3052_v20 = vpop.f32.mrf.mxu0  ;;  %v3071_v23 = vpop.f32.mrf.mxu1 }
 0x6bf   : > { %v3072_v45 = vadd.f32 %v3071_v23, %v3052_v20 }
 0x6c1   : > { %v3080_v40 = vpack.c.bf16 %v3072_v45, %v3034_v12 }
 0x6c3   : > { %3089 = vst [vmem:[%s3087_s7 + $0x8] sm:$0xff] %v3080_v40 }
 0x6c6   : > { %v3055_v33 = vpop.f32.mrf.mxu0  ;;  %v3074_v44 = vpop.f32.mrf.mxu1 }
 0x6c7   : > { %v3075_v36 = vadd.f32 %v3074_v44, %v3055_v33 }
 0x6c9   : > { %v3081_v14 = vpack.c.bf16 %v3075_v36, %v3037_v27 }
 0x6cb   : > { %3090 = vst [vmem:[%s3087_s7 + $0x10] sm:$0xff] %v3081_v14 }
 0x6ce   : > { %v3057_v5 = vpop.f32.mrf.mxu0  ;;  %v3076_v7 = vpop.f32.mrf.mxu1 }
 0x6cf   : > { %v3077_v52 = vadd.f32 %v3076_v7, %v3057_v5  ;;  %3094 = sbr.rel (%p3620_p5) target bundleno = 1932 (0x78c), region = 56 }
 0x6d1   : > { %v3082_v59 = vpack.c.bf16 %v3077_v52, %v3039_v28 }
 0x6d3   : > { %3091 = vst [vmem:[%s3087_s7 + $0x18] sm:$0xff] %v3082_v59 }
 0x6d4   : > { %v4220_v50 = vmov 0   ;;  %v3259_v31 = vld [vmem:[%s6067_s3 + $0x10] sm:$0xff]  ;;  %v3257_v22 = vld [vmem:[%s6067_s3] sm:$0xff]  ;;  %v3260_v4 = vld [vmem:[%s6067_s3 + $0x18] sm:$0xff] }
 0x6d5   : > { %4081 = vset.pattern.permute.xlu1 %v4220_v50  ;;  %4080 = vset.pattern.permute.xlu0 %v4220_v50  ;;  %v3261_v47 = vld [vmem:[%s6067_s3 + $0x20] sm:$0xff]  ;;  %v3721_v48 = vld [vmem:[%s6066_s2 + $0x10] sm:$0xff]  ;;  %v3258_v62 = vld [vmem:[%s6067_s3 + $0x8] sm:$0xff] }
 0x6d6   : > { %3277 = vperm.xlu1 %4081, %v3259_v31   ;;  %3267 = vperm.xlu0 %4080, %v3257_v22   ;;  %v3719_v42 = vld [vmem:[%s6066_s2] sm:$0xff]  ;;  %v3262_v35 = vld [vmem:[%s6067_s3 + $0x28] sm:$0xff]  ;;  %v3264_v49 = vld [vmem:[%s6067_s3 + $0x38] sm:$0xff] }
 0x6d7   : > { %4082 = vset.pattern.permute.xlu2 %v4220_v50  ;;  %v3263_v25 = vld [vmem:[%s6067_s3 + $0x30] sm:$0xff]  ;;  %v3720_v57 = vld [vmem:[%s6066_s2 + $0x8] sm:$0xff]  ;;  %v3722_v43 = vld [vmem:[%s6066_s2 + $0x18] sm:$0xff] }
 0x6d8   : > { %3287 = vperm.xlu2 %4082, %v3261_v47   ;;  %v3241_v46 = vld [vmem:[%s4349_s19] sm:$0xff]  ;;  %v3242_v54 = vld [vmem:[%s4349_s19 + $0x8] sm:$0xff]  ;;  %v3243_v20 = vld [vmem:[%s4349_s19 + $0x10] sm:$0xff] }
 0x6d9   : > { %v3249_v1 = vld [vmem:[%s4349_s19 + $0x40] sm:$0xff]  ;;  %v3250_v16 = vld [vmem:[%s4349_s19 + $0x48] sm:$0xff]  ;;  %v3244_v12 = vld [vmem:[%s4349_s19 + $0x18] sm:$0xff] }
 0x6da   : > { %v3663_v2 = vld [vmem:[#allocation3 + $0x30] sm:$0xf]  ;;  %v3718_v11 = vld [vmem:[#allocation3 + $0x34] sm:$0xf0]  ;;  %v3717_v10 = vld [vmem:[#allocation3 + $0x34] sm:$0xf] }
 0x6db   : > { %v3664_v51 = vor.u32 %v3718_v11, %v3663_v2  ;;  %v3665_v18 = vld [vmem:[#allocation3 + $0x38] sm:$0xf0]  ;;  %v3655_v6 = vld [vmem:[#allocation3 + $0x20] sm:$0xf]  ;;  %v3716_v30 = vld [vmem:[#allocation3 + $0x24] sm:$0xf0] }
 0x6dc   : > { %v3668_v38 = vor.u32 %v3717_v10, %v3665_v18  ;;  %v3715_v8 = vld [vmem:[#allocation3 + $0x24] sm:$0xf]  ;;  %v3657_v13 = vld [vmem:[#allocation3 + $0x28] sm:$0xf0]  ;;  %v3656_v41 = vor.u32 %v3716_v30, %v3655_v6  ;;  %v3647_v55 = vld [vmem:[#allocation3 + $0x10] sm:$0xf] }
 0x6dd   : > { %3187 = vmatpush.bf16.msra.mxu0 %v3664_v51  ;;  %3724 = vmatpush.bf16.msra.mxu2 %v3664_v51  ;;  %v3660_v34 = vor.u32 %v3715_v8, %v3657_v13  ;;  %v3714_v39 = vld [vmem:[#allocation3 + $0x14] sm:$0xf0]  ;;  %v3713_v32 = vld [vmem:[#allocation3 + $0x14] sm:$0xf]  ;;  %v3649_v56 = vld [vmem:[#allocation3 + $0x18] sm:$0xf0] }
 0x6de   : > { %3216 = vmatpush.bf16.msra.mxu1 %v3668_v38  ;;  %3728 = vmatpush.bf16.msra.mxu3 %v3668_v38  ;;  %v3648_v15 = vor.u32 %v3714_v39, %v3647_v55  ;;  %v3652_v61 = vor.u32 %v3713_v32, %v3649_v56  ;;  %v3639_v24 = vld [vmem:[#allocation3] sm:$0xf]  ;;  %v3712_v58 = vld [vmem:[#allocation3 + $0x4] sm:$0xf0]  ;;  %v3711_v63 = vld [vmem:[#allocation3 + $0x4] sm:$0xf] }
 0x6df   : > { %v3641_v60 = vld [vmem:[#allocation3 + $0x8] sm:$0xf0]  ;;  %v3640_v29 = vor.u32 %v3712_v58, %v3639_v24  ;;  %3282 = vperm.xlu1 %4081, %v3260_v4   ;;  %3272 = vperm.xlu0 %4080, %v3258_v62   ;;  %v3251_v59 = vld [vmem:[%s4349_s19 + $0x50] sm:$0xff]  ;;  %v3252_v10 = vld [vmem:[%s4349_s19 + $0x58] sm:$0xff] }
 0x6e0   : > { %v3644_v26 = vor.u32 %v3711_v63, %v3641_v60  ;;  %3292 = vperm.xlu2 %4082, %v3262_v35   ;;  %v3245_v6 = vld [vmem:[%s4349_s19 + $0x20] sm:$0xff]  ;;  %v3246_v38 = vld [vmem:[%s4349_s19 + $0x28] sm:$0xff]  ;;  %v3247_v58 = vld [vmem:[%s4349_s19 + $0x30] sm:$0xff] }
 0x6e1   : > { %3188 = vmatpush.bf16.msra.mxu0 %v3656_v41  ;;  %3725 = vmatpush.bf16.msra.mxu2 %v3656_v41  ;;  %v3254_v24 = vld [vmem:[%s4349_s19 + $0x68] sm:$0xff]  ;;  %v3248_v63 = vld [vmem:[%s4349_s19 + $0x38] sm:$0xff] }
 0x6e2   : > { %3217 = vmatpush.bf16.msra.mxu1 %v3660_v34  ;;  %3729 = vmatpush.bf16.msra.mxu3 %v3660_v34 }
 0x6e5   : > { %3189 = vmatpush.bf16.msra.mxu0 %v3648_v15  ;;  %3726 = vmatpush.bf16.msra.mxu2 %v3648_v15  ;;  %v3253_v15 = vld [vmem:[%s4349_s19 + $0x60] sm:$0xff] }
 0x6e6   : > { %3218 = vmatpush.bf16.msra.mxu1 %v3652_v61  ;;  %3730 = vmatpush.bf16.msra.mxu3 %v3652_v61 }
 0x6e7   : > { %3302 = vperm.xlu1 %4081, %v3264_v49   ;;  %3297 = vperm.xlu0 %4080, %v3263_v25  }
 0x6e9   : > { %3190 = vmatpush.bf16.msra.mxu0 %v3640_v29  ;;  %3727 = vmatpush.bf16.msra.mxu2 %v3640_v29 }
 0x6ea   : > { %3219 = vmatpush.bf16.msra.mxu1 %v3644_v26  ;;  %3731 = vmatpush.bf16.msra.mxu3 %v3644_v26 }
 0x6ec   : > { %3669 = vmatmul.msk.bf16.vlgmr.msra.gmra.mxu0 %vm2045_vm5, %v3719_v42  ;;  %3671 = vmatmul.msk.bf16.vlgmr.msra.gmra.mxu2 %vm2045_vm5, %v3721_v48 }
 0x6ed   : > { %3673 = vmatmul.msk.bf16.vlgmr.msra.gmra.mxu1 %vm2045_vm5, %v3719_v42  ;;  %3675 = vmatmul.msk.bf16.vlgmr.msra.gmra.mxu3 %vm2045_vm5, %v3721_v48 }
 0x6fc   : > { %3670 = vmatmul.msk.bf16.gmra.mxu0 %vm2045_vm5, %v3720_v57  ;;  %3672 = vmatmul.msk.bf16.gmra.mxu2 %vm2045_vm5, %v3722_v43 }
 0x6fd   : > { %3674 = vmatmul.msk.bf16.gmra.mxu1 %vm2045_vm5, %v3720_v57  ;;  %3676 = vmatmul.msk.bf16.gmra.mxu3 %vm2045_vm5, %v3722_v43  ;;  %v3255_v43 = vld [vmem:[%s4349_s19 + $0x70] sm:$0xff] }
 0x732   : > { %v3288_v19 = vpop.permute.xlu2 %3287 }
 0x733   : > { %v3313_v23 = vadd.f32 %v3288_v19, %v3249_v1  ;;  %v3314_v45 = vadd.f32 %v3288_v19, %v3250_v16 }
 0x73a   : > { %v3293_v52 = vpop.permute.xlu2 %3292 }
 0x73b   : > { %v3315_v18 = vadd.f32 %v3293_v52, %v3251_v59  ;;  %v3316_v30 = vadd.f32 %v3293_v52, %v3252_v10 }
 0x748   : > { %v3268_v53 = vpop.permute.xlu0 %3267  ;;  %v3278_v44 = vpop.permute.xlu1 %3277 }
 0x749   : > { %v3305_v37 = vadd.f32 %v3268_v53, %v3241_v46  ;;  %v3306_v9 = vadd.f32 %v3268_v53, %v3242_v54  ;;  %v3309_v13 = vadd.f32 %v3278_v44, %v3245_v6  ;;  %v3310_v55 = vadd.f32 %v3278_v44, %v3246_v38  ;;  %v3256_v46 = vld [vmem:[%s4349_s19 + $0x78] sm:$0xff] }
 0x751   : > { %v3273_v40 = vpop.permute.xlu0 %3272  ;;  %v3283_v39 = vpop.permute.xlu1 %3282 }
 0x752   : > { %v3307_v33 = vadd.f32 %v3273_v40, %v3243_v20  ;;  %v3308_v27 = vadd.f32 %v3273_v40, %v3244_v12  ;;  %v3311_v26 = vadd.f32 %v3283_v39, %v3247_v58  ;;  %v3312_v4 = vadd.f32 %v3283_v39, %v3248_v63 }
 0x759   : > { %v3298_v22 = vpop.permute.xlu0 %3297  ;;  %v3303_v57 = vpop.permute.xlu1 %3302 }
 0x75a   : > { %v3317_v60 = vadd.f32 %v3298_v22, %v3253_v15  ;;  %v3318_v47 = vadd.f32 %v3298_v22, %v3254_v24  ;;  %v3319_v54 = vadd.f32 %v3303_v57, %v3255_v43 }
 0x769   : > { %v3192_v3 = vpop.f32.mrf.mxu0 }
 0x76a   : > { %v3321_v21 = vadd.f32 %v3305_v37, %v3192_v3  ;;  %v3221_v0 = vpop.f32.mrf.mxu1  ;;  %v3320_v37 = vadd.f32 %v3303_v57, %v3256_v46 }
 0x76b   : > { %v3322_v17 = vadd.f32 %v3306_v9, %v3221_v0 }
 0x76c   : > { %3337 = vst [vmem:[%s4355_s10] sm:$0xff] %v3321_v21 }
 0x76d   : > { %3338 = vst [vmem:[%s4355_s10 + $0x8] sm:$0xff] %v3322_v17 }
 0x76f   : > { %v3202_v36 = vpop.f32.mrf.mxu2 }
 0x770   : > { %v3329_v14 = vadd.f32 %v3313_v23, %v3202_v36  ;;  %v3231_v5 = vpop.f32.mrf.mxu3 }
 0x771   : > { %v3330_v7 = vadd.f32 %v3314_v45, %v3231_v5  ;;  %v3194_v28 = vpop.f32.mrf.mxu0 }
 0x772   : > { %3345 = vst [vmem:[%s4355_s10 + $0x40] sm:$0xff] %v3329_v14  ;;  %v3323_v2 = vadd.f32 %v3307_v33, %v3194_v28  ;;  %v3223_v11 = vpop.f32.mrf.mxu1 }
 0x773   : > { %3346 = vst [vmem:[%s4355_s10 + $0x48] sm:$0xff] %v3330_v7  ;;  %v3324_v51 = vadd.f32 %v3308_v27, %v3223_v11 }
 0x774   : > { %3339 = vst [vmem:[%s4355_s10 + $0x10] sm:$0xff] %v3323_v2 }
 0x775   : > { %3340 = vst [vmem:[%s4355_s10 + $0x18] sm:$0xff] %v3324_v51 }
 0x777   : > { %v3204_v8 = vpop.f32.mrf.mxu2 }
 0x778   : > { %v3331_v41 = vadd.f32 %v3315_v18, %v3204_v8  ;;  %v3233_v34 = vpop.f32.mrf.mxu3 }
 0x779   : > { %v3332_v32 = vadd.f32 %v3316_v30, %v3233_v34  ;;  %v3197_v56 = vpop.f32.mrf.mxu0 }
 0x77a   : > { %3347 = vst [vmem:[%s4355_s10 + $0x50] sm:$0xff] %v3331_v41  ;;  %v3325_v50 = vadd.f32 %v3309_v13, %v3197_v56  ;;  %v3226_v31 = vpop.f32.mrf.mxu1 }
 0x77b   : > { %3348 = vst [vmem:[%s4355_s10 + $0x58] sm:$0xff] %v3332_v32  ;;  %v3326_v61 = vadd.f32 %v3310_v55, %v3226_v31 }
 0x77c   : > { %3341 = vst [vmem:[%s4355_s10 + $0x20] sm:$0xff] %v3325_v50 }
 0x77d   : > { %3342 = vst [vmem:[%s4355_s10 + $0x28] sm:$0xff] %v3326_v61 }
 0x77f   : > { %v3207_v29 = vpop.f32.mrf.mxu2 }
 0x780   : > { %v3333_v42 = vadd.f32 %v3317_v60, %v3207_v29  ;;  %v3236_v48 = vpop.f32.mrf.mxu3 }
 0x781   : > { %v3334_v62 = vadd.f32 %v3318_v47, %v3236_v48  ;;  %v3199_v35 = vpop.f32.mrf.mxu0 }
 0x782   : > { %3349 = vst [vmem:[%s4355_s10 + $0x60] sm:$0xff] %v3333_v42  ;;  %v3327_v49 = vadd.f32 %v3311_v26, %v3199_v35  ;;  %v3228_v25 = vpop.f32.mrf.mxu1 }
 0x783   : > { %3350 = vst [vmem:[%s4355_s10 + $0x68] sm:$0xff] %v3334_v62  ;;  %v3328_v53 = vadd.f32 %v3312_v4, %v3228_v25 }
 0x784   : > { %3343 = vst [vmem:[%s4355_s10 + $0x30] sm:$0xff] %v3327_v49 }
 0x785   : > { %3344 = vst [vmem:[%s4355_s10 + $0x38] sm:$0xff] %v3328_v53 }
 0x787   : > { %v3209_v9 = vpop.f32.mrf.mxu2 }
 0x788   : > { %v3335_v19 = vadd.f32 %v3319_v54, %v3209_v9  ;;  %v3238_v3 = vpop.f32.mrf.mxu3 }
 0x789   : > { %v3336_v1 = vadd.f32 %v3320_v37, %v3238_v3 }
 0x78a   : > { %3351 = vst [vmem:[%s4355_s10 + $0x70] sm:$0xff] %v3335_v19 }
 0x78b   : > { %3352 = vst [vmem:[%s4355_s10 + $0x78] sm:$0xff] %v3336_v1 }
 0x78c PF: > { %s3723_s26 = sshll.u32 %s4199_s25, 7  ;;  %s3366_s8 = sshll.u32 %s4355_s10, 4  ;;  %s3367_s8 = int_to_ptr.vmem [resolvable:$true] %s3366_s8 }
 0x78d   : > { %s3365_s19 = scalar_lea.hbm %s6070_s6, %s3723_s26  ;;  %s3354_s14 = scalar_lea.sflag [#allocation7], %s4345_s9 }
 0x78e   : > { %s3368_s11 = sshll.u32 %s3365_s19, 4  ;;  %s4133_s25 = scalar_lea.hbm %s6070_s6, 256  ;;  %s3369_s11 = int_to_ptr.hbm [resolvable:$true] %s3368_s11 }
 0x78f   : > { %s4127_s15 = sshra.s32 %s3369_s11, 4  ;;  %s4128_s15 = int_to_ptr.hbm [resolvable:$true] %s4127_s15 }
 0x790   : > { %s4129_s20 = scalar_lea.hbm %s4128_s15, 128  ;;  %p4134_p9 = scmp.lt.s32.totalorder %s4128_s15, %s6070_s6 }
 0x791   : > { %p4130_p6 = scmp.ne.s32.totalorder %s4128_s15, %s4129_s20  ;;  %p4135_p12 = scmp.lt.s32.totalorder %s4133_s25, %s4129_s20 }
 0x793   : > { %p4131_p7 = pnand %p4130_p6, %p4321_p10  ;;  %p4136_p13 = por %p4135_p12, %p4134_p9 }
 0x795   : > { %p4132_p8 = pneg %p4131_p7 }
 0x797   : > { %p4137_p0 = pnand %p4136_p13, %p4132_p8 }
 0x799   : > { %4140 = shalt.err (!%p4137_p0)
}
 0x79a   : > { %s4221_s9 = smov 256   ;;  %s4222_s10 = smov 16  }
 0x79b   : > { %3734 = dma.vmem_to_hbm [thread:$0]  (%p4321_p10), %s3367_s8, 2048, %s3369_s11, %s3354_s14, %s4221_s9, %s4221_s9, %s4222_s10  }
 0x79c PF: > { %p3745_p1 = scmp.ge.s32.totalorder %s4211_s28, 2  ;;  %s3383_s26 = sand.u32 1, %s4183_s21  }
 0x79d   : > { %s3384_s7 = scalar_lea.sflag [#allocation7], %s3383_s26 }
 0x79e   : > { %p3741_p2 = pnand %p3745_p1, %p4327_p11 }
 0x7a0   : > { %p3742_p4 = pneg %p3741_p2 }
 0x7a2   : > { %4178 = dma.done.wait (%p3742_p4), %s3384_s7, 2048  }
 0x7a3   : > { %4180 = vsyncadd (%p3742_p4), %s3384_s7, 4294965248  ;;  %s22_s28 = sadd.s32 1, %s4211_s28   ;;  %s6188_s24 = sld [smem:[#allocation11_spill]] }
 0x7a4   : > { %p19_p3 = scmp.ge.s32.totalorder %s22_s28, 6   ;;  %s6189_s26 = sld [smem:[#allocation12_spill]] }
 0x7a5   : > { %s6190_s12 = sld [smem:[#allocation13_spill]]  ;;  %s6191_s21 = smov %s4187_s22 }
 0x7a6   : > { %s6192_s22 = smov %s4191_s23  ;;  %s6193_s23 = smov %s4334_s16 }
 0x7a7   : > { %s6194_s25 = smov %s4207_s27  ;;  %21 = sbr.rel (!%p19_p3) target bundleno = 7 (0x7), region = 113 }
 0x7ab   : > { %s6195_s27 = smov %s6190_s12 }
 0x7ac   :  { %3390 = vsyncpa [#allocation6], 1 }
 0x7ad   :  { %3392 = vsyncpa [#allocation6 + $0x1], 1 }
 0x7ae   :  { %3393 = vsyncpa [#allocation7], 1 }
 0x7af   :  { %3395 = vsyncpa [#allocation7 + $0x1], 1 }

</bundles_post_ra>
